<compile_context>
chip_gen: v6e
topology: v6e:2x2x1
jax: 0.10.0
libtpu: 0.0.40
codegen_flags: <defaults>
</compile_context>

<pallas_src>
import functools

import jax
import jax.numpy as jnp
from jax import lax
from jax.experimental import pallas as pl
from jax.experimental.pallas import tpu as pltpu


def _round_up(x, m):
    return ((x + m - 1) // m) * m


# ---------------------------------------------------------------------------
# In-kernel convolution of one padded NHWC image block.
# ---------------------------------------------------------------------------
def _conv_image(x_ref, w_ref, *, ksize, stride, ho, wo, c_in):
    """x_ref: (1, Hp, Wp, C_in) bf16,  w_ref: (k, k, C_in, Cp) bf16.

    Returns the conv output for this image as (Ho*Wo, Cp) float32,
    built as ksize*ksize accumulated MXU matmuls (no im2col in HBM).
    """
    x_img = x_ref[0]                                    # (Hp, Wp, C_in)
    cp = w_ref.shape[-1]
    acc = jnp.zeros((ho * wo, cp), jnp.float32)
    for kh in range(ksize):
        for kw in range(ksize):
            if stride == 1:
                patch = x_img[kh:kh + ho, kw:kw + wo, :]
            else:
                patch = lax.slice(
                    x_img,
                    (kh, kw, 0),
                    (kh + (ho - 1) * stride + 1,
                     kw + (wo - 1) * stride + 1,
                     c_in),
                    (stride, stride, 1))
            lhs = patch.reshape(ho * wo, c_in)          # (Ho*Wo, C_in)
            acc = acc + jnp.dot(lhs, w_ref[kh, kw],
                                preferred_element_type=jnp.float32)
    return acc


# ---------------------------------------------------------------------------
# Pass 1: per-image partial BN statistics.
# ---------------------------------------------------------------------------
def _stats_kernel(x_ref, w_ref, stat_ref, *, ksize, stride, ho, wo, c_in):
    y = _conv_image(x_ref, w_ref, ksize=ksize, stride=stride,
                    ho=ho, wo=wo, c_in=c_in)            # (Ho*Wo, Cp) f32
    stat_ref[...] = jnp.zeros_like(stat_ref)
    stat_ref[0, 0:1, :] = jnp.sum(y, axis=0, keepdims=True)        # sum(y)
    stat_ref[0, 1:2, :] = jnp.sum(y * y, axis=0, keepdims=True)    # sum(y*y)


# ---------------------------------------------------------------------------
# Pass 2: conv -> folded BN (scale, shift) -> SiLU.
# ---------------------------------------------------------------------------
def _apply_kernel(x_ref, w_ref, affine_ref, out_ref, *, ksize, stride,
                  ho, wo, c_in):
    y = _conv_image(x_ref, w_ref, ksize=ksize, stride=stride,
                    ho=ho, wo=wo, c_in=c_in)            # (Ho*Wo, Cp) f32
    scale = affine_ref[0:1, :]                          # (1, Cp)
    shift = affine_ref[1:2, :]                          # (1, Cp)
    y_hat = y * scale + shift
    # SiLU: x * sigmoid(x); sigmoid via tanh -> a single EUP op per element.
    sig = 0.5 * (jnp.tanh(0.5 * y_hat) + 1.0)
    out_ref[0] = (y_hat * sig).astype(out_ref.dtype)


# ---------------------------------------------------------------------------
# Host-side wrapper.
# ---------------------------------------------------------------------------
@functools.partial(
    jax.jit,
    static_argnames=("ksize", "stride", "padding", "eps",
                     "compute_dtype", "out_dtype"))
def cbl_forward(x_nchw, conv_w, bn_gamma, bn_beta, *, ksize, stride, padding,
                eps=1e-3, compute_dtype=jnp.bfloat16, out_dtype=jnp.float32):
    """CBL forward: conv(bias=False) -> BatchNorm2d(batch stats) -> SiLU.

    x_nchw : (N, C_in, H, W)        conv_w : (C_out, C_in, kH, kW)
    returns: (N, C_out, Ho, Wo) in `out_dtype`
    """
    n, c_in, h, w = x_nchw.shape
    c_out = conv_w.shape[0]
    ho = (h + 2 * padding - ksize) // stride + 1
    wo = (w + 2 * padding - ksize) // stride + 1
    hp, wp = h + 2 * padding, w + 2 * padding
    cp = _round_up(c_out, 128)                  # lane-dense output channels
    m_total = n * ho * wo

    # NCHW -> NHWC (bf16), zero-pad spatially so the conv padding is implicit.
    x_nhwc = jnp.transpose(x_nchw, (0, 2, 3, 1)).astype(compute_dtype)
    x_pad = jnp.pad(x_nhwc,
                    ((0, 0), (padding, padding), (padding, padding), (0, 0)))

    # (C_out, C_in, kH, kW) -> (kH, kW, C_in, Cp), padded channels are zero.
    w4 = jnp.transpose(conv_w, (2, 3, 1, 0)).astype(compute_dtype)
    w4 = jnp.pad(w4, ((0, 0), (0, 0), (0, 0), (0, cp - c_out)))

    itemsize = jnp.dtype(compute_dtype).itemsize
    k_eff = ksize * ksize * c_in
    conv_flops = 2 * m_total * k_eff * cp

    x_spec = pl.BlockSpec((1, hp, wp, c_in), lambda b: (b, 0, 0, 0))
    w_spec = pl.BlockSpec((ksize, ksize, c_in, cp), lambda b: (0, 0, 0, 0))

    # -------------------- pass 1: per-image partial statistics -------------
    stats_kernel = functools.partial(_stats_kernel, ksize=ksize, stride=stride,
                                     ho=ho, wo=wo, c_in=c_in)
    stats = pl.pallas_call(
        stats_kernel,
        out_shape=jax.ShapeDtypeStruct((n, 8, cp), jnp.float32),
        grid_spec=pltpu.PrefetchScalarGridSpec(
            num_scalar_prefetch=0,
            grid=(n,),
            in_specs=[x_spec, w_spec],
            out_specs=pl.BlockSpec((1, 8, cp), lambda b: (b, 0, 0)),
        ),
        compiler_params=pltpu.CompilerParams(
            dimension_semantics=("parallel",)),
        cost_estimate=pl.CostEstimate(
            flops=conv_flops,
            transcendentals=0,
            bytes_accessed=(x_pad.size * itemsize + w4.size * itemsize
                            + n * 8 * cp * 4)),
    )(x_pad, w4)

    # -------------------- fold BN scale / shift (tiny, host-side) ----------
    stat_sum = jnp.sum(stats[:, 0, :], axis=0)          # (Cp,)
    stat_sq = jnp.sum(stats[:, 1, :], axis=0)           # (Cp,)
    mean = stat_sum / m_total
    var = jnp.maximum(stat_sq / m_total - mean * mean, 0.0)   # biased var
    inv_std = lax.rsqrt(var + jnp.float32(eps))
    gamma_p = jnp.pad(bn_gamma.astype(jnp.float32), (0, cp - c_out))
    beta_p = jnp.pad(bn_beta.astype(jnp.float32), (0, cp - c_out))
    scale = gamma_p * inv_std
    shift = beta_p - mean * scale
    affine = jnp.zeros((8, cp), jnp.float32).at[0].set(scale).at[1].set(shift)

    # -------------------- pass 2: conv + BN + SiLU --------------------------
    apply_kernel = functools.partial(_apply_kernel, ksize=ksize, stride=stride,
                                     ho=ho, wo=wo, c_in=c_in)
    out3d = pl.pallas_call(
        apply_kernel,
        out_shape=jax.ShapeDtypeStruct((n, ho * wo, cp), out_dtype),
        grid_spec=pltpu.PrefetchScalarGridSpec(
            num_scalar_prefetch=0,
            grid=(n,),
            in_specs=[x_spec, w_spec, pl.BlockSpec((8, cp), lambda b: (0, 0))],
            out_specs=pl.BlockSpec((1, ho * wo, cp), lambda b: (b, 0, 0)),
        ),
        compiler_params=pltpu.CompilerParams(
            dimension_semantics=("parallel",)),
        cost_estimate=pl.CostEstimate(
            flops=conv_flops + 4 * m_total * cp,
            transcendentals=m_total * cp,
            bytes_accessed=(x_pad.size * itemsize + w4.size * itemsize
                            + 8 * cp * 4
                            + n * ho * wo * cp * jnp.dtype(out_dtype).itemsize)),
    )(x_pad, w4, affine)

    # Tail kept only to match the PyTorch module's NCHW contract.
    out = out3d[:, :, :c_out].reshape(n, ho, wo, c_out)
    return jnp.transpose(out, (0, 3, 1, 2))


# ---------------------------------------------------------------------------
# Pure-JAX reference (sanity check only).
# ---------------------------------------------------------------------------
def _reference(x_nchw, conv_w, gamma, beta, ksize, stride, padding):
    y = lax.conv_general_dilated(
        x_nchw.astype(jnp.float32),
        conv_w.astype(jnp.float32),
        window_strides=(stride, stride),
        padding=[(padding, padding), (padding, padding)],
        dimension_numbers=("NCHW", "OIHW", "NCHW"),
    )
    mean = jnp.mean(y, axis=(0, 2, 3), keepdims=True)
    var = jnp.mean((y - mean) ** 2, axis=(0, 2, 3), keepdims=True)
    y_hat = (y - mean) * lax.rsqrt(var + 1e-3)
    y_hat = y_hat * gamma.reshape(1, -1, 1, 1) + beta.reshape(1, -1, 1, 1)
    return y_hat * jax.nn.sigmoid(y_hat)


if __name__ == "__main__":
    # CBL(in_channels=4, out_channels=8, kernel_size=3, stride=1, padding=1)
    # on a (2, 4, 16, 16) input.
    N, C_IN, H, W = 2, 4, 16, 16
    C_OUT, KSIZE, STRIDE = 8, 3, 1
    PAD = (KSIZE - 1) // 2

    key = jax.random.PRNGKey(0)
    kx, kw = jax.random.split(key)
    x = jax.random.normal(kx, (N, C_IN, H, W), dtype=jnp.float32)
    conv_w = 0.1 * jax.random.normal(kw, (C_OUT, C_IN, KSIZE, KSIZE),
                                     dtype=jnp.float32)
    gamma = jnp.ones((C_OUT,), dtype=jnp.float32)   # PyTorch BN default init
    beta = jnp.zeros((C_OUT,), dtype=jnp.float32)

    out = cbl_forward(x, conv_w, gamma, beta,
                      ksize=KSIZE, stride=STRIDE, padding=PAD)
    out = jax.block_until_ready(out)

    ref = _reference(x, conv_w, gamma, beta, KSIZE, STRIDE, PAD)
    assert out.shape == (N, C_OUT, H, W), out.shape
    # Loose tolerance: bf16 MXU operands (f32 accumulation) inside the kernel.
    err = float(jnp.max(jnp.abs(out - ref)))
    assert jnp.allclose(out, ref, atol=5e-2, rtol=5e-2), err
    print("KERNEL_OK")
</pallas_src>

<mosaic_0001>
module attributes {stable_mosaic.version = 11 : i64} {
  func.func @_apply_kernel(%arg0: i32, %arg1: memref<1x18x18x4xbf16, #tpu.memory_space<vmem>>, %arg2: memref<3x3x4x128xbf16, #tpu.memory_space<vmem>>, %arg3: memref<8x128xf32, #tpu.memory_space<vmem>>, %arg4: memref<1x256x128xf32, #tpu.memory_space<vmem>>) attributes {dimension_semantics = [#tpu.dimension_semantics<parallel>], iteration_bounds = array<i64: 2>, scalar_prefetch = 0 : i64, scratch_operands = 0 : i64, tpu.core_type = #tpu.core_type<tc>, window_params = [{transform_indices = @transform_0, window_bounds = array<i64: 1, 18, 18, 4>}, {pipeline_mode = #tpu.pipeline_mode<synchronous>, transform_indices = @transform_1, window_bounds = array<i64: 3, 3, 4, 128>}, {pipeline_mode = #tpu.pipeline_mode<synchronous>, transform_indices = @transform_2, window_bounds = array<i64: 8, 128>}, {transform_indices = @transform_3, window_bounds = array<i64: 1, 256, 128>}]} {
    %c0 = arith.constant 0 : index
    %c0_0 = arith.constant 0 : index
    %c0_1 = arith.constant 0 : index
    %c0_2 = arith.constant 0 : index
    %0 = vector.load %arg1[%c0, %c0_0, %c0_1, %c0_2] : memref<1x18x18x4xbf16, #tpu.memory_space<vmem>>, vector<1x18x18x4xbf16>
    %1 = vector.shape_cast %0 : vector<1x18x18x4xbf16> to vector<18x18x4xbf16>
    %cst = arith.constant 0.000000e+00 : f32
    %2 = vector.broadcast %cst : f32 to vector<256x128xf32>
    %3 = vector.extract_strided_slice %1 {offsets = [0, 0, 0], sizes = [16, 16, 4], strides = [1, 1, 1]} : vector<18x18x4xbf16> to vector<16x16x4xbf16>
    %4 = vector.shape_cast %3 : vector<16x16x4xbf16> to vector<256x4xbf16>
    %c0_3 = arith.constant 0 : index
    %c0_4 = arith.constant 0 : index
    %c0_5 = arith.constant 0 : index
    %c0_6 = arith.constant 0 : index
    %5 = vector.load %arg2[%c0_3, %c0_4, %c0_5, %c0_6] : memref<3x3x4x128xbf16, #tpu.memory_space<vmem>>, vector<1x1x4x128xbf16>
    %6 = vector.shape_cast %5 : vector<1x1x4x128xbf16> to vector<4x128xbf16>
    %cst_7 = arith.constant dense<0.000000e+00> : vector<256x128xf32>
    %7 = tpu.matmul %4, %6, %cst_7 {dimension_numbers = #tpu.dot_dimension_numbers<[1], [0], [0], [1], [0, 0, 1, 1], [], []>} : vector<256x4xbf16>, vector<4x128xbf16>, vector<256x128xf32> -> vector<256x128xf32>
    %8 = arith.addf %2, %7 : vector<256x128xf32>
    %9 = vector.extract_strided_slice %1 {offsets = [0, 1, 0], sizes = [16, 16, 4], strides = [1, 1, 1]} : vector<18x18x4xbf16> to vector<16x16x4xbf16>
    %10 = vector.shape_cast %9 : vector<16x16x4xbf16> to vector<256x4xbf16>
    %c0_8 = arith.constant 0 : index
    %c1 = arith.constant 1 : index
    %c0_9 = arith.constant 0 : index
    %c0_10 = arith.constant 0 : index
    %11 = vector.load %arg2[%c0_8, %c1, %c0_9, %c0_10] : memref<3x3x4x128xbf16, #tpu.memory_space<vmem>>, vector<1x1x4x128xbf16>
    %12 = vector.shape_cast %11 : vector<1x1x4x128xbf16> to vector<4x128xbf16>
    %cst_11 = arith.constant dense<0.000000e+00> : vector<256x128xf32>
    %13 = tpu.matmul %10, %12, %cst_11 {dimension_numbers = #tpu.dot_dimension_numbers<[1], [0], [0], [1], [0, 0, 1, 1], [], []>} : vector<256x4xbf16>, vector<4x128xbf16>, vector<256x128xf32> -> vector<256x128xf32>
    %14 = arith.addf %8, %13 : vector<256x128xf32>
    %15 = vector.extract_strided_slice %1 {offsets = [0, 2, 0], sizes = [16, 16, 4], strides = [1, 1, 1]} : vector<18x18x4xbf16> to vector<16x16x4xbf16>
    %16 = vector.shape_cast %15 : vector<16x16x4xbf16> to vector<256x4xbf16>
    %c0_12 = arith.constant 0 : index
    %c2 = arith.constant 2 : index
    %c0_13 = arith.constant 0 : index
    %c0_14 = arith.constant 0 : index
    %17 = vector.load %arg2[%c0_12, %c2, %c0_13, %c0_14] : memref<3x3x4x128xbf16, #tpu.memory_space<vmem>>, vector<1x1x4x128xbf16>
    %18 = vector.shape_cast %17 : vector<1x1x4x128xbf16> to vector<4x128xbf16>
    %cst_15 = arith.constant dense<0.000000e+00> : vector<256x128xf32>
    %19 = tpu.matmul %16, %18, %cst_15 {dimension_numbers = #tpu.dot_dimension_numbers<[1], [0], [0], [1], [0, 0, 1, 1], [], []>} : vector<256x4xbf16>, vector<4x128xbf16>, vector<256x128xf32> -> vector<256x128xf32>
    %20 = arith.addf %14, %19 : vector<256x128xf32>
    %21 = vector.extract_strided_slice %1 {offsets = [1, 0, 0], sizes = [16, 16, 4], strides = [1, 1, 1]} : vector<18x18x4xbf16> to vector<16x16x4xbf16>
    %22 = vector.shape_cast %21 : vector<16x16x4xbf16> to vector<256x4xbf16>
    %c1_16 = arith.constant 1 : index
    %c0_17 = arith.constant 0 : index
    %c0_18 = arith.constant 0 : index
    %c0_19 = arith.constant 0 : index
    %23 = vector.load %arg2[%c1_16, %c0_17, %c0_18, %c0_19] : memref<3x3x4x128xbf16, #tpu.memory_space<vmem>>, vector<1x1x4x128xbf16>
    %24 = vector.shape_cast %23 : vector<1x1x4x128xbf16> to vector<4x128xbf16>
    %cst_20 = arith.constant dense<0.000000e+00> : vector<256x128xf32>
    %25 = tpu.matmul %22, %24, %cst_20 {dimension_numbers = #tpu.dot_dimension_numbers<[1], [0], [0], [1], [0, 0, 1, 1], [], []>} : vector<256x4xbf16>, vector<4x128xbf16>, vector<256x128xf32> -> vector<256x128xf32>
    %26 = arith.addf %20, %25 : vector<256x128xf32>
    %27 = vector.extract_strided_slice %1 {offsets = [1, 1, 0], sizes = [16, 16, 4], strides = [1, 1, 1]} : vector<18x18x4xbf16> to vector<16x16x4xbf16>
    %28 = vector.shape_cast %27 : vector<16x16x4xbf16> to vector<256x4xbf16>
    %c1_21 = arith.constant 1 : index
    %c1_22 = arith.constant 1 : index
    %c0_23 = arith.constant 0 : index
    %c0_24 = arith.constant 0 : index
    %29 = vector.load %arg2[%c1_21, %c1_22, %c0_23, %c0_24] : memref<3x3x4x128xbf16, #tpu.memory_space<vmem>>, vector<1x1x4x128xbf16>
    %30 = vector.shape_cast %29 : vector<1x1x4x128xbf16> to vector<4x128xbf16>
    %cst_25 = arith.constant dense<0.000000e+00> : vector<256x128xf32>
    %31 = tpu.matmul %28, %30, %cst_25 {dimension_numbers = #tpu.dot_dimension_numbers<[1], [0], [0], [1], [0, 0, 1, 1], [], []>} : vector<256x4xbf16>, vector<4x128xbf16>, vector<256x128xf32> -> vector<256x128xf32>
    %32 = arith.addf %26, %31 : vector<256x128xf32>
    %33 = vector.extract_strided_slice %1 {offsets = [1, 2, 0], sizes = [16, 16, 4], strides = [1, 1, 1]} : vector<18x18x4xbf16> to vector<16x16x4xbf16>
    %34 = vector.shape_cast %33 : vector<16x16x4xbf16> to vector<256x4xbf16>
    %c1_26 = arith.constant 1 : index
    %c2_27 = arith.constant 2 : index
    %c0_28 = arith.constant 0 : index
    %c0_29 = arith.constant 0 : index
    %35 = vector.load %arg2[%c1_26, %c2_27, %c0_28, %c0_29] : memref<3x3x4x128xbf16, #tpu.memory_space<vmem>>, vector<1x1x4x128xbf16>
    %36 = vector.shape_cast %35 : vector<1x1x4x128xbf16> to vector<4x128xbf16>
    %cst_30 = arith.constant dense<0.000000e+00> : vector<256x128xf32>
    %37 = tpu.matmul %34, %36, %cst_30 {dimension_numbers = #tpu.dot_dimension_numbers<[1], [0], [0], [1], [0, 0, 1, 1], [], []>} : vector<256x4xbf16>, vector<4x128xbf16>, vector<256x128xf32> -> vector<256x128xf32>
    %38 = arith.addf %32, %37 : vector<256x128xf32>
    %39 = vector.extract_strided_slice %1 {offsets = [2, 0, 0], sizes = [16, 16, 4], strides = [1, 1, 1]} : vector<18x18x4xbf16> to vector<16x16x4xbf16>
    %40 = vector.shape_cast %39 : vector<16x16x4xbf16> to vector<256x4xbf16>
    %c2_31 = arith.constant 2 : index
    %c0_32 = arith.constant 0 : index
    %c0_33 = arith.constant 0 : index
    %c0_34 = arith.constant 0 : index
    %41 = vector.load %arg2[%c2_31, %c0_32, %c0_33, %c0_34] : memref<3x3x4x128xbf16, #tpu.memory_space<vmem>>, vector<1x1x4x128xbf16>
    %42 = vector.shape_cast %41 : vector<1x1x4x128xbf16> to vector<4x128xbf16>
    %cst_35 = arith.constant dense<0.000000e+00> : vector<256x128xf32>
    %43 = tpu.matmul %40, %42, %cst_35 {dimension_numbers = #tpu.dot_dimension_numbers<[1], [0], [0], [1], [0, 0, 1, 1], [], []>} : vector<256x4xbf16>, vector<4x128xbf16>, vector<256x128xf32> -> vector<256x128xf32>
    %44 = arith.addf %38, %43 : vector<256x128xf32>
    %45 = vector.extract_strided_slice %1 {offsets = [2, 1, 0], sizes = [16, 16, 4], strides = [1, 1, 1]} : vector<18x18x4xbf16> to vector<16x16x4xbf16>
    %46 = vector.shape_cast %45 : vector<16x16x4xbf16> to vector<256x4xbf16>
    %c2_36 = arith.constant 2 : index
    %c1_37 = arith.constant 1 : index
    %c0_38 = arith.constant 0 : index
    %c0_39 = arith.constant 0 : index
    %47 = vector.load %arg2[%c2_36, %c1_37, %c0_38, %c0_39] : memref<3x3x4x128xbf16, #tpu.memory_space<vmem>>, vector<1x1x4x128xbf16>
    %48 = vector.shape_cast %47 : vector<1x1x4x128xbf16> to vector<4x128xbf16>
    %cst_40 = arith.constant dense<0.000000e+00> : vector<256x128xf32>
    %49 = tpu.matmul %46, %48, %cst_40 {dimension_numbers = #tpu.dot_dimension_numbers<[1], [0], [0], [1], [0, 0, 1, 1], [], []>} : vector<256x4xbf16>, vector<4x128xbf16>, vector<256x128xf32> -> vector<256x128xf32>
    %50 = arith.addf %44, %49 : vector<256x128xf32>
    %51 = vector.extract_strided_slice %1 {offsets = [2, 2, 0], sizes = [16, 16, 4], strides = [1, 1, 1]} : vector<18x18x4xbf16> to vector<16x16x4xbf16>
    %52 = vector.shape_cast %51 : vector<16x16x4xbf16> to vector<256x4xbf16>
    %c2_41 = arith.constant 2 : index
    %c2_42 = arith.constant 2 : index
    %c0_43 = arith.constant 0 : index
    %c0_44 = arith.constant 0 : index
    %53 = vector.load %arg2[%c2_41, %c2_42, %c0_43, %c0_44] : memref<3x3x4x128xbf16, #tpu.memory_space<vmem>>, vector<1x1x4x128xbf16>
    %54 = vector.shape_cast %53 : vector<1x1x4x128xbf16> to vector<4x128xbf16>
    %cst_45 = arith.constant dense<0.000000e+00> : vector<256x128xf32>
    %55 = tpu.matmul %52, %54, %cst_45 {dimension_numbers = #tpu.dot_dimension_numbers<[1], [0], [0], [1], [0, 0, 1, 1], [], []>} : vector<256x4xbf16>, vector<4x128xbf16>, vector<256x128xf32> -> vector<256x128xf32>
    %56 = arith.addf %50, %55 : vector<256x128xf32>
    %c0_46 = arith.constant 0 : index
    %c0_47 = arith.constant 0 : index
    %57 = vector.load %arg3[%c0_46, %c0_47] : memref<8x128xf32, #tpu.memory_space<vmem>>, vector<1x128xf32>
    %c1_48 = arith.constant 1 : index
    %c0_49 = arith.constant 0 : index
    %58 = vector.load %arg3[%c1_48, %c0_49] : memref<8x128xf32, #tpu.memory_space<vmem>>, vector<1x128xf32>
    %59 = vector.broadcast %57 : vector<1x128xf32> to vector<256x128xf32>
    %60 = arith.mulf %56, %59 : vector<256x128xf32>
    %61 = vector.broadcast %58 : vector<1x128xf32> to vector<256x128xf32>
    %62 = arith.addf %60, %61 : vector<256x128xf32>
    %cst_50 = arith.constant 5.000000e-01 : f32
    %63 = vector.broadcast %cst_50 : f32 to vector<256x128xf32>
    %64 = arith.mulf %63, %62 : vector<256x128xf32>
    %65 = math.tanh %64 : vector<256x128xf32>
    %cst_51 = arith.constant 1.000000e+00 : f32
    %66 = vector.broadcast %cst_51 : f32 to vector<256x128xf32>
    %67 = arith.addf %65, %66 : vector<256x128xf32>
    %cst_52 = arith.constant 5.000000e-01 : f32
    %68 = vector.broadcast %cst_52 : f32 to vector<256x128xf32>
    %69 = arith.mulf %68, %67 : vector<256x128xf32>
    %70 = arith.mulf %62, %69 : vector<256x128xf32>
    %c0_53 = arith.constant 0 : index
    %c0_54 = arith.constant 0 : index
    %c0_55 = arith.constant 0 : index
    %71 = vector.load %arg4[%c0_53, %c0_54, %c0_55] : memref<1x256x128xf32, #tpu.memory_space<vmem>>, vector<1x256x128xf32>
    %72 = vector.shape_cast %71 : vector<1x256x128xf32> to vector<256x128xf32>
    %73 = vector.shape_cast %70 : vector<256x128xf32> to vector<1x256x128xf32>
    tpu.vector_store %arg4[%c0_53, %c0_54, %c0_55], %73 {strides = array<i32>} : memref<1x256x128xf32, #tpu.memory_space<vmem>>, vector<1x256x128xf32>,
    return
  }
  func.func @transform_0(%arg0: i32) -> (i32, i32, i32, i32) {
    %c0_i32 = arith.constant 0 : i32
    %c0_i32_0 = arith.constant 0 : i32
    %c0_i32_1 = arith.constant 0 : i32
    %c0_i32_2 = arith.constant 0 : i32
    return %arg0, %c0_i32, %c0_i32_0, %c0_i32_1 : i32, i32, i32, i32
  }
  func.func @transform_1(%arg0: i32) -> (i32, i32, i32, i32) {
    %c0_i32 = arith.constant 0 : i32
    %c0_i32_0 = arith.constant 0 : i32
    %c0_i32_1 = arith.constant 0 : i32
    %c0_i32_2 = arith.constant 0 : i32
    %c0_i32_3 = arith.constant 0 : i32
    return %c0_i32, %c0_i32_0, %c0_i32_1, %c0_i32_2 : i32, i32, i32, i32
  }
  func.func @transform_2(%arg0: i32) -> (i32, i32) {
    %c0_i32 = arith.constant 0 : i32
    %c0_i32_0 = arith.constant 0 : i32
    %c0_i32_1 = arith.constant 0 : i32
    return %c0_i32, %c0_i32_0 : i32, i32
  }
  func.func @transform_3(%arg0: i32) -> (i32, i32, i32) {
    %c0_i32 = arith.constant 0 : i32
    %c0_i32_0 = arith.constant 0 : i32
    %c0_i32_1 = arith.constant 0 : i32
    return %arg0, %c0_i32, %c0_i32_0 : i32, i32, i32
  }
}

module attributes {stable_mosaic.version = 11 : i64} {
  func.func @_stats_kernel(%arg0: i32, %arg1: memref<1x18x18x4xbf16, #tpu.memory_space<vmem>>, %arg2: memref<3x3x4x128xbf16, #tpu.memory_space<vmem>>, %arg3: memref<1x8x128xf32, #tpu.memory_space<vmem>>) attributes {dimension_semantics = [#tpu.dimension_semantics<parallel>], iteration_bounds = array<i64: 2>, scalar_prefetch = 0 : i64, scratch_operands = 0 : i64, tpu.core_type = #tpu.core_type<tc>, window_params = [{transform_indices = @transform_0, window_bounds = array<i64: 1, 18, 18, 4>}, {pipeline_mode = #tpu.pipeline_mode<synchronous>, transform_indices = @transform_1, window_bounds = array<i64: 3, 3, 4, 128>}, {transform_indices = @transform_2, window_bounds = array<i64: 1, 8, 128>}]} {
    %c0 = arith.constant 0 : index
    %c0_0 = arith.constant 0 : index
    %c0_1 = arith.constant 0 : index
    %c0_2 = arith.constant 0 : index
    %0 = vector.load %arg1[%c0, %c0_0, %c0_1, %c0_2] : memref<1x18x18x4xbf16, #tpu.memory_space<vmem>>, vector<1x18x18x4xbf16>
    %1 = vector.shape_cast %0 : vector<1x18x18x4xbf16> to vector<18x18x4xbf16>
    %cst = arith.constant 0.000000e+00 : f32
    %2 = vector.broadcast %cst : f32 to vector<256x128xf32>
    %3 = vector.extract_strided_slice %1 {offsets = [0, 0, 0], sizes = [16, 16, 4], strides = [1, 1, 1]} : vector<18x18x4xbf16> to vector<16x16x4xbf16>
    %4 = vector.shape_cast %3 : vector<16x16x4xbf16> to vector<256x4xbf16>
    %c0_3 = arith.constant 0 : index
    %c0_4 = arith.constant 0 : index
    %c0_5 = arith.constant 0 : index
    %c0_6 = arith.constant 0 : index
    %5 = vector.load %arg2[%c0_3, %c0_4, %c0_5, %c0_6] : memref<3x3x4x128xbf16, #tpu.memory_space<vmem>>, vector<1x1x4x128xbf16>
    %6 = vector.shape_cast %5 : vector<1x1x4x128xbf16> to vector<4x128xbf16>
    %cst_7 = arith.constant dense<0.000000e+00> : vector<256x128xf32>
    %7 = tpu.matmul %4, %6, %cst_7 {dimension_numbers = #tpu.dot_dimension_numbers<[1], [0], [0], [1], [0, 0, 1, 1], [], []>} : vector<256x4xbf16>, vector<4x128xbf16>, vector<256x128xf32> -> vector<256x128xf32>
    %8 = arith.addf %2, %7 : vector<256x128xf32>
    %9 = vector.extract_strided_slice %1 {offsets = [0, 1, 0], sizes = [16, 16, 4], strides = [1, 1, 1]} : vector<18x18x4xbf16> to vector<16x16x4xbf16>
    %10 = vector.shape_cast %9 : vector<16x16x4xbf16> to vector<256x4xbf16>
    %c0_8 = arith.constant 0 : index
    %c1 = arith.constant 1 : index
    %c0_9 = arith.constant 0 : index
    %c0_10 = arith.constant 0 : index
    %11 = vector.load %arg2[%c0_8, %c1, %c0_9, %c0_10] : memref<3x3x4x128xbf16, #tpu.memory_space<vmem>>, vector<1x1x4x128xbf16>
    %12 = vector.shape_cast %11 : vector<1x1x4x128xbf16> to vector<4x128xbf16>
    %cst_11 = arith.constant dense<0.000000e+00> : vector<256x128xf32>
    %13 = tpu.matmul %10, %12, %cst_11 {dimension_numbers = #tpu.dot_dimension_numbers<[1], [0], [0], [1], [0, 0, 1, 1], [], []>} : vector<256x4xbf16>, vector<4x128xbf16>, vector<256x128xf32> -> vector<256x128xf32>
    %14 = arith.addf %8, %13 : vector<256x128xf32>
    %15 = vector.extract_strided_slice %1 {offsets = [0, 2, 0], sizes = [16, 16, 4], strides = [1, 1, 1]} : vector<18x18x4xbf16> to vector<16x16x4xbf16>
    %16 = vector.shape_cast %15 : vector<16x16x4xbf16> to vector<256x4xbf16>
    %c0_12 = arith.constant 0 : index
    %c2 = arith.constant 2 : index
    %c0_13 = arith.constant 0 : index
    %c0_14 = arith.constant 0 : index
    %17 = vector.load %arg2[%c0_12, %c2, %c0_13, %c0_14] : memref<3x3x4x128xbf16, #tpu.memory_space<vmem>>, vector<1x1x4x128xbf16>
    %18 = vector.shape_cast %17 : vector<1x1x4x128xbf16> to vector<4x128xbf16>
    %cst_15 = arith.constant dense<0.000000e+00> : vector<256x128xf32>
    %19 = tpu.matmul %16, %18, %cst_15 {dimension_numbers = #tpu.dot_dimension_numbers<[1], [0], [0], [1], [0, 0, 1, 1], [], []>} : vector<256x4xbf16>, vector<4x128xbf16>, vector<256x128xf32> -> vector<256x128xf32>
    %20 = arith.addf %14, %19 : vector<256x128xf32>
    %21 = vector.extract_strided_slice %1 {offsets = [1, 0, 0], sizes = [16, 16, 4], strides = [1, 1, 1]} : vector<18x18x4xbf16> to vector<16x16x4xbf16>
    %22 = vector.shape_cast %21 : vector<16x16x4xbf16> to vector<256x4xbf16>
    %c1_16 = arith.constant 1 : index
    %c0_17 = arith.constant 0 : index
    %c0_18 = arith.constant 0 : index
    %c0_19 = arith.constant 0 : index
    %23 = vector.load %arg2[%c1_16, %c0_17, %c0_18, %c0_19] : memref<3x3x4x128xbf16, #tpu.memory_space<vmem>>, vector<1x1x4x128xbf16>
    %24 = vector.shape_cast %23 : vector<1x1x4x128xbf16> to vector<4x128xbf16>
    %cst_20 = arith.constant dense<0.000000e+00> : vector<256x128xf32>
    %25 = tpu.matmul %22, %24, %cst_20 {dimension_numbers = #tpu.dot_dimension_numbers<[1], [0], [0], [1], [0, 0, 1, 1], [], []>} : vector<256x4xbf16>, vector<4x128xbf16>, vector<256x128xf32> -> vector<256x128xf32>
    %26 = arith.addf %20, %25 : vector<256x128xf32>
    %27 = vector.extract_strided_slice %1 {offsets = [1, 1, 0], sizes = [16, 16, 4], strides = [1, 1, 1]} : vector<18x18x4xbf16> to vector<16x16x4xbf16>
    %28 = vector.shape_cast %27 : vector<16x16x4xbf16> to vector<256x4xbf16>
    %c1_21 = arith.constant 1 : index
    %c1_22 = arith.constant 1 : index
    %c0_23 = arith.constant 0 : index
    %c0_24 = arith.constant 0 : index
    %29 = vector.load %arg2[%c1_21, %c1_22, %c0_23, %c0_24] : memref<3x3x4x128xbf16, #tpu.memory_space<vmem>>, vector<1x1x4x128xbf16>
    %30 = vector.shape_cast %29 : vector<1x1x4x128xbf16> to vector<4x128xbf16>
    %cst_25 = arith.constant dense<0.000000e+00> : vector<256x128xf32>
    %31 = tpu.matmul %28, %30, %cst_25 {dimension_numbers = #tpu.dot_dimension_numbers<[1], [0], [0], [1], [0, 0, 1, 1], [], []>} : vector<256x4xbf16>, vector<4x128xbf16>, vector<256x128xf32> -> vector<256x128xf32>
    %32 = arith.addf %26, %31 : vector<256x128xf32>
    %33 = vector.extract_strided_slice %1 {offsets = [1, 2, 0], sizes = [16, 16, 4], strides = [1, 1, 1]} : vector<18x18x4xbf16> to vector<16x16x4xbf16>
    %34 = vector.shape_cast %33 : vector<16x16x4xbf16> to vector<256x4xbf16>
    %c1_26 = arith.constant 1 : index
    %c2_27 = arith.constant 2 : index
    %c0_28 = arith.constant 0 : index
    %c0_29 = arith.constant 0 : index
    %35 = vector.load %arg2[%c1_26, %c2_27, %c0_28, %c0_29] : memref<3x3x4x128xbf16, #tpu.memory_space<vmem>>, vector<1x1x4x128xbf16>
    %36 = vector.shape_cast %35 : vector<1x1x4x128xbf16> to vector<4x128xbf16>
    %cst_30 = arith.constant dense<0.000000e+00> : vector<256x128xf32>
    %37 = tpu.matmul %34, %36, %cst_30 {dimension_numbers = #tpu.dot_dimension_numbers<[1], [0], [0], [1], [0, 0, 1, 1], [], []>} : vector<256x4xbf16>, vector<4x128xbf16>, vector<256x128xf32> -> vector<256x128xf32>
    %38 = arith.addf %32, %37 : vector<256x128xf32>
    %39 = vector.extract_strided_slice %1 {offsets = [2, 0, 0], sizes = [16, 16, 4], strides = [1, 1, 1]} : vector<18x18x4xbf16> to vector<16x16x4xbf16>
    %40 = vector.shape_cast %39 : vector<16x16x4xbf16> to vector<256x4xbf16>
    %c2_31 = arith.constant 2 : index
    %c0_32 = arith.constant 0 : index
    %c0_33 = arith.constant 0 : index
    %c0_34 = arith.constant 0 : index
    %41 = vector.load %arg2[%c2_31, %c0_32, %c0_33, %c0_34] : memref<3x3x4x128xbf16, #tpu.memory_space<vmem>>, vector<1x1x4x128xbf16>
    %42 = vector.shape_cast %41 : vector<1x1x4x128xbf16> to vector<4x128xbf16>
    %cst_35 = arith.constant dense<0.000000e+00> : vector<256x128xf32>
    %43 = tpu.matmul %40, %42, %cst_35 {dimension_numbers = #tpu.dot_dimension_numbers<[1], [0], [0], [1], [0, 0, 1, 1], [], []>} : vector<256x4xbf16>, vector<4x128xbf16>, vector<256x128xf32> -> vector<256x128xf32>
    %44 = arith.addf %38, %43 : vector<256x128xf32>
    %45 = vector.extract_strided_slice %1 {offsets = [2, 1, 0], sizes = [16, 16, 4], strides = [1, 1, 1]} : vector<18x18x4xbf16> to vector<16x16x4xbf16>
    %46 = vector.shape_cast %45 : vector<16x16x4xbf16> to vector<256x4xbf16>
    %c2_36 = arith.constant 2 : index
    %c1_37 = arith.constant 1 : index
    %c0_38 = arith.constant 0 : index
    %c0_39 = arith.constant 0 : index
    %47 = vector.load %arg2[%c2_36, %c1_37, %c0_38, %c0_39] : memref<3x3x4x128xbf16, #tpu.memory_space<vmem>>, vector<1x1x4x128xbf16>
    %48 = vector.shape_cast %47 : vector<1x1x4x128xbf16> to vector<4x128xbf16>
    %cst_40 = arith.constant dense<0.000000e+00> : vector<256x128xf32>
    %49 = tpu.matmul %46, %48, %cst_40 {dimension_numbers = #tpu.dot_dimension_numbers<[1], [0], [0], [1], [0, 0, 1, 1], [], []>} : vector<256x4xbf16>, vector<4x128xbf16>, vector<256x128xf32> -> vector<256x128xf32>
    %50 = arith.addf %44, %49 : vector<256x128xf32>
    %51 = vector.extract_strided_slice %1 {offsets = [2, 2, 0], sizes = [16, 16, 4], strides = [1, 1, 1]} : vector<18x18x4xbf16> to vector<16x16x4xbf16>
    %52 = vector.shape_cast %51 : vector<16x16x4xbf16> to vector<256x4xbf16>
    %c2_41 = arith.constant 2 : index
    %c2_42 = arith.constant 2 : index
    %c0_43 = arith.constant 0 : index
    %c0_44 = arith.constant 0 : index
    %53 = vector.load %arg2[%c2_41, %c2_42, %c0_43, %c0_44] : memref<3x3x4x128xbf16, #tpu.memory_space<vmem>>, vector<1x1x4x128xbf16>
    %54 = vector.shape_cast %53 : vector<1x1x4x128xbf16> to vector<4x128xbf16>
    %cst_45 = arith.constant dense<0.000000e+00> : vector<256x128xf32>
    %55 = tpu.matmul %52, %54, %cst_45 {dimension_numbers = #tpu.dot_dimension_numbers<[1], [0], [0], [1], [0, 0, 1, 1], [], []>} : vector<256x4xbf16>, vector<4x128xbf16>, vector<256x128xf32> -> vector<256x128xf32>
    %56 = arith.addf %50, %55 : vector<256x128xf32>
    %cst_46 = arith.constant 0.000000e+00 : f32
    %57 = vector.broadcast %cst_46 : f32 to vector<1x8x128xf32>
    %c0_47 = arith.constant 0 : index
    %c0_48 = arith.constant 0 : index
    %c0_49 = arith.constant 0 : index
    %58 = vector.load %arg3[%c0_47, %c0_48, %c0_49] : memref<1x8x128xf32, #tpu.memory_space<vmem>>, vector<1x8x128xf32>
    tpu.vector_store %arg3[%c0_47, %c0_48, %c0_49], %57 {strides = array<i32>} : memref<1x8x128xf32, #tpu.memory_space<vmem>>, vector<1x8x128xf32>,
    %cst_50 = arith.constant dense<0.000000e+00> : vector<128xf32>
    %59 = vector.multi_reduction <add>, %56, %cst_50 [0] : vector<256x128xf32> to vector<128xf32>
    %60 = vector.shape_cast %59 : vector<128xf32> to vector<1x128xf32>
    %c0_51 = arith.constant 0 : index
    %c0_52 = arith.constant 0 : index
    %c0_53 = arith.constant 0 : index
    %61 = vector.load %arg3[%c0_51, %c0_52, %c0_53] : memref<1x8x128xf32, #tpu.memory_space<vmem>>, vector<1x1x128xf32>
    %62 = vector.shape_cast %61 : vector<1x1x128xf32> to vector<1x128xf32>
    %63 = vector.shape_cast %60 : vector<1x128xf32> to vector<1x1x128xf32>
    tpu.vector_store %arg3[%c0_51, %c0_52, %c0_53], %63 {strides = array<i32>} : memref<1x8x128xf32, #tpu.memory_space<vmem>>, vector<1x1x128xf32>,
    %64 = arith.mulf %56, %56 : vector<256x128xf32>
    %cst_54 = arith.constant dense<0.000000e+00> : vector<128xf32>
    %65 = vector.multi_reduction <add>, %64, %cst_54 [0] : vector<256x128xf32> to vector<128xf32>
    %66 = vector.shape_cast %65 : vector<128xf32> to vector<1x128xf32>
    %c0_55 = arith.constant 0 : index
    %c1_56 = arith.constant 1 : index
    %c0_57 = arith.constant 0 : index
    %67 = vector.load %arg3[%c0_55, %c1_56, %c0_57] : memref<1x8x128xf32, #tpu.memory_space<vmem>>, vector<1x1x128xf32>
    %68 = vector.shape_cast %67 : vector<1x1x128xf32> to vector<1x128xf32>
    %69 = vector.shape_cast %66 : vector<1x128xf32> to vector<1x1x128xf32>
    tpu.vector_store %arg3[%c0_55, %c1_56, %c0_57], %69 {strides = array<i32>} : memref<1x8x128xf32, #tpu.memory_space<vmem>>, vector<1x1x128xf32>,
    return
  }
  func.func @transform_0(%arg0: i32) -> (i32, i32, i32, i32) {
    %c0_i32 = arith.constant 0 : i32
    %c0_i32_0 = arith.constant 0 : i32
    %c0_i32_1 = arith.constant 0 : i32
    %c0_i32_2 = arith.constant 0 : i32
    return %arg0, %c0_i32, %c0_i32_0, %c0_i32_1 : i32, i32, i32, i32
  }
  func.func @transform_1(%arg0: i32) -> (i32, i32, i32, i32) {
    %c0_i32 = arith.constant 0 : i32
    %c0_i32_0 = arith.constant 0 : i32
    %c0_i32_1 = arith.constant 0 : i32
    %c0_i32_2 = arith.constant 0 : i32
    %c0_i32_3 = arith.constant 0 : i32
    return %c0_i32, %c0_i32_0, %c0_i32_1, %c0_i32_2 : i32, i32, i32, i32
  }
  func.func @transform_2(%arg0: i32) -> (i32, i32, i32) {
    %c0_i32 = arith.constant 0 : i32
    %c0_i32_0 = arith.constant 0 : i32
    %c0_i32_1 = arith.constant 0 : i32
    return %arg0, %c0_i32, %c0_i32_0 : i32, i32, i32
  }
}

</mosaic_0001>

<bundles_post_ra>
// kernel: cbl_forward.2
= control target key start
LH: loop header
LB: loop body
LE: loop exit
PB: predicated region body
PF: predicated region fallthrough
CT: control target
= control target key end

     0   :  { %s3776_s9 = smov 0   ;;  %s5176_s0 = inlined_call_operand.vmem [shape: bf16[2,18,18,4], index: 0, kind: input, shape index: {}]   ;;  %s5177_s1 = inlined_call_operand.vmem [shape: bf16[3,3,4,128], index: 1, kind: input, shape index: {}]   ;;  %s5178_s2 = inlined_call_operand.vmem [shape: f32[2,8,128], index: 2, kind: output, shape index: {}]  }
   0x1 LB: > { %s3020_s10 = sadd.s32 4294967295, %s3758_s9   ;;  %p3024_p0 = scmp.ge.s32.totalorder %s3758_s9, 1  ;;  %s3758_s9 = sphi %s3776_s9, %s12_s9  }
   0x2   : > { %p112_p1 = scmp.lt.s32.totalorder %s3758_s9, 3 }
   0x4   : > { %p113_p2 = pnand %p3024_p0, %p112_p1 }
   0x6   : > { %116 = sbr.rel (%p113_p2) target bundleno = 572 (0x23c), region = 28 }
   0xb   : > { %v3027_v0 = vld [vmem:[%s5177_s1 + $0x2] sm:$0x3]  ;;  %vm684_vm0 = vcmask 1041408   ;;  %p133_p3 = scmp.lt.s32.totalorder %s3020_s10, 1  ;;  %v197_v2 = vld [vmem:[%s5177_s1] sm:$0x3] }
   0xc   : > { %3715 = vmatprep.subr.msk.bf16.mxu1 %vm684_vm0, %v3027_v0  ;;  %3714 = vmatprep.subr.msk.bf16.mxu0 %vm684_vm0, %v3027_v0  ;;  %v686_v1 = vsel %vm684_vm0, %v3027_v0, 0  ;;  %v3108_v3 = vld [vmem:[%s5177_s1 + $0x4] sm:$0x3]  ;;  %vm198_vm1 = vsmask.f32 3328  ;;  %v3807_v4 = vsel %vm684_vm0, %v197_v2, 0 }
   0xd   : > { %3713 = vmatpush3.bf16.msra.mxu1 %v686_v1  ;;  %3407 = vmatpush3.bf16.msra.mxu0 %v686_v1  ;;  %s5334_s10 = smov (!%p133_p3, %s3020_s10), 1  ;;  %vm199_vm2 = vsmask.f32 7440  ;;  %v3810_v5 = vsel %vm684_vm0, %v3108_v3, 0  ;;  %vm635_vm3 = vcmask 31744   ;;  %v5222_v32 = vmov 0 }
   0xe   : > { %3716 = vmatprep.subr.msk.bf16.mxu1 %vm684_vm0, %v197_v2  ;;  %3717 = vmatprep.subr.msk.bf16.mxu0 %vm684_vm0, %v3108_v3  ;;  %s3724_s17 = smul.u32 216, %s5334_s10  ;;  %vm3849_vm4 = vmor %vm198_vm1, %vm199_vm2  ;;  %vm1157_vm5 = vcmask 1042432   ;;  %vm1158_vm6 = vcmask 1046532   ;;  %s3026_s5 = sshll.u32 %s5334_s10, 3 }
   0xf   : > { %v5223_v32 = vsel %vm3849_vm4, 4294967295, %v5222_v32  ;;  %vm4172_vm7 = vmor %vm1157_vm5, %vm1158_vm6  ;;  %s5004_s8 = scalar_lea.vmem %s5178_s2, %s3026_s5 }
  0x10   : > { %s3804_s20 = scalar_lea.vmem %s5176_s0, %s3724_s17  ;;  %5224 = vst [vmem:[#allocation2_spill] sm:$0xff] %v5223_v32 }
  0x11   : > { %v3813_v6 = vld [vmem:[%s3804_s20] sm:$0xf]  ;;  %v3816_v7 = vld [vmem:[%s3804_s20 + $0x4] sm:$0xf]  ;;  %v3819_v8 = vld [vmem:[%s3804_s20 + $0x8] sm:$0x1] }
  0x12   : > { %v202_v9 = vshrl.u32 %v3813_v6, 16  ;;  %v205_v10 = vshll.u32 %v3813_v6, 16  ;;  %v211_v11 = vshll.u32 %v3816_v7, 16  ;;  %v215_v12 = vshrl.u32 %v3816_v7, 16  ;;  %v3826_v13 = vld [vmem:[%s3804_s20 + $0x60] sm:$0xf] }
  0x13   : > { %v221_v14 = vshll.u32 %v3819_v8, 16  ;;  %v3831_v16 = vld [vmem:[%s3804_s20 + $0x64] sm:$0xf]  ;;  %v3834_v17 = vld [vmem:[%s3804_s20 + $0x68] sm:$0x1]  ;;  %v394_v23 = vshrl.u32 %v3826_v13, 16 }
  0x14   : > { %v204_v18 = vrot.slane %v202_v9, 4  ;;  %v207_v19 = vrot.slane %v205_v10, 5  ;;  %v213_v20 = vrot.slane %v211_v11, 5  ;;  %v217_v21 = vrot.slane %v215_v12, 4  ;;  %v3842_v30 = vld [vmem:[%s3804_s20 + $0xc] sm:$0xf] }
  0x15   : > { %v223_v22 = vrot.slane %v221_v14, 5  ;;  %v397_v24 = vshll.u32 %v3826_v13, 16  ;;  %v403_v25 = vshll.u32 %v3831_v16, 16  ;;  %v407_v28 = vshrl.u32 %v3831_v16, 16  ;;  %v3845_v31 = vld [vmem:[%s3804_s20 + $0x10] sm:$0xf] }
  0x16   : > { %v208_v26 = vor.u32 %v207_v19, %v204_v18  ;;  %v218_v27 = vor.u32 %v217_v21, %v213_v20  ;;  %v413_v29 = vshll.u32 %v3834_v17, 16  ;;  %v396_v33 = vrot.slane %v394_v23, 4  ;;  %v3856_v42 = vld [vmem:[%s3804_s20 + $0x14] sm:$0x1]  ;;  %v3867_v54 = vld [vmem:[%s3804_s20 + $0x6c] sm:$0xf] }
  0x17   : > { %v399_v34 = vrot.slane %v397_v24, 5  ;;  %v405_v35 = vrot.slane %v403_v25, 5  ;;  %v409_v39 = vrot.slane %v407_v28, 4  ;;  %v226_v43 = vshrl.u32 %v3842_v30, 16  ;;  %5225 = vst [vmem:[#allocation3_spill] sm:$0xff] %v3867_v54 }
  0x18   : > { %v209_v37 = vrot.slane %v208_v26, 4  ;;  %v219_v38 = vrot.slane %v218_v27, 4  ;;  %v415_v40 = vrot.slane %v413_v29, 5  ;;  %v229_v44 = vshll.u32 %v3842_v30, 16  ;;  %v3871_v59 = vld [vmem:[%s3804_s20 + $0x70] sm:$0xf] }
  0x19   : > { %v400_v41 = vor.u32 %v399_v34, %v396_v33  ;;  %v235_v45 = vshll.u32 %v3845_v31, 16  ;;  %v410_v48 = vor.u32 %v409_v39, %v405_v35  ;;  %v239_v49 = vshrl.u32 %v3845_v31, 16  ;;  %v3879_v0 = vld [vmem:[%s3804_s20 + $0x74] sm:$0x1]  ;;  %v3885_v10 = vld [vmem:[%s3804_s20 + $0x18] sm:$0xf] }
  0x1a   : > { %v214_v46 = vsel %vm3849_vm4, %v209_v37, %v213_v20  ;;  %v224_v47 = vsel %vm3849_vm4, %v219_v38, %v223_v22  ;;  %v228_v52 = vrot.slane %v226_v43, 4  ;;  %v231_v53 = vrot.slane %v229_v44, 5  ;;  %5226 = vst [vmem:[#allocation4_spill] sm:$0xff] %v3879_v0  ;;  %v3894_v23 = vld [vmem:[%s3804_s20 + $0x1c] sm:$0xf] }
  0x1b   : > { %v3028_v50 = vcombine.low %v214_v46, %v224_v47  ;;  %v401_v51 = vrot.slane %v400_v41, 4  ;;  %v411_v55 = vrot.slane %v410_v48, 4  ;;  %v237_v56 = vrot.slane %v235_v45, 5  ;;  %v3901_v27 = vld [vmem:[%s3804_s20 + $0x20] sm:$0x1] }
  0x1c   : > { %v241_v57 = vrot.slane %v239_v49, 4  ;;  %v245_v58 = vshll.u32 %v3856_v42, 16  ;;  %v232_v61 = vor.u32 %v231_v53, %v228_v52  ;;  %v418_v9 = vshrl.u32 %v3867_v54, 16  ;;  %v3908_v37 = vld [vmem:[%s3804_s20 + $0x78] sm:$0xf] }
  0x1d   : > { %3408 = vmatprep.mubr.msk.bf16.mxu0 %vm635_vm3, %v3028_v50  ;;  %v406_v60 = vsel %vm3849_vm4, %v401_v51, %v405_v35  ;;  %v416_v1 = vsel %vm3849_vm4, %v411_v55, %v415_v40  ;;  %v421_v14 = vshll.u32 %v3867_v54, 16  ;;  %v427_v18 = vshll.u32 %v3871_v59, 16  ;;  %5228 = vst [vmem:[#allocation6_spill] sm:$0xff] %v3908_v37  ;;  %v3916_v43 = vld [vmem:[%s5177_s1 + $0x8] sm:$0x3] }
  0x1e   : > { %v242_v2 = vor.u32 %v241_v57, %v237_v56  ;;  %v247_v3 = vrot.slane %v245_v58, 5  ;;  %v3887_v11 = vcombine.low %v406_v60, %v416_v1  ;;  %v233_v12 = vrot.slane %v232_v61, 4  ;;  %v3921_v48 = vld [vmem:[%s3804_s20 + $0x7c] sm:$0xf]  ;;  %v3929_v58 = vld [vmem:[%s3804_s20 + $0x80] sm:$0x1] }
  0x1f   : > { %v420_v20 = vrot.slane %v418_v9, 4  ;;  %v431_v21 = vshrl.u32 %v3871_v59, 16  ;;  %v437_v22 = vshll.u32 %v3879_v0, 16  ;;  %v423_v25 = vrot.slane %v421_v14, 5  ;;  %5230 = vst [vmem:[#allocation8_spill] sm:$0xff] %v3921_v48  ;;  %5231 = vst [vmem:[#allocation9_spill] sm:$0xff] %v3929_v58 }
  0x20   : > { %5227 = vst [vmem:[#allocation5_spill] sm:$0xff] %v3887_v11  ;;  %v243_v19 = vrot.slane %v242_v2, 4  ;;  %3424 = vmatprep.mubr.msk.bf16.mxu1 %vm635_vm3, %v3887_v11  ;;  %v238_v24 = vsel %vm3849_vm4, %v233_v12, %v237_v56  ;;  %v429_v26 = vrot.slane %v427_v18, 5  ;;  %v250_v28 = vshrl.u32 %v3885_v10, 16  ;;  %v3943_v18 = vld [vmem:[%s3804_s20 + $0x28] sm:$0xf] }
  0x21   : > { %v433_v33 = vrot.slane %v431_v21, 4  ;;  %v439_v34 = vrot.slane %v437_v22, 5  ;;  %v253_v35 = vshll.u32 %v3885_v10, 16  ;;  %v424_v39 = vor.u32 %v423_v25, %v420_v20 }
  0x22   : > { %v248_v29 = vsel %vm3849_vm4, %v243_v19, %v247_v3  ;;  %v252_v40 = vrot.slane %v250_v28, 4  ;;  %v259_v41 = vshll.u32 %v3894_v23, 16  ;;  %v263_v46 = vshrl.u32 %v3894_v23, 16  ;;  %v3935_v3 = vld [vmem:[%s3804_s20 + $0x24] sm:$0xf] }
  0x23   : > { %v3910_v38 = vcombine.low %v238_v24, %v248_v29  ;;  %v434_v44 = vor.u32 %v433_v33, %v429_v26  ;;  %v255_v45 = vrot.slane %v253_v35, 5  ;;  %v269_v47 = vshll.u32 %v3901_v27, 16  ;;  %v3951_v24 = vld [vmem:[%s5177_s1 + $0x6] sm:$0x3]  ;;  %v3956_v29 = vld [vmem:[%s3804_s20 + $0x2c] sm:$0x1] }
  0x24   : > { %v425_v49 = vrot.slane %v424_v39, 4  ;;  %v261_v50 = vrot.slane %v259_v41, 5  ;;  %v442_v51 = vshrl.u32 %v3908_v37, 16  ;;  %v445_v52 = vshll.u32 %v3908_v37, 16  ;;  %v3964_v41 = vld [vmem:[%s3804_s20 + $0x84] sm:$0xf] }
  0x25   : > { %5229 = vst [vmem:[#allocation7_spill] sm:$0xff] %v3910_v38  ;;  %3409 = vmatmul.mubr.msk.bf16.vlgmr.msra.gmra.mxu0 %vm635_vm3, %v3910_v38  ;;  %v435_v53 = vrot.slane %v434_v44, 4  ;;  %v256_v55 = vor.u32 %v255_v45, %v252_v40  ;;  %v265_v56 = vrot.slane %v263_v46, 4  ;;  %v271_v57 = vrot.slane %v269_v47, 5  ;;  %v4111_v38 = vld [vmem:[%s3804_s20 + $0xb0] sm:$0x1] }
  0x26   : > { %3475 = vmatpush3.bf16.msra.mxu0 %v3810_v5  ;;  %v430_v60 = vsel %vm3849_vm4, %v425_v49, %v429_v26  ;;  %v444_v61 = vrot.slane %v442_v51, 4  ;;  %v447_v1 = vrot.slane %v445_v52, 5  ;;  %v451_v2 = vshll.u32 %v3921_v48, 16  ;;  %v3971_v49 = vld [vmem:[%s3804_s20 + $0x88] sm:$0xf]  ;;  %5243 = vst [vmem:[#allocation21_spill] sm:$0xff] %v4111_v38 }
  0x27   : > { %3719 = vmatprep.subr.msk.bf16.mxu0 %vm684_vm0, %v3916_v43  ;;  %v440_v5 = vsel %vm3849_vm4, %v435_v53, %v439_v34  ;;  %v257_v9 = vrot.slane %v256_v55, 4  ;;  %v266_v12 = vor.u32 %v265_v56, %v261_v50  ;;  %v455_v14 = vshrl.u32 %v3921_v48, 16  ;;  %v4133_v48 = vld [vmem:[%s3804_s20 + $0x5c] sm:$0x1] }
  0x28   : > { %v3945_v19 = vcombine.low %v430_v60, %v440_v5  ;;  %v448_v20 = vor.u32 %v447_v1, %v444_v61  ;;  %v453_v21 = vrot.slane %v451_v2, 5  ;;  %v461_v22 = vshll.u32 %v3929_v58, 16 }
  0x29   : > { %v262_v25 = vsel %vm3849_vm4, %v257_v9, %v261_v50  ;;  %v267_v26 = vrot.slane %v266_v12, 4  ;;  %v457_v28 = vrot.slane %v455_v14, 4  ;;  %v274_v33 = vshrl.u32 %v3935_v3, 16  ;;  %v3990_v9 = vld [vmem:[%s3804_s20 + $0x30] sm:$0xf] }
  0x2a   : > { %5232 = vst [vmem:[#allocation10_spill] sm:$0xff] %v3945_v19  ;;  %3425 = vmatmul.mubr.msk.bf16.vlgmr.msra.gmra.mxu1 %vm635_vm3, %v3945_v19  ;;  %v449_v34 = vrot.slane %v448_v20, 4  ;;  %v463_v35 = vrot.slane %v461_v22, 5  ;;  %v277_v39 = vshll.u32 %v3935_v3, 16  ;;  %v283_v40 = vshll.u32 %v3943_v18, 16 }
  0x2b   : > { %3441 = vmatpush3.bf16.msra.mxu1 %v3807_v4  ;;  %v272_v44 = vsel %vm3849_vm4, %v267_v26, %v271_v57  ;;  %v458_v45 = vor.u32 %v457_v28, %v453_v21  ;;  %v276_v46 = vrot.slane %v274_v33, 4  ;;  %v287_v47 = vshrl.u32 %v3943_v18, 16  ;;  %v3981_v57 = vld [vmem:[%s3804_s20 + $0x8c] sm:$0x1]  ;;  %v3995_v22 = vld [vmem:[%s3804_s20 + $0x34] sm:$0xf] }
  0x2c   : > { %v3973_v50 = vcombine.low %v262_v25, %v272_v44  ;;  %v454_v51 = vsel %vm3849_vm4, %v449_v34, %v453_v21  ;;  %v279_v52 = vrot.slane %v277_v39, 5  ;;  %v285_v53 = vrot.slane %v283_v40, 5  ;;  %3718 = vmatprep.subr.msk.bf16.mxu1 %vm684_vm0, %v3951_v24 }
  0x2d   : > { %v459_v4 = vrot.slane %v458_v45, 4  ;;  %v289_v55 = vrot.slane %v287_v47, 4  ;;  %v293_v56 = vshll.u32 %v3956_v29, 16  ;;  %v466_v60 = vshrl.u32 %v3964_v41, 16 }
  0x2e   : > { %5233 = vst [vmem:[#allocation11_spill] sm:$0xff] %v3973_v50  ;;  %3412 = vmatprep.mubr.msk.bf16.mxu0 %vm635_vm3, %v3973_v50  ;;  %v280_v61 = vor.u32 %v279_v52, %v276_v46  ;;  %v469_v1 = vshll.u32 %v3964_v41, 16  ;;  %v475_v2 = vshll.u32 %v3971_v49, 16  ;;  %v479_v5 = vshrl.u32 %v3971_v49, 16  ;;  %v4006_v46 = vld [vmem:[%s3804_s20 + $0x38] sm:$0x1] }
  0x2f   : > { %v464_v12 = vsel %vm3849_vm4, %v459_v4, %v463_v35  ;;  %v290_v14 = vor.u32 %v289_v55, %v285_v53  ;;  %v295_v20 = vrot.slane %v293_v56, 5  ;;  %v468_v21 = vrot.slane %v466_v60, 4  ;;  %v4011_v52 = vld [vmem:[%s3804_s20 + $0x90] sm:$0xf] }
  0x30   : > { %v3997_v25 = vcombine.low %v454_v51, %v464_v12  ;;  %v281_v26 = vrot.slane %v280_v61, 4  ;;  %v471_v28 = vrot.slane %v469_v1, 5  ;;  %v477_v33 = vrot.slane %v475_v2, 5  ;;  %v4016_v61 = vld [vmem:[%s3804_s20 + $0x94] sm:$0xf] }
  0x31   : > { %v291_v34 = vrot.slane %v290_v14, 4  ;;  %v481_v39 = vrot.slane %v479_v5, 4  ;;  %v485_v40 = vshll.u32 %v3981_v57, 16  ;;  %v298_v44 = vshrl.u32 %v3990_v9, 16 }
  0x32   : > { %5234 = vst [vmem:[#allocation12_spill] sm:$0xff] %v3997_v25  ;;  %3428 = vmatprep.mubr.msk.bf16.mxu1 %vm635_vm3, %v3997_v25  ;;  %v286_v35 = vsel %vm3849_vm4, %v281_v26, %v285_v53  ;;  %v472_v45 = vor.u32 %v471_v28, %v468_v21  ;;  %v301_v47 = vshll.u32 %v3990_v9, 16  ;;  %v307_v51 = vshll.u32 %v3995_v22, 16  ;;  %v4062_v25 = vld [vmem:[%s3804_s20 + $0xa0] sm:$0xf] }
  0x33   : > { %v296_v4 = vsel %vm3849_vm4, %v291_v34, %v295_v20  ;;  %v482_v55 = vor.u32 %v481_v39, %v477_v33  ;;  %v487_v56 = vrot.slane %v485_v40, 5  ;;  %v300_v60 = vrot.slane %v298_v44, 4  ;;  %v4028_v34 = vld [vmem:[%s3804_s20 + $0x98] sm:$0x1]  ;;  %v4033_v44 = vld [vmem:[%s3804_s20 + $0x3c] sm:$0xf] }
  0x34   : > { %v4018_v53 = vcombine.low %v286_v35, %v296_v4  ;;  %v473_v1 = vrot.slane %v472_v45, 4  ;;  %v303_v2 = vrot.slane %v301_v47, 5  ;;  %v309_v5 = vrot.slane %v307_v51, 5  ;;  %v4038_v4 = vld [vmem:[%s3804_s20 + $0x40] sm:$0xf] }
  0x35   : > { %v483_v12 = vrot.slane %v482_v55, 4  ;;  %v311_v14 = vshrl.u32 %v3995_v22, 16  ;;  %v317_v21 = vshll.u32 %v4006_v46, 16  ;;  %v490_v20 = vshrl.u32 %v4011_v52, 16 }
  0x36   : > { %5235 = vst [vmem:[#allocation13_spill] sm:$0xff] %v4018_v53  ;;  %3413 = vmatmul.mubr.msk.bf16.gmra.mxu0 %vm635_vm3, %v4018_v53  ;;  %v478_v26 = vsel %vm3849_vm4, %v473_v1, %v477_v33  ;;  %v304_v28 = vor.u32 %v303_v2, %v300_v60  ;;  %v493_v39 = vshll.u32 %v4011_v52, 16  ;;  %v499_v40 = vshll.u32 %v4016_v61, 16 }
  0x37   : > { %v488_v35 = vsel %vm3849_vm4, %v483_v12, %v487_v56  ;;  %v313_v45 = vrot.slane %v311_v14, 4  ;;  %v319_v47 = vrot.slane %v317_v21, 5  ;;  %v492_v51 = vrot.slane %v490_v20, 4  ;;  %v4050_v14 = vld [vmem:[%s3804_s20 + $0x44] sm:$0x1] }
  0x38   : > { %v4040_v33 = vcombine.low %v478_v26, %v488_v35  ;;  %v305_v55 = vrot.slane %v304_v28, 4  ;;  %v495_v60 = vrot.slane %v493_v39, 5  ;;  %v501_v1 = vrot.slane %v499_v40, 5  ;;  %v4055_v26 = vld [vmem:[%s3804_s20 + $0x9c] sm:$0xf] }
  0x39   : > { %v314_v2 = vor.u32 %v313_v45, %v309_v5  ;;  %v503_v36 = vshrl.u32 %v4016_v61, 16  ;;  %v509_v63 = vshll.u32 %v4028_v34, 16  ;;  %v322_v15 = vshrl.u32 %v4033_v44, 16 }
  0x3a   : > { %5236 = vst [vmem:[#allocation14_spill] sm:$0xff] %v4040_v33  ;;  %3429 = vmatmul.mubr.msk.bf16.gmra.mxu1 %vm635_vm3, %v4040_v33  ;;  %v310_v56 = vsel %vm3849_vm4, %v305_v55, %v309_v5  ;;  %v496_v12 = vor.u32 %v495_v60, %v492_v51  ;;  %v325_v21 = vshll.u32 %v4033_v44, 16  ;;  %v331_v20 = vshll.u32 %v4038_v4, 16 }
  0x3b   : > { %v315_v28 = vrot.slane %v314_v2, 4  ;;  %v505_v39 = vrot.slane %v503_v36, 4  ;;  %v511_v40 = vrot.slane %v509_v63, 5  ;;  %v324_v35 = vrot.slane %v322_v15, 4 }
  0x3c   : > { %v497_v45 = vrot.slane %v496_v12, 4  ;;  %v327_v62 = vrot.slane %v325_v21, 5  ;;  %v333_v33 = vrot.slane %v331_v20, 5  ;;  %v335_v5 = vshrl.u32 %v4038_v4, 16  ;;  %v4070_v21 = vld [vmem:[%s3804_s20 + $0xa4] sm:$0x1] }
  0x3d   : > { %v320_v51 = vsel %vm3849_vm4, %v315_v28, %v319_v47  ;;  %v506_v55 = vor.u32 %v505_v39, %v501_v1  ;;  %v341_v60 = vshll.u32 %v4050_v14, 16  ;;  %v514_v2 = vshrl.u32 %v4055_v26, 16  ;;  %5238 = vst [vmem:[#allocation16_spill] sm:$0xff] %v4070_v21  ;;  %v4073_v20 = vld [vmem:[%s3804_s20 + $0x48] sm:$0xf] }
  0x3e   : > { %v4065_v36 = vcombine.low %v310_v56, %v320_v51  ;;  %v502_v15 = vsel %vm3849_vm4, %v497_v45, %v501_v1  ;;  %v328_v63 = vor.u32 %v327_v62, %v324_v35  ;;  %v337_v12 = vrot.slane %v335_v5, 4 }
  0x3f   : > { %v507_v47 = vrot.slane %v506_v55, 4  ;;  %v343_v28 = vrot.slane %v341_v60, 5  ;;  %v516_v39 = vrot.slane %v514_v2, 4  ;;  %v517_v19 = vshll.u32 %v4055_v26, 16  ;;  %v4084_v55 = vld [vmem:[%s3804_s20 + $0x4c] sm:$0xf] }
  0x40   : > { %5237 = vst [vmem:[#allocation15_spill] sm:$0xff] %v4065_v36  ;;  %3416 = vmatprep.mubr.msk.bf16.mxu0 %vm635_vm3, %v4065_v36  ;;  %v329_v56 = vrot.slane %v328_v63, 4  ;;  %v338_v51 = vor.u32 %v337_v12, %v333_v33  ;;  %v523_v1 = vshll.u32 %v4062_v25, 16  ;;  %v527_v62 = vshrl.u32 %v4062_v25, 16  ;;  %v4092_v36 = vld [vmem:[%s3804_s20 + $0x50] sm:$0x1] }
  0x41   : > { %v512_v35 = vsel %vm3849_vm4, %v507_v47, %v511_v40  ;;  %v519_v45 = vrot.slane %v517_v19, 5  ;;  %v533_v5 = vshll.u32 %v4070_v21, 16  ;;  %v346_v60 = vshrl.u32 %v4073_v20, 16  ;;  %v4095_v47 = vld [vmem:[%s3804_s20 + $0xa8] sm:$0xf] }
  0x42   : > { %v4087_v2 = vcombine.low %v502_v15, %v512_v35  ;;  %v334_v63 = vsel %vm3849_vm4, %v329_v56, %v333_v33  ;;  %v339_v12 = vrot.slane %v338_v51, 4  ;;  %v525_v11 = vrot.slane %v523_v1, 5  ;;  %5240 = vst [vmem:[#allocation18_spill] sm:$0xff] %v4095_v47 }
  0x43   : > { %v520_v53 = vor.u32 %v519_v45, %v516_v39  ;;  %v529_v50 = vrot.slane %v527_v62, 4  ;;  %v535_v40 = vrot.slane %v533_v5, 5  ;;  %v348_v19 = vrot.slane %v346_v60, 4  ;;  %v4108_v45 = vld [vmem:[%s3804_s20 + $0xac] sm:$0xf] }
  0x44   : > { %5239 = vst [vmem:[#allocation17_spill] sm:$0xff] %v4087_v2  ;;  %3432 = vmatprep.mubr.msk.bf16.mxu1 %vm635_vm3, %v4087_v2  ;;  %v344_v15 = vsel %vm3849_vm4, %v339_v12, %v343_v28  ;;  %v349_v33 = vshll.u32 %v4073_v20, 16  ;;  %v355_v56 = vshll.u32 %v4084_v55, 16  ;;  %v359_v51 = vshrl.u32 %v4084_v55, 16  ;;  %5242 = vst [vmem:[#allocation20_spill] sm:$0xff] %v4108_v45 }
  0x45   : > { %v4104_v1 = vcombine.low %v334_v63, %v344_v15  ;;  %v521_v39 = vrot.slane %v520_v53, 4  ;;  %v530_v62 = vor.u32 %v529_v50, %v525_v11  ;;  %v365_v35 = vshll.u32 %v4092_v36, 16 }
  0x46   : > { %v351_v5 = vrot.slane %v349_v33, 5  ;;  %v357_v60 = vrot.slane %v355_v56, 5  ;;  %v361_v2 = vrot.slane %v359_v51, 4  ;;  %v538_v28 = vshrl.u32 %v4095_v47, 16  ;;  %v4121_v51 = vld [vmem:[%s3804_s20 + $0x54] sm:$0xf] }
  0x47   : > { %5241 = vst [vmem:[#allocation19_spill] sm:$0xff] %v4104_v1  ;;  %3417 = vmatmul.mubr.msk.bf16.gmra.mxu0 %vm635_vm3, %v4104_v1  ;;  %v526_v53 = vsel %vm3849_vm4, %v521_v39, %v525_v11  ;;  %v531_v50 = vrot.slane %v530_v62, 4  ;;  %v367_v63 = vrot.slane %v365_v35, 5  ;;  %v541_v12 = vshll.u32 %v4095_v47, 16  ;;  %v4128_v62 = vld [vmem:[%s3804_s20 + $0x58] sm:$0xf] }
  0x48   : > { %v352_v15 = vor.u32 %v351_v5, %v348_v19  ;;  %v362_v58 = vor.u32 %v361_v2, %v357_v60  ;;  %v540_v33 = vrot.slane %v538_v28, 4  ;;  %v547_v56 = vshll.u32 %v4108_v45, 16 }
  0x49   : > { %v536_v1 = vsel %vm3849_vm4, %v531_v50, %v535_v40  ;;  %v543_v37 = vrot.slane %v541_v12, 5  ;;  %v551_v11 = vshrl.u32 %v4108_v45, 16  ;;  %v557_v39 = vshll.u32 %v4111_v38, 16 }
  0x4a   : > { %v4130_v2 = vcombine.low %v526_v53, %v536_v1  ;;  %v353_v19 = vrot.slane %v352_v15, 4  ;;  %v363_v35 = vrot.slane %v362_v58, 4  ;;  %v549_v5 = vrot.slane %v547_v56, 5 }
  0x4b   : > { %v544_v28 = vor.u32 %v543_v37, %v540_v33  ;;  %v553_v0 = vrot.slane %v551_v11, 4  ;;  %v559_v54 = vrot.slane %v557_v39, 5  ;;  %v370_v40 = vshrl.u32 %v4121_v51, 16  ;;  %v4145_v37 = vld [vmem:[%s3804_s20 + $0xb4] sm:$0xf] }
  0x4c   : > { %5244 = vst [vmem:[#allocation22_spill] sm:$0xff] %v4130_v2  ;;  %3433 = vmatmul.mubr.msk.bf16.gmra.mxu1 %vm635_vm3, %v4130_v2  ;;  %v358_v50 = vsel %vm3849_vm4, %v353_v19, %v357_v60  ;;  %v368_v1 = vsel %vm3849_vm4, %v363_v35, %v367_v63  ;;  %v373_v58 = vshll.u32 %v4121_v51, 16  ;;  %v379_v53 = vshll.u32 %v4128_v62, 16  ;;  %5245 = vst [vmem:[#allocation23_spill] sm:$0xff] %v4145_v37  ;;  %v4150_v11 = vld [vmem:[%s3804_s20 + $0xb8] sm:$0xf] }
  0x4d   : > { %v4147_v12 = vcombine.low %v358_v50, %v368_v1  ;;  %v545_v15 = vrot.slane %v544_v28, 4  ;;  %v554_v33 = vor.u32 %v553_v0, %v549_v5  ;;  %v372_v56 = vrot.slane %v370_v40, 4 }
  0x4e   : > { %v375_v39 = vrot.slane %v373_v58, 5  ;;  %v381_v2 = vrot.slane %v379_v53, 5  ;;  %v383_v60 = vshrl.u32 %v4128_v62, 16  ;;  %v389_v63 = vshll.u32 %v4133_v48, 16  ;;  %v4161_v58 = vld [vmem:[%s3804_s20 + $0xbc] sm:$0x1] }
  0x4f   : > { %5246 = vst [vmem:[#allocation24_spill] sm:$0xff] %v4147_v12  ;;  %3420 = vmatprep.mubr.msk.bf16.mxu0 %vm635_vm3, %v4147_v12  ;;  %v550_v19 = vsel %vm3849_vm4, %v545_v15, %v549_v5  ;;  %v555_v35 = vrot.slane %v554_v33, 4  ;;  %v562_v28 = vshrl.u32 %v4145_v37, 16  ;;  %v565_v0 = vshll.u32 %v4145_v37, 16 }
  0x50   : > { %v376_v40 = vor.u32 %v375_v39, %v372_v56  ;;  %v385_v50 = vrot.slane %v383_v60, 4  ;;  %v391_v1 = vrot.slane %v389_v63, 5  ;;  %v571_v53 = vshll.u32 %v4150_v11, 16 }
  0x51   : > { %v560_v38 = vsel %vm3849_vm4, %v555_v35, %v559_v54  ;;  %v564_v47 = vrot.slane %v562_v28, 4  ;;  %v567_v12 = vrot.slane %v565_v0, 5  ;;  %v575_v45 = vshrl.u32 %v4150_v11, 16 }
  0x52   : > { %v4167_v5 = vcombine.low %v550_v19, %v560_v38  ;;  %v377_v15 = vrot.slane %v376_v40, 4  ;;  %v386_v33 = vor.u32 %v385_v50, %v381_v2  ;;  %v573_v21 = vrot.slane %v571_v53, 5 }
  0x53   : > { %v568_v37 = vor.u32 %v567_v12, %v564_v47  ;;  %v577_v56 = vrot.slane %v575_v45, 4  ;;  %v581_v39 = vshll.u32 %v4161_v58, 16  ;;  %v3092_v54 = vrot.slane %v3813_v6, 9 }
  0x54   : > { %3436 = vmatprep.mubr.msk.bf16.mxu1 %vm635_vm3, %v4167_v5  ;;  %v382_v38 = vsel %vm3849_vm4, %v377_v15, %v381_v2  ;;  %v387_v63 = vrot.slane %v386_v33, 4  ;;  %v1162_v47 = vrot.slane %v3816_v7, 5  ;;  %v4184_v45 = vcombine.low %v3842_v30, %v3845_v31 }
  0x55   : > { %v569_v12 = vrot.slane %v568_v37, 4  ;;  %v578_v19 = vor.u32 %v577_v56, %v573_v21  ;;  %v583_v35 = vrot.slane %v581_v39, 5  ;;  %v3093_v28 = vrot.slane %v3842_v30, 9 }
  0x56   : > { %v392_v0 = vsel %vm3849_vm4, %v387_v63, %v391_v1  ;;  %v1163_v40 = vsel %vm4172_vm7, %v3092_v54, %v1162_v47  ;;  %v1164_v50 = vrot.slane %v1162_v47, 4  ;;  %v5249_v2 = vrot.slane %v3845_v31, 5 }
  0x57   : > { %v4193_v15 = vcombine.low %v382_v38, %v392_v0  ;;  %v574_v33 = vsel %vm3849_vm4, %v569_v12, %v573_v21  ;;  %v579_v37 = vrot.slane %v578_v19, 4  ;;  %v5251_v1 = vrot.slane %v3819_v8, 5 }
  0x58   : > { %v1171_v53 = vrot.slane %v5249_v2, 4  ;;  %v5250_v56 = vmov %v5249_v2  ;;  %v5252_v54 = vrot.slane %v3856_v42, 5  ;;  %v4211_v63 = vcombine.low %v3885_v10, %v3894_v23 }
  0x59   : > { %v1170_v30 = vsel %vm4172_vm7, %v3093_v28, %v5250_v56  ;;  %v1166_v39 = vsel %vm4172_vm7, %v1164_v50, %v5251_v1  ;;  %v3094_v21 = vrot.slane %v3885_v10, 9  ;;  %3421 = vmatmul.mubr.msk.bf16.gmra.mxu0 %vm635_vm3, %v4193_v15  ;;  %v584_v8 = vsel %vm3849_vm4, %v579_v37, %v583_v35 }
  0x5a   : > { %v1173_v38 = vsel %vm4172_vm7, %v1171_v53, %v5252_v54  ;;  %v3109_v31 = vcombine.low %v1163_v40, %v1166_v39  ;;  %v1176_v42 = vrot.slane %v3894_v23, 5  ;;  %v4221_v12 = vcombine.low %v574_v33, %v584_v8 }
  0x5b   : > { %v4218_v47 = vcombine.low %v1170_v30, %v1173_v38  ;;  %v1179_v19 = vrot.slane %v3901_v27, 5  ;;  %v1183_v0 = vrot.slane %v3943_v18, 5  ;;  %v3095_v35 = vrot.slane %v3935_v3, 9 }
  0x5c   : > { %5253 = vst [vmem:[#allocation25_spill] sm:$0xff] %v4221_v12  ;;  %3476 = vmatprep.mubr.msk.bf16.mxu0 %vm635_vm3, %v3109_v31  ;;  %v1177_v10 = vsel %vm4172_vm7, %v3094_v21, %v1176_v42  ;;  %v1178_v28 = vrot.slane %v1176_v42, 4  ;;  %3437 = vmatmul.mubr.msk.bf16.gmra.mxu1 %vm635_vm3, %v4221_v12  ;;  %v3096_v40 = vrot.slane %v3990_v9, 9  ;;  %v1190_v23 = vrot.slane %v3995_v22, 5 }
  0x5d   : > { %v5254_v27 = vcombine.low %v3813_v6, %v3816_v7  ;;  %v1185_v2 = vrot.slane %v1183_v0, 4  ;;  %v1186_v53 = vrot.slane %v3956_v29, 5  ;;  %v1193_v33 = vrot.slane %v4006_v46, 5  ;;  %v4256_v46 = vld [vmem:[%s5177_s1 + $0xc] sm:$0x3] }
  0x5e   : > { %v1180_v50 = vsel %vm4172_vm7, %v1178_v28, %v1179_v19  ;;  %v1192_v56 = vrot.slane %v1190_v23, 4  ;;  %v1805_v30 = vsel %vm684_vm0, %v3916_v43, 0  ;;  %v1197_v1 = vrot.slane %v4038_v4, 5  ;;  %v4273_v19 = vld [vmem:[%s5177_s1 + $0xa] sm:$0x3] }
  0x5f   : > { %3442 = vmatprep.mubr.msk.bf16.mxu1 %vm635_vm3, %v5254_v27  ;;  %v4241_v37 = vcombine.low %v1177_v10, %v1180_v50  ;;  %v1577_v6 = vsel %vm684_vm0, %v3951_v24, 0  ;;  %v1184_v7 = vsel %vm4172_vm7, %v3095_v35, %v1183_v0  ;;  %v1191_v39 = vsel %vm4172_vm7, %v3096_v40, %v1190_v23 }
  0x60   : > { %v1204_v29 = vrot.slane %v4084_v55, 5  ;;  %v1187_v43 = vsel %vm4172_vm7, %v1185_v2, %v1186_v53  ;;  %v1194_v24 = vsel %vm4172_vm7, %v1192_v56, %v1193_v33  ;;  %v3097_v54 = vrot.slane %v4033_v44, 9 }
  0x61   : > { %3477 = vmatmul.mubr.msk.bf16.vlgmr.msra.gmra.mxu0 %vm635_vm3, %v4218_v47  ;;  %v1200_v38 = vrot.slane %v4050_v14, 5  ;;  %v1199_v21 = vrot.slane %v1197_v1, 4  ;;  %v3098_v8 = vrot.slane %v4073_v20, 9  ;;  %v1207_v42 = vrot.slane %v4092_v36, 5 }
  0x62   : > { %3543 = vmatpush3.bf16.msra.mxu0 %v1805_v30  ;;  %3480 = vmatprep.mubr.msk.bf16.mxu0 %vm635_vm3, %v4241_v37  ;;  %v1206_v31 = vrot.slane %v1204_v29, 4  ;;  %v4281_v14 = vcombine.low %v1184_v7, %v1187_v43  ;;  %v4283_v10 = vcombine.low %v1191_v39, %v1194_v24  ;;  %v1198_v36 = vsel %vm4172_vm7, %v3097_v54, %v1197_v1 }
  0x63   : > { %3721 = vmatprep.subr.msk.bf16.mxu0 %vm684_vm0, %v4256_v46  ;;  %v1201_v28 = vsel %vm4172_vm7, %v1199_v21, %v1200_v38  ;;  %v1205_v0 = vsel %vm4172_vm7, %v3098_v8, %v1204_v29  ;;  %v1211_v40 = vrot.slane %v4128_v62, 5  ;;  %v1221_v23 = vrot.slane %v3834_v17, 5  ;;  %v5255_v8 = vld [vmem:[#allocation16_spill] sm:$0xff] }
  0x64   : > { %3443 = vmatmul.mubr.msk.bf16.vlgmr.msra.gmra.mxu1 %vm635_vm3, %v4184_v45  ;;  %v1208_v35 = vsel %vm4172_vm7, %v1206_v31, %v1207_v42  ;;  %v3099_v27 = vrot.slane %v4121_v51, 9  ;;  %v3100_v50 = vrot.slane %v3826_v13, 9  ;;  %v1218_v2 = vrot.slane %v3831_v16, 5  ;;  %v5256_v42 = vld [vmem:[#allocation20_spill] sm:$0xff] }
  0x65   : > { %3509 = vmatpush3.bf16.msra.mxu1 %v1577_v6  ;;  %3446 = vmatprep.mubr.msk.bf16.mxu1 %vm635_vm3, %v4211_v63  ;;  %v4302_v53 = vcombine.low %v3935_v3, %v3943_v18  ;;  %v4306_v33 = vcombine.low %v3990_v9, %v3995_v22  ;;  %v4310_v56 = vcombine.low %v4033_v44, %v4038_v4  ;;  %v1214_v3 = vrot.slane %v4133_v48, 5 }
  0x66   : > { %3720 = vmatprep.subr.msk.bf16.mxu1 %vm684_vm0, %v4273_v19  ;;  %v4314_v17 = vcombine.low %v4073_v20, %v4084_v55  ;;  %v4318_v30 = vcombine.low %v1198_v36, %v1201_v28  ;;  %v4320_v1 = vcombine.low %v1205_v0, %v1208_v35  ;;  %v4325_v18 = vcombine.low %v3964_v41, %v3971_v49  ;;  %v5257_v36 = vld [vmem:[#allocation18_spill] sm:$0xff] }
  0x67   : > { %v1213_v9 = vrot.slane %v1211_v40, 4  ;;  %v3103_v22 = vrot.slane %v3964_v41, 9  ;;  %v1239_v44 = vrot.slane %v3971_v49, 5  ;;  %v1242_v4 = vrot.slane %v3981_v57, 5 }
  0x68   : > { %v1212_v20 = vsel %vm4172_vm7, %v3099_v27, %v1211_v40  ;;  %v1219_v48 = vsel %vm4172_vm7, %v3100_v50, %v1218_v2  ;;  %v1220_v55 = vrot.slane %v1218_v2, 4  ;;  %v4338_v6 = vcombine.low %v4011_v52, %v4016_v61  ;;  %v5258_v40 = vld [vmem:[#allocation21_spill] sm:$0xff] }
  0x69   : > { %3481 = vmatmul.mubr.msk.bf16.gmra.mxu0 %vm635_vm3, %v4281_v14  ;;  %v1240_v41 = vsel %vm4172_vm7, %v3103_v22, %v1239_v44  ;;  %v1241_v49 = vrot.slane %v1239_v44, 4  ;;  %v3104_v57 = vrot.slane %v4011_v52, 9  ;;  %v1246_v7 = vrot.slane %v4016_v61, 5 }
  0x6a   : > { %3484 = vmatprep.mubr.msk.bf16.mxu0 %vm635_vm3, %v4283_v10  ;;  %v1225_v39 = vrot.slane %v3871_v59, 5  ;;  %v1249_v29 = vrot.slane %v4028_v34, 5  ;;  %v4352_v43 = vcombine.low %v4055_v26, %v4062_v25  ;;  %v3105_v24 = vrot.slane %v4055_v26, 9 }
  0x6b   : > { %v1215_v54 = vsel %vm4172_vm7, %v1213_v9, %v1214_v3  ;;  %v1243_v52 = vsel %vm4172_vm7, %v1241_v49, %v1242_v4  ;;  %v1247_v61 = vsel %vm4172_vm7, %v3104_v57, %v1246_v7  ;;  %v1248_v38 = vrot.slane %v1246_v7, 4  ;;  %v5259_v3 = vld [vmem:[#allocation23_spill] sm:$0xff]  ;;  %v5260_v57 = vld [vmem:[#allocation8_spill] sm:$0xff] }
  0x6c   : > { %3447 = vmatmul.mubr.msk.bf16.gmra.mxu1 %vm635_vm3, %v4302_v53  ;;  %v4361_v21 = vcombine.low %v1240_v41, %v1243_v52  ;;  %v1253_v34 = vrot.slane %v4062_v25, 5  ;;  %v1256_v31 = vrot.slane %v5255_v8, 5  ;;  %v4367_v28 = vcombine.low %v5257_v36, %v5256_v42 }
  0x6d   : > { %3450 = vmatprep.mubr.msk.bf16.mxu1 %vm635_vm3, %v4306_v33  ;;  %v1250_v26 = vsel %vm4172_vm7, %v1248_v38, %v1249_v29  ;;  %v3106_v0 = vrot.slane %v5257_v36, 9  ;;  %v1260_v35 = vrot.slane %v5256_v42, 5  ;;  %v1263_v27 = vrot.slane %v5258_v40, 5  ;;  %v5262_v42 = vld [vmem:[#allocation4_spill] sm:$0xff] }
  0x6e   : > { %v4376_v50 = vcombine.low %v1247_v61, %v1250_v26  ;;  %v1254_v25 = vsel %vm4172_vm7, %v3105_v24, %v1253_v34  ;;  %v1255_v2 = vrot.slane %v1253_v34, 4  ;;  %v4382_v9 = vcombine.low %v5259_v3, %v4150_v11 }
  0x6f   : > { %v1261_v22 = vsel %vm4172_vm7, %v3106_v0, %v1260_v35  ;;  %v1262_v44 = vrot.slane %v1260_v35, 4  ;;  %v3107_v4 = vrot.slane %v5259_v3, 9  ;;  %v1267_v41 = vrot.slane %v4150_v11, 5  ;;  %v5263_v0 = vld [vmem:[#allocation6_spill] sm:$0xff] }
  0x70   : > { %v1222_v49 = vsel %vm4172_vm7, %v1220_v55, %v1221_v23  ;;  %v1232_v7 = vrot.slane %v5260_v57, 5  ;;  %v1257_v29 = vsel %vm4172_vm7, %v1255_v2, %v1256_v31  ;;  %v1270_v24 = vrot.slane %v4161_v58, 5  ;;  %v5261_v55 = vld [vmem:[#allocation3_spill] sm:$0xff] }
  0x71   : > { %3485 = vmatmul.mubr.msk.bf16.gmra.mxu0 %vm635_vm3, %v4318_v30  ;;  %v4398_v52 = vcombine.low %v1254_v25, %v1257_v29  ;;  %v1264_v61 = vsel %vm4172_vm7, %v1262_v44, %v1263_v27  ;;  %v1268_v11 = vsel %vm4172_vm7, %v3107_v4, %v1267_v41  ;;  %v1269_v38 = vrot.slane %v1267_v41, 4  ;;  %v5264_v27 = vld [vmem:[#allocation9_spill] sm:$0xff]  ;;  %v4485_v4 = vld [vmem:[%s3804_s20 + $0xc0] sm:$0xf]  ;;  %v193_v41 = vld [vmem:[%s3804_s20 + $0xc8] sm:$0x1] }
  0x72   : > { %3488 = vmatprep.mubr.msk.bf16.mxu0 %vm635_vm3, %v4320_v1  ;;  %v4406_v23 = vcombine.low %v1212_v20, %v1215_v54  ;;  %v3101_v34 = vrot.slane %v5261_v55, 9  ;;  %v4409_v58 = vcombine.low %v1261_v22, %v1264_v61  ;;  %v4411_v8 = vcombine.low %v1219_v48, %v1222_v49  ;;  %v5265_v61 = vld [vmem:[#allocation7_spill] sm:$0xff] }
  0x73   : > { %v1227_v31 = vrot.slane %v1225_v39, 4  ;;  %v1228_v36 = vrot.slane %v5262_v42, 5  ;;  %v1271_v26 = vsel %vm4172_vm7, %v1269_v38, %v1270_v24  ;;  %v3102_v35 = vrot.slane %v5263_v0, 9  ;;  %v5267_v42 = vld [vmem:[#allocation13_spill] sm:$0xff] }
  0x74   : > { %3451 = vmatmul.mubr.msk.bf16.gmra.mxu1 %vm635_vm3, %v4310_v56  ;;  %v1234_v40 = vrot.slane %v1232_v7, 4  ;;  %v1235_v25 = vrot.slane %v5264_v27, 5  ;;  %v4418_v2 = vcombine.low %v1268_v11, %v1271_v26  ;;  %v4422_v20 = vcombine.low %v4121_v51, %v4128_v62  ;;  %v5271_v26 = vld [vmem:[#allocation5_spill] sm:$0xff] }
  0x75   : > { %3454 = vmatprep.mubr.msk.bf16.mxu1 %vm635_vm3, %v4314_v17  ;;  %v4428_v48 = vcombine.low %v3826_v13, %v3831_v16  ;;  %v1226_v54 = vsel %vm4172_vm7, %v3101_v34, %v1225_v39  ;;  %v1229_v3 = vsel %vm4172_vm7, %v1227_v31, %v1228_v36  ;;  %v1233_v51 = vsel %vm4172_vm7, %v3102_v35, %v1232_v7  ;;  %v5266_v34 = vld [vmem:[#allocation11_spill] sm:$0xff]  ;;  %v5270_v36 = vld [vmem:[#allocation24_spill] sm:$0xff] }
  0x76   : > { %v1236_v62 = vsel %vm4172_vm7, %v1234_v40, %v1235_v25  ;;  %v4444_v13 = vcombine.low %v1226_v54, %v1229_v3  ;;  %v4450_v39 = vcombine.low %v5261_v55, %v3871_v59  ;;  %v4456_v22 = vcombine.low %v5263_v0, %v5260_v57  ;;  %v4479_v59 = vld [vmem:[%s3804_s20 + $0xc4] sm:$0xf]  ;;  %v3233_v55 = vld [vmem:[%s5177_s1 + $0x10] sm:$0x3] }
  0x77   : > { %v4446_v16 = vcombine.low %v1233_v51, %v1236_v62  ;;  %v2003_v44 = vrot.slane %v4479_v59, 5  ;;  %v3177_v49 = vrot.slane %v4485_v4, 9  ;;  %v2006_v7 = vrot.slane %v193_v41, 5  ;;  %v5272_v0 = vld [vmem:[#allocation10_spill] sm:$0xff]  ;;  %v5273_v35 = vld [vmem:[#allocation12_spill] sm:$0xff] }
  0x78   : > { %v2223_v38 = vsel %vm684_vm0, %v4256_v46, 0  ;;  %v2017_v31 = vsel %vm684_vm0, %v4273_v19, 0  ;;  %v5268_v46 = vld [vmem:[#allocation15_spill] sm:$0xff]  ;;  %v5274_v40 = vld [vmem:[#allocation14_spill] sm:$0xff]  ;;  %v1773_v27 = vshrl.u32 %v4485_v4, 16  ;;  %v1776_v25 = vshll.u32 %v4485_v4, 16 }
  0x79   : > { %3489 = vmatmul.mubr.msk.bf16.gmra.mxu0 %vm635_vm3, %v4406_v23  ;;  %v2005_v57 = vrot.slane %v2003_v44, 4  ;;  %v2004_v29 = vsel %vm4172_vm7, %v3177_v49, %v2003_v44  ;;  %v5269_v19 = vld [vmem:[#allocation19_spill] sm:$0xff]  ;;  %v1786_v54 = vshrl.u32 %v4479_v59, 16  ;;  %v1782_v3 = vshll.u32 %v4479_v59, 16 }
  0x7a   : > { %3492 = vmatprep.mubr.msk.bf16.mxu0 %vm635_vm3, %v4411_v8  ;;  %v1775_v51 = vrot.slane %v1773_v27, 4  ;;  %v1778_v62 = vrot.slane %v1776_v25, 5 }
  0x7b   : > { %v2007_v24 = vsel %vm4172_vm7, %v2005_v57, %v2006_v7  ;;  %v1784_v44 = vrot.slane %v1782_v3, 5  ;;  %v1788_v49 = vrot.slane %v1786_v54, 4  ;;  %v5275_v57 = vld [vmem:[#allocation17_spill] sm:$0xff]  ;;  %v5276_v7 = vld [vmem:[#allocation22_spill] sm:$0xff]  ;;  %v3142_v3 = vcombine.low %v4485_v4, %v4479_v59 }
  0x7c   : > { %3455 = vmatmul.mubr.msk.bf16.gmra.mxu1 %vm635_vm3, %v4422_v20  ;;  %v4497_v11 = vcombine.low %v2004_v29, %v2007_v24  ;;  %v1779_v29 = vor.u32 %v1778_v62, %v1775_v51  ;;  %v2663_v51 = vsel %vm684_vm0, %v3233_v55, 0 }
  0x7d   : > { %3458 = vmatprep.mubr.msk.bf16.mxu1 %vm635_vm3, %v4428_v48  ;;  %v1789_v24 = vor.u32 %v1788_v49, %v1784_v44 }
  0x81   : > { %3493 = vmatmul.mubr.msk.bf16.gmra.mxu0 %vm635_vm3, %v4444_v13 }
  0x82   : > { %3496 = vmatprep.mubr.msk.bf16.mxu0 %vm635_vm3, %v4446_v16 }
  0x84   : > { %3459 = vmatmul.mubr.msk.bf16.gmra.mxu1 %vm635_vm3, %v4450_v39 }
  0x85   : > { %3462 = vmatprep.mubr.msk.bf16.mxu1 %vm635_vm3, %v4456_v22 }
  0x89   : > { %3497 = vmatmul.mubr.msk.bf16.gmra.mxu0 %vm635_vm3, %v4361_v21 }
  0x8a   : > { %3500 = vmatprep.mubr.msk.bf16.mxu0 %vm635_vm3, %v4376_v50 }
  0x8c   : > { %3463 = vmatmul.mubr.msk.bf16.gmra.mxu1 %vm635_vm3, %v4325_v18 }
  0x8d   : > { %3466 = vmatprep.mubr.msk.bf16.mxu1 %vm635_vm3, %v4338_v6 }
  0x91   : > { %3501 = vmatmul.mubr.msk.bf16.gmra.mxu0 %vm635_vm3, %v4398_v52 }
  0x92   : > { %3504 = vmatprep.mubr.msk.bf16.mxu0 %vm635_vm3, %v4409_v58 }
  0x94   : > { %3467 = vmatmul.mubr.msk.bf16.gmra.mxu1 %vm635_vm3, %v4352_v43 }
  0x95   : > { %3470 = vmatprep.mubr.msk.bf16.mxu1 %vm635_vm3, %v4367_v28 }
  0x99   : > { %3505 = vmatmul.mubr.msk.bf16.gmra.mxu0 %vm635_vm3, %v4418_v2 }
  0x9a   : > { %3544 = vmatprep.mubr.msk.bf16.mxu0 %vm635_vm3, %v5265_v61  ;;  %v1792_v61 = vshll.u32 %v193_v41, 16 }
  0x9c   : > { %3471 = vmatmul.mubr.msk.bf16.gmra.mxu1 %vm635_vm3, %v4382_v9  ;;  %v1794_v27 = vrot.slane %v1792_v61, 5  ;;  %v4689_v61 = vld [vmem:[%s3804_s20 + $0xd0] sm:$0xf] }
  0x9d   : > { %3510 = vmatprep.mubr.msk.bf16.mxu1 %vm635_vm3, %v4184_v45  ;;  %v3214_v45 = vld [vmem:[%s5177_s1 + $0xe] sm:$0x3] }
  0x9e   : > { %v2451_v62 = vsel %vm684_vm0, %v3214_v45, 0 }
  0xa1   : > { %3545 = vmatmul.mubr.msk.bf16.vlgmr.msra.gmra.mxu0 %vm635_vm3, %v5266_v34 }
  0xa2   : > { %3611 = vmatpush3.bf16.msra.mxu0 %v2223_v38  ;;  %3548 = vmatprep.mubr.msk.bf16.mxu0 %vm635_vm3, %v5267_v42  ;;  %v1780_v38 = vrot.slane %v1779_v29, 4 }
  0xa3   : > { %3723 = vmatprep.subr.msk.bf16.mxu0 %vm684_vm0, %v3233_v55 }
  0xa4   : > { %3511 = vmatmul.mubr.msk.bf16.vlgmr.msra.gmra.mxu1 %vm635_vm3, %v4211_v63  ;;  %v1785_v25 = vsel %vm3849_vm4, %v1780_v38, %v1784_v44 }
  0xa5   : > { %3577 = vmatpush3.bf16.msra.mxu1 %v2017_v31  ;;  %3514 = vmatprep.mubr.msk.bf16.mxu1 %vm635_vm3, %v4302_v53  ;;  %v1790_v31 = vrot.slane %v1789_v24, 4 }
  0xa6   : > { %3722 = vmatprep.subr.msk.bf16.mxu1 %vm684_vm0, %v3214_v45 }
  0xa7   : > { %v1795_v41 = vsel %vm3849_vm4, %v1790_v31, %v1794_v27 }
  0xa8   : > { %v4579_v54 = vcombine.low %v1785_v25, %v1795_v41 }
  0xa9   : > { %3549 = vmatmul.mubr.msk.bf16.gmra.mxu0 %vm635_vm3, %v5268_v46 }
  0xaa   : > { %3552 = vmatprep.mubr.msk.bf16.mxu0 %vm635_vm3, %v5269_v19  ;;  %5277 = vst [vmem:[#allocation16_spill] sm:$0xff] %v4579_v54 }
  0xac   : > { %3515 = vmatmul.mubr.msk.bf16.gmra.mxu1 %vm635_vm3, %v4306_v33 }
  0xad   : > { %3518 = vmatprep.mubr.msk.bf16.mxu1 %vm635_vm3, %v4310_v56 }
  0xb1   : > { %3553 = vmatmul.mubr.msk.bf16.gmra.mxu0 %vm635_vm3, %v5270_v36 }
  0xb2   : > { %3556 = vmatprep.mubr.msk.bf16.mxu0 %vm635_vm3, %v4193_v15 }
  0xb4   : > { %3519 = vmatmul.mubr.msk.bf16.gmra.mxu1 %vm635_vm3, %v4314_v17 }
  0xb5   : > { %3522 = vmatprep.mubr.msk.bf16.mxu1 %vm635_vm3, %v4422_v20 }
  0xb9   : > { %3557 = vmatmul.mubr.msk.bf16.gmra.mxu0 %vm635_vm3, %v5271_v26 }
  0xba   : > { %3560 = vmatprep.mubr.msk.bf16.mxu0 %vm635_vm3, %v5272_v0 }
  0xbc   : > { %3523 = vmatmul.mubr.msk.bf16.gmra.mxu1 %vm635_vm3, %v4428_v48 }
  0xbd   : > { %3526 = vmatprep.mubr.msk.bf16.mxu1 %vm635_vm3, %v4450_v39 }
  0xc1   : > { %3561 = vmatmul.mubr.msk.bf16.gmra.mxu0 %vm635_vm3, %v5273_v35 }
  0xc2   : > { %3564 = vmatprep.mubr.msk.bf16.mxu0 %vm635_vm3, %v5274_v40 }
  0xc4   : > { %3527 = vmatmul.mubr.msk.bf16.gmra.mxu1 %vm635_vm3, %v4456_v22 }
  0xc5   : > { %3530 = vmatprep.mubr.msk.bf16.mxu1 %vm635_vm3, %v4325_v18 }
  0xc9   : > { %3565 = vmatmul.mubr.msk.bf16.gmra.mxu0 %vm635_vm3, %v5275_v57 }
  0xca   : > { %3568 = vmatprep.mubr.msk.bf16.mxu0 %vm635_vm3, %v5276_v7 }
  0xcc   : > { %3531 = vmatmul.mubr.msk.bf16.gmra.mxu1 %vm635_vm3, %v4338_v6 }
  0xcd   : > { %3534 = vmatprep.mubr.msk.bf16.mxu1 %vm635_vm3, %v4352_v43 }
  0xd1   : > { %3569 = vmatmul.mubr.msk.bf16.gmra.mxu0 %vm635_vm3, %v4167_v5 }
  0xd2   : > { %3572 = vmatprep.mubr.msk.bf16.mxu0 %vm635_vm3, %v4221_v12 }
  0xd4   : > { %3535 = vmatmul.mubr.msk.bf16.gmra.mxu1 %vm635_vm3, %v4367_v28 }
  0xd5   : > { %3538 = vmatprep.mubr.msk.bf16.mxu1 %vm635_vm3, %v4382_v9 }
  0xd9   : > { %3573 = vmatmul.mubr.msk.bf16.gmra.mxu0 %vm635_vm3, %v4579_v54 }
  0xda   : > { %3612 = vmatprep.mubr.msk.bf16.mxu0 %vm635_vm3, %v4211_v63 }
  0xdc   : > { %3539 = vmatmul.mubr.msk.bf16.gmra.mxu1 %vm635_vm3, %v3142_v3 }
  0xdd   : > { %3578 = vmatprep.mubr.msk.bf16.mxu1 %vm635_vm3, %v4218_v47 }
  0xe1   : > { %3613 = vmatmul.mubr.msk.bf16.vlgmr.msra.gmra.mxu0 %vm635_vm3, %v4302_v53 }
  0xe2   : > { %3679 = vmatpush3.bf16.msra.mxu0 %v2663_v51  ;;  %3616 = vmatprep.mubr.msk.bf16.mxu0 %vm635_vm3, %v4306_v33 }
  0xe4   : > { %3579 = vmatmul.mubr.msk.bf16.vlgmr.msra.gmra.mxu1 %vm635_vm3, %v4241_v37 }
  0xe5   : > { %3645 = vmatpush3.bf16.msra.mxu1 %v2451_v62  ;;  %3582 = vmatprep.mubr.msk.bf16.mxu1 %vm635_vm3, %v4281_v14  ;;  %v4602_v63 = vpop.f32.mrf.mxu0 }
  0xe7   : > { %v4612_v53 = vpop.f32.mrf.mxu0 }
  0xe9   : > { %3617 = vmatmul.mubr.msk.bf16.gmra.mxu0 %vm635_vm3, %v4310_v56  ;;  %v4618_v56 = vpop.f32.mrf.mxu0 }
  0xea   : > { %3620 = vmatprep.mubr.msk.bf16.mxu0 %vm635_vm3, %v4314_v17  ;;  %v4608_v47 = vpop.f32.mrf.mxu1 }
  0xeb   : > { %v4628_v59 = vpop.f32.mrf.mxu0 }
  0xec   : > { %3583 = vmatmul.mubr.msk.bf16.gmra.mxu1 %vm635_vm3, %v4283_v10  ;;  %v4614_v33 = vpop.f32.mrf.mxu1 }
  0xed   : > { %3586 = vmatprep.mubr.msk.bf16.mxu1 %vm635_vm3, %v4318_v30 }
  0xee   : > { %v4624_v17 = vpop.f32.mrf.mxu1 }
  0xf0   : > { %v4630_v4 = vpop.f32.mrf.mxu1 }
  0xf1   : > { %3621 = vmatmul.mubr.msk.bf16.gmra.mxu0 %vm635_vm3, %v4422_v20 }
  0xf2   : > { %3624 = vmatprep.mubr.msk.bf16.mxu0 %vm635_vm3, %v4428_v48 }
  0xf4   : > { %3587 = vmatmul.mubr.msk.bf16.gmra.mxu1 %vm635_vm3, %v4320_v1 }
  0xf5   : > { %3590 = vmatprep.mubr.msk.bf16.mxu1 %vm635_vm3, %v4406_v23 }
  0xf6   : > { %v4634_v20 = vpop.f32.mrf.mxu0 }
  0xf8   : > { %v4644_v55 = vpop.f32.mrf.mxu0 }
  0xf9   : > { %3625 = vmatmul.mubr.msk.bf16.gmra.mxu0 %vm635_vm3, %v4450_v39 }
  0xfa   : > { %3628 = vmatprep.mubr.msk.bf16.mxu0 %vm635_vm3, %v4456_v22  ;;  %v4640_v48 = vpop.f32.mrf.mxu1  ;;  %v4650_v39 = vpop.f32.mrf.mxu0 }
  0xfc   : > { %3591 = vmatmul.mubr.msk.bf16.gmra.mxu1 %vm635_vm3, %v4411_v8  ;;  %v4646_v45 = vpop.f32.mrf.mxu1  ;;  %v4660_v44 = vpop.f32.mrf.mxu0 }
  0xfd   : > { %3594 = vmatprep.mubr.msk.bf16.mxu1 %vm635_vm3, %v4444_v13 }
  0xfe   : > { %v4656_v22 = vpop.f32.mrf.mxu1 }
 0x100   : > { %v4662_v49 = vpop.f32.mrf.mxu1 }
 0x101   : > { %3629 = vmatmul.mubr.msk.bf16.gmra.mxu0 %vm635_vm3, %v4325_v18 }
 0x102   : > { %3632 = vmatprep.mubr.msk.bf16.mxu0 %vm635_vm3, %v4338_v6 }
 0x104   : > { %3595 = vmatmul.mubr.msk.bf16.gmra.mxu1 %vm635_vm3, %v4446_v16 }
 0x105   : > { %3598 = vmatprep.mubr.msk.bf16.mxu1 %vm635_vm3, %v4361_v21 }
 0x107   : > { %v4666_v18 = vpop.f32.mrf.mxu0 }
 0x109   : > { %3633 = vmatmul.mubr.msk.bf16.gmra.mxu0 %vm635_vm3, %v4352_v43  ;;  %v4676_v29 = vpop.f32.mrf.mxu0 }
 0x10a   : > { %3636 = vmatprep.mubr.msk.bf16.mxu0 %vm635_vm3, %v4367_v28  ;;  %v4686_v28 = vld [vmem:[%s3804_s20 + $0xcc] sm:$0xf] }
 0x10b   : > { %v4682_v43 = vpop.f32.mrf.mxu0 }
 0x10c   : > { %3599 = vmatmul.mubr.msk.bf16.gmra.mxu1 %vm635_vm3, %v4376_v50  ;;  %v4672_v6 = vpop.f32.mrf.mxu1 }
 0x10d   : > { %5278 = vst [vmem:[#allocation20_spill] sm:$0xff] %v4672_v6  ;;  %3602 = vmatprep.mubr.msk.bf16.mxu1 %vm635_vm3, %v4398_v52  ;;  %v4695_v31 = vpop.f32.mrf.mxu0 }
 0x10e   : > { %v4678_v24 = vpop.f32.mrf.mxu1 }
 0x10f   : > { %5279 = vst [vmem:[#allocation18_spill] sm:$0xff] %v4678_v24 }
 0x110   : > { %v4693_v38 = vpop.f32.mrf.mxu1 }
 0x111   : > { %3637 = vmatmul.mubr.msk.bf16.gmra.mxu0 %vm635_vm3, %v4382_v9  ;;  %5280 = vst [vmem:[#allocation21_spill] sm:$0xff] %v4693_v38  ;;  %v3197_v9 = vcombine.low %v4686_v28, %v4689_v61 }
 0x112   : > { %3640 = vmatprep.mubr.msk.bf16.mxu0 %vm635_vm3, %v3142_v3  ;;  %v4701_v27 = vpop.f32.mrf.mxu1 }
 0x113   : > { %5281 = vst [vmem:[#allocation23_spill] sm:$0xff] %v4701_v27 }
 0x114   : > { %3603 = vmatmul.mubr.msk.bf16.gmra.mxu1 %vm635_vm3, %v4409_v58 }
 0x115   : > { %3606 = vmatprep.mubr.msk.bf16.mxu1 %vm635_vm3, %v4418_v2 }
 0x119   : > { %v4703_v25 = vpop.f32.mrf.mxu0  ;;  %3641 = vmatmul.mubr.msk.bf16.gmra.mxu0 %vm635_vm3, %v3197_v9 }
 0x11a   : > { %3680 = vmatprep.mubr.msk.bf16.mxu0 %vm635_vm3, %v4241_v37 }
 0x11b   : > { %v4708_v41 = vpop.f32.mrf.mxu0 }
 0x11c   : > { %v4710_v3 = vpop.f32.mrf.mxu1  ;;  %3607 = vmatmul.mubr.msk.bf16.gmra.mxu1 %vm635_vm3, %v4497_v11 }
 0x11d   : > { %5282 = vst [vmem:[#allocation8_spill] sm:$0xff] %v4710_v3  ;;  %v4714_v51 = vpop.f32.mrf.mxu0  ;;  %3646 = vmatprep.mubr.msk.bf16.mxu1 %vm635_vm3, %v5266_v34 }
 0x11e   : > { %v4718_v62 = vpop.f32.mrf.mxu1 }
 0x11f   : > { %5283 = vst [vmem:[#allocation3_spill] sm:$0xff] %v4718_v62  ;;  %v4720_v27 = vpop.f32.mrf.mxu0 }
 0x120   : > { %v4722_v9 = vpop.f32.mrf.mxu1 }
 0x121   : > { %5284 = vst [vmem:[#allocation4_spill] sm:$0xff] %v4722_v9  ;;  %v3478_v38 = vpop.f32.mrf.mxu0  ;;  %3681 = vmatmul.mubr.msk.bf16.vlgmr.msra.gmra.mxu0 %vm635_vm3, %v4281_v14 }
 0x122   : > { %v4726_v37 = vpop.f32.mrf.mxu1  ;;  %3684 = vmatprep.mubr.msk.bf16.mxu0 %vm635_vm3, %v4283_v10 }
 0x123   : > { %5285 = vst [vmem:[#allocation6_spill] sm:$0xff] %v4726_v37  ;;  %v1407_v3 = vpop.f32.mrf.mxu0 }
 0x124   : > { %v3444_v24 = vpop.f32.mrf.mxu1  ;;  %3647 = vmatmul.mubr.msk.bf16.vlgmr.msra.gmra.mxu1 %vm635_vm3, %v5267_v42 }
 0x125   : > { %v1023_v34 = vadd.f32 %v3444_v24, %v4602_v63  ;;  %v3479_v62 = vpop.f32.mrf.mxu0  ;;  %3650 = vmatprep.mubr.msk.bf16.mxu1 %vm635_vm3, %v5268_v46 }
 0x126   : > { %v1014_v9 = vpop.f32.mrf.mxu1 }
 0x127   : > { %v4735_v54 = vadd.f32 %v3478_v38, %v1023_v34  ;;  %v1015_v14 = vadd.f32 %v1014_v9, %v4612_v53  ;;  %v1410_v37 = vpop.f32.mrf.mxu0 }
 0x128   : > { %v3445_v6 = vpop.f32.mrf.mxu1 }
 0x129   : > { %v4738_v32 = vadd.f32 %v1407_v3, %v1015_v14  ;;  %v1026_v10 = vadd.f32 %v3445_v6, %v4618_v56  ;;  %v3482_v12 = vpop.f32.mrf.mxu0  ;;  %3685 = vmatmul.mubr.msk.bf16.gmra.mxu0 %vm635_vm3, %v4318_v30 }
 0x12a   : > { %v1017_v42 = vpop.f32.mrf.mxu1  ;;  %3688 = vmatprep.mubr.msk.bf16.mxu0 %vm635_vm3, %v4320_v1 }
 0x12b   : > { %v4745_v46 = vadd.f32 %v3479_v62, %v1026_v10  ;;  %v1018_v63 = vadd.f32 %v1017_v42, %v4628_v59  ;;  %v1423_v24 = vpop.f32.mrf.mxu0 }
 0x12c   : > { %v3448_v53 = vpop.f32.mrf.mxu1  ;;  %3651 = vmatmul.mubr.msk.bf16.gmra.mxu1 %vm635_vm3, %v5269_v19 }
 0x12d   : > { %v4750_v38 = vadd.f32 %v1410_v37, %v1018_v63  ;;  %v1039_v56 = vadd.f32 %v3448_v53, %v4634_v20  ;;  %v3483_v6 = vpop.f32.mrf.mxu0  ;;  %3654 = vmatprep.mubr.msk.bf16.mxu1 %vm635_vm3, %v5270_v36 }
 0x12e   : > { %v1030_v30 = vpop.f32.mrf.mxu1 }
 0x12f   : > { %v4755_v3 = vadd.f32 %v3482_v12, %v1039_v56  ;;  %v1031_v1 = vadd.f32 %v1030_v30, %v4644_v55  ;;  %v1426_v62 = vpop.f32.mrf.mxu0 }
 0x130   : > { %v3449_v59 = vpop.f32.mrf.mxu1 }
 0x131   : > { %v4758_v9 = vadd.f32 %v1423_v24, %v1031_v1  ;;  %v1042_v34 = vadd.f32 %v3449_v59, %v4650_v39  ;;  %v3486_v19 = vpop.f32.mrf.mxu0  ;;  %3689 = vmatmul.mubr.msk.bf16.gmra.mxu0 %vm635_vm3, %v4406_v23 }
 0x132   : > { %v1033_v20 = vpop.f32.mrf.mxu1  ;;  %3692 = vmatprep.mubr.msk.bf16.mxu0 %vm635_vm3, %v4411_v8 }
 0x133   : > { %v4765_v36 = vadd.f32 %v3483_v6, %v1042_v34  ;;  %v1034_v12 = vadd.f32 %v1033_v20, %v4660_v44  ;;  %v1439_v37 = vpop.f32.mrf.mxu0 }
 0x134   : > { %v3452_v55 = vpop.f32.mrf.mxu1  ;;  %3655 = vmatmul.mubr.msk.bf16.gmra.mxu1 %vm635_vm3, %v4193_v15 }
 0x135   : > { %v4770_v14 = vadd.f32 %v1426_v62, %v1034_v12  ;;  %v1055_v39 = vadd.f32 %v3452_v55, %v4666_v18  ;;  %v3487_v10 = vpop.f32.mrf.mxu0  ;;  %3658 = vmatprep.mubr.msk.bf16.mxu1 %vm635_vm3, %v5271_v26 }
 0x136   : > { %v1046_v23 = vpop.f32.mrf.mxu1 }
 0x137   : > { %v4775_v42 = vadd.f32 %v3486_v19, %v1055_v39  ;;  %v1047_v8 = vadd.f32 %v1046_v23, %v4676_v29  ;;  %v1442_v63 = vpop.f32.mrf.mxu0 }
 0x138   : > { %v3453_v44 = vpop.f32.mrf.mxu1 }
 0x139   : > { %v4778_v24 = vadd.f32 %v1439_v37, %v1047_v8  ;;  %v1058_v53 = vadd.f32 %v3453_v44, %v4682_v43  ;;  %v3490_v15 = vpop.f32.mrf.mxu0  ;;  %3693 = vmatmul.mubr.msk.bf16.gmra.mxu0 %vm635_vm3, %v4444_v13  ;;  %v2422_v37 = vshll.u32 %v4686_v28, 16 }
 0x13a   : > { %v1049_v18 = vpop.f32.mrf.mxu1  ;;  %3696 = vmatprep.mubr.msk.bf16.mxu0 %vm635_vm3, %v4446_v16 }
 0x13b   : > { %v4785_v26 = vadd.f32 %v3487_v10, %v1058_v53  ;;  %v1050_v56 = vadd.f32 %v1049_v18, %v4695_v31  ;;  %v1455_v6 = vpop.f32.mrf.mxu0  ;;  %v2424_v44 = vrot.slane %v2422_v37, 5 }
 0x13c   : > { %v3456_v29 = vpop.f32.mrf.mxu1  ;;  %3659 = vmatmul.mubr.msk.bf16.gmra.mxu1 %vm635_vm3, %v5272_v0 }
 0x13d   : > { %v4790_v30 = vadd.f32 %v1442_v63, %v1050_v56  ;;  %v1071_v43 = vadd.f32 %v3456_v29, %v4703_v25  ;;  %v3491_v1 = vpop.f32.mrf.mxu0  ;;  %3662 = vmatprep.mubr.msk.bf16.mxu1 %vm635_vm3, %v5273_v35 }
 0x13e   : > { %v1062_v13 = vpop.f32.mrf.mxu1 }
 0x13f   : > { %v4795_v62 = vadd.f32 %v3490_v15, %v1071_v43  ;;  %v1063_v16 = vadd.f32 %v1062_v13, %v4708_v41  ;;  %v1458_v59 = vpop.f32.mrf.mxu0  ;;  %v2419_v41 = vshrl.u32 %v4686_v28, 16 }
 0x140   : > { %v3457_v31 = vpop.f32.mrf.mxu1 }
 0x141   : > { %v4798_v34 = vadd.f32 %v1455_v6, %v1063_v16  ;;  %v1074_v19 = vadd.f32 %v3457_v31, %v4714_v51  ;;  %v3494_v0 = vpop.f32.mrf.mxu0  ;;  %3697 = vmatmul.mubr.msk.bf16.gmra.mxu0 %vm635_vm3, %v4361_v21  ;;  %v2428_v51 = vshll.u32 %v4689_v61, 16  ;;  %v2432_v21 = vshrl.u32 %v4689_v61, 16 }
 0x142   : > { %v1065_v25 = vpop.f32.mrf.mxu1  ;;  %3700 = vmatprep.mubr.msk.bf16.mxu0 %vm635_vm3, %v4376_v50 }
 0x143   : > { %v4805_v35 = vadd.f32 %v3491_v1, %v1074_v19  ;;  %v1066_v20 = vadd.f32 %v1065_v25, %v4720_v27  ;;  %v1471_v12 = vpop.f32.mrf.mxu0  ;;  %v2430_v15 = vrot.slane %v2428_v51, 5  ;;  %v2434_v18 = vrot.slane %v2432_v21, 4 }
 0x144   : > { %v3460_v55 = vpop.f32.mrf.mxu1  ;;  %3663 = vmatmul.mubr.msk.bf16.gmra.mxu1 %vm635_vm3, %v5274_v40  ;;  %v2421_v40 = vrot.slane %v2419_v41, 4  ;;  %v3232_v19 = vrot.slane %v4686_v28, 9 }
 0x145   : > { %v4814_v39 = vadd.f32 %v1458_v59, %v1066_v20  ;;  %v1087_v50 = vadd.f32 %v3460_v55, %v4608_v47  ;;  %v3495_v10 = vpop.f32.mrf.mxu0  ;;  %3666 = vmatprep.mubr.msk.bf16.mxu1 %vm635_vm3, %v5275_v57  ;;  %v2649_v57 = vrot.slane %v4689_v61, 5 }
 0x146   : > { %v1078_v27 = vpop.f32.mrf.mxu1 }
 0x147   : > { %v4819_v23 = vadd.f32 %v3494_v0, %v1087_v50  ;;  %v1079_v8 = vadd.f32 %v1078_v27, %v4614_v33  ;;  %v1474_v63 = vpop.f32.mrf.mxu0  ;;  %v196_v33 = vld [vmem:[%s3804_s20 + $0xd4] sm:$0x1] }
 0x148   : > { %v3461_v53 = vpop.f32.mrf.mxu1  ;;  %v2438_v31 = vshll.u32 %v196_v33, 16  ;;  %v2652_v25 = vrot.slane %v196_v33, 5 }
 0x149   : > { %v4822_v56 = vadd.f32 %v1471_v12, %v1079_v8  ;;  %v1090_v47 = vadd.f32 %v3461_v53, %v4624_v17  ;;  %v3498_v6 = vpop.f32.mrf.mxu0  ;;  %3701 = vmatmul.mubr.msk.bf16.gmra.mxu0 %vm635_vm3, %v4398_v52  ;;  %v2425_v17 = vor.u32 %v2424_v44, %v2421_v40 }
 0x14a   : > { %v1081_v29 = vpop.f32.mrf.mxu1  ;;  %3704 = vmatprep.mubr.msk.bf16.mxu0 %vm635_vm3, %v4409_v58  ;;  %v2435_v58 = vor.u32 %v2434_v18, %v2430_v15  ;;  %v2440_v28 = vrot.slane %v2438_v31, 5 }
 0x14b   : > { %v4831_v43 = vadd.f32 %v3495_v10, %v1090_v47  ;;  %v1082_v1 = vadd.f32 %v1081_v29, %v4630_v4  ;;  %v1487_v13 = vpop.f32.mrf.mxu0  ;;  %v2651_v4 = vrot.slane %v2649_v57, 4  ;;  %v2426_v37 = vrot.slane %v2425_v17, 4  ;;  %v5289_v47 = vld [vmem:[#allocation16_spill] sm:$0xff]  ;;  %v5290_v29 = vld [vmem:[#allocation18_spill] sm:$0xff]  ;;  %v5291_v17 = vld [vmem:[#allocation21_spill] sm:$0xff] }
 0x14c   : > { %v3464_v16 = vpop.f32.mrf.mxu1  ;;  %3667 = vmatmul.mubr.msk.bf16.gmra.mxu1 %vm635_vm3, %v5276_v7 }
 0x14d   : > { %v4836_v59 = vadd.f32 %v1474_v63, %v1082_v1  ;;  %v1103_v52 = vadd.f32 %v3464_v16, %v4640_v48  ;;  %v3499_v61 = vpop.f32.mrf.mxu0  ;;  %3670 = vmatprep.mubr.msk.bf16.mxu1 %vm635_vm3, %v4167_v5  ;;  %v2436_v5 = vrot.slane %v2435_v58, 4  ;;  %v2653_v50 = vsel %vm4172_vm7, %v2651_v4, %v2652_v25  ;;  %v5286_v63 = vld [vmem:[#allocation25_spill] sm:$0xff] }
 0x14e   : > { %v1094_v0 = vpop.f32.mrf.mxu1  ;;  %v2431_v40 = vsel %vm3849_vm4, %v2426_v37, %v2430_v15 }
 0x14f   : > { %v4842_v20 = vadd.f32 %v3498_v6, %v1103_v52  ;;  %v1095_v7 = vadd.f32 %v1094_v0, %v4646_v45  ;;  %v1490_v12 = vpop.f32.mrf.mxu0  ;;  %v2650_v45 = vsel %vm4172_vm7, %v3232_v19, %v2649_v57  ;;  %v2441_v60 = vsel %vm3849_vm4, %v2436_v5, %v2440_v28  ;;  %v5292_v19 = vld [vmem:[#allocation23_spill] sm:$0xff] }
 0x150   : > { %v3465_v41 = vpop.f32.mrf.mxu1  ;;  %v3215_v15 = vcombine.low %v2431_v40, %v2441_v60  ;;  %v5294_v5 = vld [vmem:[#allocation3_spill] sm:$0xff]  ;;  %v5296_v40 = vld [vmem:[#allocation6_spill] sm:$0xff] }
 0x151   : > { %v4845_v55 = vadd.f32 %v1487_v13, %v1095_v7  ;;  %v1106_v48 = vadd.f32 %v3465_v41, %v4656_v22  ;;  %v3502_v51 = vpop.f32.mrf.mxu0  ;;  %3705 = vmatmul.mubr.msk.bf16.gmra.mxu0 %vm635_vm3, %v4418_v2 }
 0x152   : > { %v1097_v21 = vpop.f32.mrf.mxu1  ;;  %3708 = vmatprep.mubr.msk.bf16.mxu0 %vm635_vm3, %v4497_v11  ;;  %v5288_v11 = vld [vmem:[#allocation20_spill] sm:$0xff] }
 0x153   : > { %v4856_v10 = vadd.f32 %v3499_v61, %v1106_v48  ;;  %v1098_v22 = vadd.f32 %v1097_v21, %v4662_v49  ;;  %v1503_v27 = vpop.f32.mrf.mxu0  ;;  %v3234_v49 = vcombine.low %v2650_v45, %v2653_v50 }
 0x154   : > { %v3468_v8 = vpop.f32.mrf.mxu1  ;;  %3671 = vmatmul.mubr.msk.bf16.gmra.mxu1 %vm635_vm3, %v5286_v63 }
 0x155   : > { %v4863_v44 = vadd.f32 %v1490_v12, %v1098_v22  ;;  %v1119_v53 = vadd.f32 %v3468_v8, %v5288_v11  ;;  %v3503_v18 = vpop.f32.mrf.mxu0  ;;  %3674 = vmatprep.mubr.msk.bf16.mxu1 %vm635_vm3, %v5289_v47  ;;  %v5293_v12 = vld [vmem:[#allocation8_spill] sm:$0xff] }
 0x156   : > { %v1110_v6 = vpop.f32.mrf.mxu1  ;;  %v5295_v22 = vld [vmem:[#allocation4_spill] sm:$0xff] }
 0x157   : > { %v4870_v57 = vadd.f32 %v3502_v51, %v1119_v53  ;;  %v1111_v33 = vadd.f32 %v1110_v6, %v5290_v29  ;;  %v1506_v1 = vpop.f32.mrf.mxu0 }
 0x158   : > { %v3469_v13 = vpop.f32.mrf.mxu1 }
 0x159   : > { %v4873_v16 = vadd.f32 %v1503_v27, %v1111_v33  ;;  %v1122_v52 = vadd.f32 %v3469_v13, %v5291_v17  ;;  %v3506_v61 = vpop.f32.mrf.mxu0  ;;  %3709 = vmatmul.mubr.msk.bf16.gmra.mxu0 %vm635_vm3, %v3234_v49 }
 0x15a   : > { %v1113_v58 = vpop.f32.mrf.mxu1 }
 0x15b   : > { %v4877_v31 = vadd.f32 %v3503_v18, %v1122_v52  ;;  %v1114_v0 = vadd.f32 %v1113_v58, %v5292_v19  ;;  %v1519_v4 = vpop.f32.mrf.mxu0 }
 0x15c   : > { %v3472_v25 = vpop.f32.mrf.mxu1  ;;  %3675 = vmatmul.mubr.msk.bf16.gmra.mxu1 %vm635_vm3, %v3215_v15 }
 0x15d   : > { %v4881_v7 = vadd.f32 %v1506_v1, %v1114_v0  ;;  %v1135_v41 = vadd.f32 %v3472_v25, %v5293_v12  ;;  %v3507_v37 = vpop.f32.mrf.mxu0 }
 0x15e   : > { %v1126_v48 = vpop.f32.mrf.mxu1 }
 0x15f   : > { %v4884_v51 = vadd.f32 %v3506_v61, %v1135_v41  ;;  %v1127_v28 = vadd.f32 %v1126_v48, %v5294_v5  ;;  %v1522_v21 = vpop.f32.mrf.mxu0 }
 0x160   : > { %v3473_v45 = vpop.f32.mrf.mxu1 }
 0x161   : > { %v4887_v50 = vadd.f32 %v1519_v4, %v1127_v28  ;;  %v1138_v27 = vadd.f32 %v3473_v45, %v5295_v22  ;;  %v3546_v8 = vpop.f32.mrf.mxu0 }
 0x162   : > { %v1129_v63 = vpop.f32.mrf.mxu1 }
 0x163   : > { %v4890_v2 = vadd.f32 %v3507_v37, %v1138_v27  ;;  %v1130_v11 = vadd.f32 %v1129_v63, %v5296_v40  ;;  %v1841_v53 = vpop.f32.mrf.mxu0 }
 0x164   : > { %v3512_v18 = vpop.f32.mrf.mxu1 }
 0x165   : > { %v4893_v47 = vadd.f32 %v1522_v21, %v1130_v11  ;;  %v1742_v60 = vadd.f32 %v3512_v18, %v4735_v54  ;;  %v3547_v49 = vpop.f32.mrf.mxu0 }
 0x166   : > { %v1613_v6 = vpop.f32.mrf.mxu1 }
 0x167   : > { %v4896_v29 = vadd.f32 %v3546_v8, %v1742_v60  ;;  %v1740_v33 = vadd.f32 %v1613_v6, %v4738_v32  ;;  %v1844_v1 = vpop.f32.mrf.mxu0 }
 0x168   : > { %v3513_v13 = vpop.f32.mrf.mxu1 }
 0x169   : > { %v4899_v15 = vadd.f32 %v1841_v53, %v1740_v33  ;;  %v1743_v17 = vadd.f32 %v3513_v13, %v4745_v46  ;;  %v3550_v52 = vpop.f32.mrf.mxu0 }
 0x16a   : > { %v1616_v61 = vpop.f32.mrf.mxu1 }
 0x16b   : > { %v4902_v58 = vadd.f32 %v3547_v49, %v1743_v17  ;;  %v1741_v19 = vadd.f32 %v1616_v61, %v4750_v38  ;;  %v1857_v0 = vpop.f32.mrf.mxu0 }
 0x16c   : > { %v3516_v54 = vpop.f32.mrf.mxu1 }
 0x16d   : > { %v4905_v4 = vadd.f32 %v1844_v1, %v1741_v19  ;;  %v1746_v25 = vadd.f32 %v3516_v54, %v4755_v3  ;;  %v3551_v12 = vpop.f32.mrf.mxu0 }
 0x16e   : > { %v1629_v32 = vpop.f32.mrf.mxu1 }
 0x16f   : > { %v4908_v41 = vadd.f32 %v3550_v52, %v1746_v25  ;;  %v1744_v37 = vadd.f32 %v1629_v32, %v4758_v9  ;;  %v1860_v48 = vpop.f32.mrf.mxu0 }
 0x170   : > { %v3517_v46 = vpop.f32.mrf.mxu1 }
 0x171   : > { %v4911_v5 = vadd.f32 %v1857_v0, %v1744_v37  ;;  %v1747_v28 = vadd.f32 %v3517_v46, %v4765_v36  ;;  %v3554_v21 = vpop.f32.mrf.mxu0 }
 0x172   : > { %v1632_v38 = vpop.f32.mrf.mxu1 }
 0x173   : > { %v4914_v45 = vadd.f32 %v3551_v12, %v1747_v28  ;;  %v1745_v22 = vadd.f32 %v1632_v38, %v4770_v14  ;;  %v1873_v27 = vpop.f32.mrf.mxu0 }
 0x174   : > { %v3520_v3 = vpop.f32.mrf.mxu1 }
 0x175   : > { %v4917_v8 = vadd.f32 %v1860_v48, %v1745_v22  ;;  %v1750_v63 = vadd.f32 %v3520_v3, %v4775_v42  ;;  %v3555_v40 = vpop.f32.mrf.mxu0 }
 0x176   : > { %v1645_v9 = vpop.f32.mrf.mxu1 }
 0x177   : > { %v4920_v11 = vadd.f32 %v3554_v21, %v1750_v63  ;;  %v1748_v53 = vadd.f32 %v1645_v9, %v4778_v24  ;;  %v1876_v18 = vpop.f32.mrf.mxu0 }
 0x178   : > { %v3521_v36 = vpop.f32.mrf.mxu1 }
 0x179   : > { %v4923_v60 = vadd.f32 %v1873_v27, %v1748_v53  ;;  %v1751_v49 = vadd.f32 %v3521_v36, %v4785_v26  ;;  %v3558_v6 = vpop.f32.mrf.mxu0 }
 0x17a   : > { %v1648_v14 = vpop.f32.mrf.mxu1 }
 0x17b   : > { %v4926_v33 = vadd.f32 %v3555_v40, %v1751_v49  ;;  %v1749_v1 = vadd.f32 %v1648_v14, %v4790_v30  ;;  %v1889_v13 = vpop.f32.mrf.mxu0 }
 0x17c   : > { %v3524_v42 = vpop.f32.mrf.mxu1 }
 0x17d   : > { %v4929_v17 = vadd.f32 %v1876_v18, %v1749_v1  ;;  %v1754_v52 = vadd.f32 %v3524_v42, %v4795_v62  ;;  %v3559_v61 = vpop.f32.mrf.mxu0 }
 0x17e   : > { %v1661_v24 = vpop.f32.mrf.mxu1 }
 0x17f   : > { %v4932_v19 = vadd.f32 %v3558_v6, %v1754_v52  ;;  %v1752_v0 = vadd.f32 %v1661_v24, %v4798_v34  ;;  %v1892_v54 = vpop.f32.mrf.mxu0 }
 0x180   : > { %v3525_v26 = vpop.f32.mrf.mxu1 }
 0x181   : > { %v4935_v25 = vadd.f32 %v1889_v13, %v1752_v0  ;;  %v1755_v12 = vadd.f32 %v3525_v26, %v4805_v35  ;;  %v3562_v32 = vpop.f32.mrf.mxu0 }
 0x182   : > { %v1664_v30 = vpop.f32.mrf.mxu1 }
 0x183   : > { %v4938_v37 = vadd.f32 %v3559_v61, %v1755_v12  ;;  %v1753_v48 = vadd.f32 %v1664_v30, %v4814_v39  ;;  %v1905_v46 = vpop.f32.mrf.mxu0 }
 0x184   : > { %v3528_v62 = vpop.f32.mrf.mxu1 }
 0x185   : > { %v4941_v28 = vadd.f32 %v1892_v54, %v1753_v48  ;;  %v1758_v21 = vadd.f32 %v3528_v62, %v4819_v23  ;;  %v3563_v38 = vpop.f32.mrf.mxu0 }
 0x186   : > { %v1677_v34 = vpop.f32.mrf.mxu1 }
 0x187   : > { %v4944_v22 = vadd.f32 %v3562_v32, %v1758_v21  ;;  %v1756_v27 = vadd.f32 %v1677_v34, %v4822_v56  ;;  %v1908_v3 = vpop.f32.mrf.mxu0 }
 0x188   : > { %v3529_v35 = vpop.f32.mrf.mxu1 }
 0x189   : > { %v4947_v63 = vadd.f32 %v1905_v46, %v1756_v27  ;;  %v1759_v40 = vadd.f32 %v3529_v35, %v4831_v43  ;;  %v3566_v9 = vpop.f32.mrf.mxu0 }
 0x18a   : > { %v1680_v39 = vpop.f32.mrf.mxu1 }
 0x18b   : > { %v4950_v53 = vadd.f32 %v3563_v38, %v1759_v40  ;;  %v1757_v18 = vadd.f32 %v1680_v39, %v4836_v59  ;;  %v1921_v36 = vpop.f32.mrf.mxu0 }
 0x18c   : > { %v3532_v23 = vpop.f32.mrf.mxu1 }
 0x18d   : > { %v4953_v49 = vadd.f32 %v1908_v3, %v1757_v18  ;;  %v1762_v6 = vadd.f32 %v3532_v23, %v4842_v20  ;;  %v3567_v14 = vpop.f32.mrf.mxu0 }
 0x18e   : > { %v1693_v56 = vpop.f32.mrf.mxu1 }
 0x18f   : > { %v4956_v1 = vadd.f32 %v3566_v9, %v1762_v6  ;;  %v1760_v13 = vadd.f32 %v1693_v56, %v4845_v55  ;;  %v1924_v42 = vpop.f32.mrf.mxu0 }
 0x190   : > { %v3533_v43 = vpop.f32.mrf.mxu1 }
 0x191   : > { %v4959_v52 = vadd.f32 %v1921_v36, %v1760_v13  ;;  %v1763_v61 = vadd.f32 %v3533_v43, %v4856_v10  ;;  %v3570_v24 = vpop.f32.mrf.mxu0 }
 0x192   : > { %v1696_v59 = vpop.f32.mrf.mxu1 }
 0x193   : > { %v4962_v0 = vadd.f32 %v3567_v14, %v1763_v61  ;;  %v1761_v54 = vadd.f32 %v1696_v59, %v4863_v44  ;;  %v1937_v26 = vpop.f32.mrf.mxu0 }
 0x194   : > { %v3536_v20 = vpop.f32.mrf.mxu1 }
 0x195   : > { %v4965_v12 = vadd.f32 %v1924_v42, %v1761_v54  ;;  %v1766_v32 = vadd.f32 %v3536_v20, %v4870_v57  ;;  %v3571_v30 = vpop.f32.mrf.mxu0 }
 0x196   : > { %v1709_v55 = vpop.f32.mrf.mxu1 }
 0x197   : > { %v4968_v48 = vadd.f32 %v3570_v24, %v1766_v32  ;;  %v1764_v46 = vadd.f32 %v1709_v55, %v4873_v16  ;;  %v1940_v62 = vpop.f32.mrf.mxu0  ;;  %v3760_v55 = vmov 0.0  }
 0x198   : > { %v3537_v10 = vpop.f32.mrf.mxu1  ;;  %2858 = vst [vmem:[%s5004_s8] sm:$0xff] %v3760_v55 }
 0x199   : > { %v4971_v21 = vadd.f32 %v1937_v26, %v1764_v46  ;;  %v1767_v38 = vadd.f32 %v3537_v10, %v4877_v31  ;;  %v3574_v34 = vpop.f32.mrf.mxu0 }
 0x19a   : > { %v1712_v44 = vpop.f32.mrf.mxu1 }
 0x19b   : > { %5297 = vst [vmem:[#allocation9_spill] sm:$0xff] %v4971_v21  ;;  %v4974_v27 = vadd.f32 %v3571_v30, %v1767_v38  ;;  %v1765_v3 = vadd.f32 %v1712_v44, %v4881_v7  ;;  %v1953_v35 = vpop.f32.mrf.mxu0 }
 0x19c   : > { %v3540_v57 = vpop.f32.mrf.mxu1 }
 0x19d   : > { %v4977_v40 = vadd.f32 %v1940_v62, %v1765_v3  ;;  %v1770_v9 = vadd.f32 %v3540_v57, %v4884_v51  ;;  %v3575_v39 = vpop.f32.mrf.mxu0 }
 0x19e   : > { %v1725_v16 = vpop.f32.mrf.mxu1 }
 0x19f   : > { %5298 = vst [vmem:[#allocation7_spill] sm:$0xff] %v4977_v40  ;;  %v4980_v18 = vadd.f32 %v3574_v34, %v1770_v9  ;;  %v1768_v36 = vadd.f32 %v1725_v16, %v4887_v50  ;;  %v1956_v23 = vpop.f32.mrf.mxu0 }
 0x1a0   : > { %v3541_v31 = vpop.f32.mrf.mxu1 }
 0x1a1   : > { %v4983_v6 = vadd.f32 %v1953_v35, %v1768_v36  ;;  %v1771_v14 = vadd.f32 %v3541_v31, %v4890_v2  ;;  %v3614_v7 = vpop.f32.mrf.mxu0 }
 0x1a2   : > { %v1728_v56 = vpop.f32.mrf.mxu1 }
 0x1a3   : > { %5299 = vst [vmem:[#allocation11_spill] sm:$0xff] %v4983_v6  ;;  %v4986_v13 = vadd.f32 %v3575_v39, %v1771_v14  ;;  %v1769_v42 = vadd.f32 %v1728_v56, %v4893_v47  ;;  %v2259_v51 = vpop.f32.mrf.mxu0 }
 0x1a4   : > { %v3580_v43 = vpop.f32.mrf.mxu1 }
 0x1a5   : > { %v4989_v61 = vadd.f32 %v1956_v23, %v1769_v42  ;;  %v2182_v24 = vadd.f32 %v3580_v43, %v4896_v29  ;;  %v3615_v50 = vpop.f32.mrf.mxu0 }
 0x1a6   : > { %v2053_v59 = vpop.f32.mrf.mxu1 }
 0x1a7   : > { %5300 = vst [vmem:[#allocation13_spill] sm:$0xff] %v4989_v61  ;;  %v4992_v54 = vadd.f32 %v3614_v7, %v2182_v24  ;;  %v2180_v26 = vadd.f32 %v2053_v59, %v4899_v15  ;;  %v4995_v20 = vpop.f32.mrf.mxu0 }
 0x1a8   : > { %v3581_v2 = vpop.f32.mrf.mxu1 }
 0x1a9   : > { %v4998_v32 = vadd.f32 %v2259_v51, %v2180_v26  ;;  %v2183_v47 = vadd.f32 %v3581_v2, %v4902_v58  ;;  %v3618_v30 = vpop.f32.mrf.mxu0 }
 0x1aa   : > { %v5006_v29 = vpop.f32.mrf.mxu1 }
 0x1ab   : > { %v5009_v15 = vadd.f32 %v3615_v50, %v2183_v47  ;;  %v5011_v46 = vpop.f32.mrf.mxu0 }
 0x1ac   : > { %v3584_v62 = vpop.f32.mrf.mxu1 }
 0x1ad   : > { %v2186_v10 = vadd.f32 %v3584_v62, %v4908_v41  ;;  %v3619_v38 = vpop.f32.mrf.mxu0 }
 0x1ae   : > { %v5014_v58 = vpop.f32.mrf.mxu1 }
 0x1af   : > { %v5016_v34 = vadd.f32 %v3618_v30, %v2186_v10  ;;  %v5018_v44 = vpop.f32.mrf.mxu0 }
 0x1b0   : > { %v3585_v3 = vpop.f32.mrf.mxu1 }
 0x1b1   : > { %v2187_v35 = vadd.f32 %v3585_v3, %v4914_v45  ;;  %v3622_v57 = vpop.f32.mrf.mxu0 }
 0x1b2   : > { %v5021_v9 = vpop.f32.mrf.mxu1 }
 0x1b3   : > { %v5023_v39 = vadd.f32 %v3619_v38, %v2187_v35  ;;  %v5025_v16 = vpop.f32.mrf.mxu0 }
 0x1b4   : > { %v3588_v36 = vpop.f32.mrf.mxu1 }
 0x1b5   : > { %v2190_v41 = vadd.f32 %v3588_v36, %v4920_v11  ;;  %v3623_v23 = vpop.f32.mrf.mxu0 }
 0x1b6   : > { %v5028_v31 = vpop.f32.mrf.mxu1 }
 0x1b7   : > { %v5030_v14 = vadd.f32 %v3622_v57, %v2190_v41  ;;  %v5032_v7 = vpop.f32.mrf.mxu0 }
 0x1b8   : > { %v3589_v56 = vpop.f32.mrf.mxu1 }
 0x1b9   : > { %v2191_v45 = vadd.f32 %v3589_v56, %v4926_v33  ;;  %v3626_v42 = vpop.f32.mrf.mxu0 }
 0x1ba   : > { %v5035_v51 = vpop.f32.mrf.mxu1 }
 0x1bb   : > { %v5037_v43 = vadd.f32 %v3623_v23, %v2191_v45  ;;  %v5039_v24 = vpop.f32.mrf.mxu0 }
 0x1bc   : > { %v3592_v50 = vpop.f32.mrf.mxu1 }
 0x1bd   : > { %v2194_v11 = vadd.f32 %v3592_v50, %v4932_v19  ;;  %v3627_v59 = vpop.f32.mrf.mxu0 }
 0x1be   : > { %v5042_v26 = vpop.f32.mrf.mxu1 }
 0x1bf   : > { %v5044_v2 = vadd.f32 %v3626_v42, %v2194_v11  ;;  %v5046_v47 = vpop.f32.mrf.mxu0 }
 0x1c0   : > { %v3593_v30 = vpop.f32.mrf.mxu1 }
 0x1c1   : > { %v2195_v33 = vadd.f32 %v3593_v30, %v4938_v37  ;;  %v3630_v55 = vpop.f32.mrf.mxu0 }
 0x1c2   : > { %v5049_v62 = vpop.f32.mrf.mxu1 }
 0x1c3   : > { %v5051_v10 = vadd.f32 %v3627_v59, %v2195_v33  ;;  %v5053_v38 = vpop.f32.mrf.mxu0 }
 0x1c4   : > { %v3596_v3 = vpop.f32.mrf.mxu1 }
 0x1c5   : > { %v2198_v19 = vadd.f32 %v3596_v3, %v4944_v22  ;;  %v3631_v35 = vpop.f32.mrf.mxu0 }
 0x1c6   : > { %v5056_v57 = vpop.f32.mrf.mxu1 }
 0x1c7   : > { %v5058_v36 = vadd.f32 %v3630_v55, %v2198_v19  ;;  %v5060_v41 = vpop.f32.mrf.mxu0 }
 0x1c8   : > { %v3597_v23 = vpop.f32.mrf.mxu1 }
 0x1c9   : > { %v2199_v37 = vadd.f32 %v3597_v23, %v4950_v53  ;;  %v3634_v56 = vpop.f32.mrf.mxu0 }
 0x1ca   : > { %v5063_v45 = vpop.f32.mrf.mxu1 }
 0x1cb   : > { %v5065_v42 = vadd.f32 %v3631_v35, %v2199_v37  ;;  %v5067_v50 = vpop.f32.mrf.mxu0 }
 0x1cc   : > { %v3600_v11 = vpop.f32.mrf.mxu1 }
 0x1cd   : > { %v2202_v22 = vadd.f32 %v3600_v11, %v4956_v1  ;;  %v3635_v59 = vpop.f32.mrf.mxu0 }
 0x1ce   : > { %v5070_v30 = vpop.f32.mrf.mxu1 }
 0x1cf   : > { %v5072_v33 = vadd.f32 %v3634_v56, %v2202_v22  ;;  %v5074_v55 = vpop.f32.mrf.mxu0 }
 0x1d0   : > { %v3601_v3 = vpop.f32.mrf.mxu1 }
 0x1d1   : > { %5301 = vst [vmem:[#allocation15_spill] sm:$0xff] %v5072_v33  ;;  %v2203_v53 = vadd.f32 %v3601_v3, %v4962_v0  ;;  %v3638_v19 = vpop.f32.mrf.mxu0 }
 0x1d2   : > { %v5077_v23 = vpop.f32.mrf.mxu1 }
 0x1d3   : > { %v5079_v35 = vadd.f32 %v3635_v59, %v2203_v53  ;;  %v5081_v37 = vpop.f32.mrf.mxu0 }
 0x1d4   : > { %5303 = vst [vmem:[#allocation24_spill] sm:$0xff] %v5081_v37  ;;  %v3604_v61 = vpop.f32.mrf.mxu1 }
 0x1d5   : > { %5302 = vst [vmem:[#allocation19_spill] sm:$0xff] %v5079_v35  ;;  %v2206_v1 = vadd.f32 %v3604_v61, %v4968_v48  ;;  %v3639_v11 = vpop.f32.mrf.mxu0 }
 0x1d6   : > { %v5084_v6 = vpop.f32.mrf.mxu1 }
 0x1d7   : > { %5304 = vst [vmem:[#allocation5_spill] sm:$0xff] %v5084_v6  ;;  %v5086_v56 = vadd.f32 %v3638_v19, %v2206_v1  ;;  %v5088_v22 = vpop.f32.mrf.mxu0 }
 0x1d8   : > { %5306 = vst [vmem:[#allocation12_spill] sm:$0xff] %v5088_v22  ;;  %v3605_v40 = vpop.f32.mrf.mxu1 }
 0x1d9   : > { %5305 = vst [vmem:[#allocation10_spill] sm:$0xff] %v5086_v56  ;;  %v2207_v0 = vadd.f32 %v3605_v40, %v4974_v27  ;;  %v3642_v3 = vpop.f32.mrf.mxu0 }
 0x1da   : > { %v5091_v33 = vpop.f32.mrf.mxu1 }
 0x1db   : > { %5307 = vst [vmem:[#allocation14_spill] sm:$0xff] %v5091_v33  ;;  %v5093_v59 = vadd.f32 %v3639_v11, %v2207_v0  ;;  %v5095_v53 = vpop.f32.mrf.mxu0 }
 0x1dc   : > { %5309 = vst [vmem:[#allocation22_spill] sm:$0xff] %v5095_v53  ;;  %v3608_v37 = vpop.f32.mrf.mxu1 }
 0x1dd   : > { %5308 = vst [vmem:[#allocation17_spill] sm:$0xff] %v5093_v59  ;;  %v2210_v48 = vadd.f32 %v3608_v37, %v4980_v18  ;;  %v3643_v61 = vpop.f32.mrf.mxu0  ;;  %v2181_v18 = vadd.f32 %v5006_v29, %v4905_v4  ;;  %v2185_v29 = vadd.f32 %v5021_v9, %v4917_v8 }
 0x1de   : > { %v5098_v35 = vpop.f32.mrf.mxu1 }
 0x1df   : > { %5310 = vst [vmem:[#allocation25_spill] sm:$0xff] %v5098_v35  ;;  %v5100_v19 = vadd.f32 %v3642_v3, %v2210_v48  ;;  %v5102_v1 = vpop.f32.mrf.mxu0 }
 0x1e0   : > { %5312 = vst [vmem:[#allocation20_spill] sm:$0xff] %v5102_v1  ;;  %v3609_v56 = vpop.f32.mrf.mxu1  ;;  %v2387_v1 = vadd.f32 %v4995_v20, %v2181_v18 }
 0x1e1   : > { %5311 = vst [vmem:[#allocation2_spill] sm:$0xff] %v5100_v19  ;;  %v2211_v27 = vadd.f32 %v3609_v56, %v4986_v13  ;;  %v3682_v40 = vpop.f32.mrf.mxu0  ;;  %v2184_v13 = vadd.f32 %v5014_v58, %v4911_v5 }
 0x1e2   : > { %v5105_v22 = vpop.f32.mrf.mxu1 }
 0x1e3   : > { %5313 = vst [vmem:[#allocation16_spill] sm:$0xff] %v5105_v22  ;;  %v5107_v11 = vadd.f32 %v3643_v61, %v2211_v27  ;;  %v2699_v0 = vpop.f32.mrf.mxu0 }
 0x1e4   : > { %v3648_v53 = vpop.f32.mrf.mxu1 }
 0x1e5   : > { %5314 = vst [vmem:[#allocation18_spill] sm:$0xff] %v5107_v11  ;;  %v3683_v37 = vpop.f32.mrf.mxu0  ;;  %v2616_v56 = vadd.f32 %v3648_v53, %v4992_v54 }
 0x1e6   : > { %v2487_v59 = vpop.f32.mrf.mxu1 }
 0x1e7   : > { %v2614_v3 = vadd.f32 %v2487_v59, %v4998_v32  ;;  %v2702_v48 = vpop.f32.mrf.mxu0  ;;  %v2390_v59 = vadd.f32 %v5011_v46, %v2184_v13  ;;  %v2828_v33 = vadd.f32 %v3682_v40, %v2616_v56 }
 0x1e8   : > { %v3649_v19 = vpop.f32.mrf.mxu1 }
 0x1e9   : > { %v3686_v61 = vpop.f32.mrf.mxu0  ;;  %v2617_v27 = vadd.f32 %v3649_v19, %v5009_v15  ;;  %v2826_v22 = vadd.f32 %v2699_v0, %v2614_v3  ;;  %v2391_v19 = vadd.f32 %v5018_v44, %v2185_v29  ;;  %v2899_v0 = vmul.f32 %v2828_v33, %v2828_v33 }
 0x1ea   : > { %v2490_v11 = vpop.f32.mrf.mxu1 }
 0x1eb   : > { %v2615_v35 = vadd.f32 %v2490_v11, %v2387_v1  ;;  %v2715_v4 = vpop.f32.mrf.mxu0  ;;  %v2829_v6 = vadd.f32 %v3683_v37, %v2617_v27  ;;  %v2897_v58 = vmul.f32 %v2826_v22, %v2826_v22 }
 0x1ec   : > { %v3652_v32 = vpop.f32.mrf.mxu1 }
 0x1ed   : > { %v2827_v20 = vadd.f32 %v2702_v48, %v2615_v35  ;;  %v3687_v18 = vpop.f32.mrf.mxu0  ;;  %v2620_v1 = vadd.f32 %v3652_v32, %v5016_v34  ;;  %v2188_v35 = vadd.f32 %v5028_v31, %v4923_v60  ;;  %v2900_v40 = vmul.f32 %v2829_v6, %v2829_v6 }
 0x1ee   : > { %v2503_v5 = vpop.f32.mrf.mxu1  ;;  %v2189_v34 = vadd.f32 %v5035_v51, %v4929_v17 }
 0x1ef   : > { %v2859_v54 = vadd.f32 %v2827_v20, %v2826_v22  ;;  %v2898_v53 = vmul.f32 %v2827_v20, %v2827_v20  ;;  %v2618_v21 = vadd.f32 %v2503_v5, %v2390_v59  ;;  %v2718_v15 = vpop.f32.mrf.mxu0  ;;  %v2832_v44 = vadd.f32 %v3686_v61, %v2620_v1 }
 0x1f0   : > { %v3653_v11 = vpop.f32.mrf.mxu1  ;;  %v2394_v60 = vadd.f32 %v5025_v16, %v2188_v35 }
 0x1f1   : > { %v2860_v8 = vadd.f32 %v2859_v54, %v2828_v33  ;;  %v2929_v9 = vadd.f32 %v2898_v53, %v2897_v58  ;;  %v2830_v3 = vadd.f32 %v2715_v4, %v2618_v21  ;;  %v3690_v46 = vpop.f32.mrf.mxu0  ;;  %v2621_v13 = vadd.f32 %v3653_v11, %v5023_v39 }
 0x1f2   : > { %v2506_v37 = vpop.f32.mrf.mxu1  ;;  %v2192_v54 = vadd.f32 %v5042_v26, %v4935_v25  ;;  %v2395_v53 = vadd.f32 %v5032_v7, %v2189_v34 }
 0x1f3   : > { %v2930_v48 = vadd.f32 %v2929_v9, %v2899_v0  ;;  %v2861_v22 = vadd.f32 %v2860_v8, %v2829_v6  ;;  %v2619_v56 = vadd.f32 %v2506_v37, %v2391_v19  ;;  %v2731_v27 = vpop.f32.mrf.mxu0  ;;  %v2901_v32 = vmul.f32 %v2830_v3, %v2830_v3 }
 0x1f4   : > { %v3656_v29 = vpop.f32.mrf.mxu1  ;;  %v2833_v5 = vadd.f32 %v3687_v18, %v2621_v13  ;;  %v2903_v19 = vmul.f32 %v2832_v44, %v2832_v44  ;;  %v2398_v25 = vadd.f32 %v5039_v24, %v2192_v54  ;;  %v2196_v24 = vadd.f32 %v5056_v57, %v4947_v63 }
 0x1f5   : > { %v2862_v33 = vadd.f32 %v2861_v22, %v2830_v3  ;;  %v2931_v21 = vadd.f32 %v2930_v48, %v2900_v40  ;;  %v2831_v4 = vadd.f32 %v2718_v15, %v2619_v56  ;;  %v3691_v59 = vpop.f32.mrf.mxu0  ;;  %v2624_v17 = vadd.f32 %v3656_v29, %v5030_v14 }
 0x1f6   : > { %v2519_v31 = vpop.f32.mrf.mxu1  ;;  %v2904_v8 = vmul.f32 %v2833_v5, %v2833_v5  ;;  %v2193_v56 = vadd.f32 %v5049_v62, %v4941_v28  ;;  %v2402_v54 = vadd.f32 %v5053_v38, %v2196_v24 }
 0x1f7   : > { %v2932_v20 = vadd.f32 %v2931_v21, %v2901_v32  ;;  %v2863_v6 = vadd.f32 %v2862_v33, %v2831_v4  ;;  %v2902_v58 = vmul.f32 %v2831_v4, %v2831_v4  ;;  %v2734_v39 = vpop.f32.mrf.mxu0  ;;  %v2622_v51 = vadd.f32 %v2519_v31, %v2394_v60 }
 0x1f8   : > { %v3657_v61 = vpop.f32.mrf.mxu1  ;;  %v2836_v14 = vadd.f32 %v3690_v46, %v2624_v17 }
 0x1f9   : > { %v2864_v15 = vadd.f32 %v2863_v6, %v2832_v44  ;;  %v2933_v1 = vadd.f32 %v2932_v20, %v2902_v58  ;;  %v3694_v11 = vpop.f32.mrf.mxu0  ;;  %v2834_v16 = vadd.f32 %v2731_v27, %v2622_v51  ;;  %v2625_v0 = vadd.f32 %v3657_v61, %v5037_v43 }
 0x1fa   : > { %v2522_v18 = vpop.f32.mrf.mxu1  ;;  %v2907_v21 = vmul.f32 %v2836_v14, %v2836_v14  ;;  %v2197_v51 = vadd.f32 %v5063_v45, %v4953_v49 }
 0x1fb   : > { %v2934_v9 = vadd.f32 %v2933_v1, %v2903_v19  ;;  %v2865_v3 = vadd.f32 %v2864_v15, %v2833_v5  ;;  %v2623_v35 = vadd.f32 %v2522_v18, %v2395_v53  ;;  %v2747_v40 = vpop.f32.mrf.mxu0  ;;  %v2905_v48 = vmul.f32 %v2834_v16, %v2834_v16 }
 0x1fc   : > { %v3660_v26 = vpop.f32.mrf.mxu1  ;;  %v2837_v27 = vadd.f32 %v3691_v59, %v2625_v0  ;;  %v2399_v5 = vadd.f32 %v5046_v47, %v2193_v56 }
 0x1fd   : > { %v2866_v37 = vadd.f32 %v2865_v3, %v2834_v16  ;;  %v2935_v7 = vadd.f32 %v2934_v9, %v2904_v8  ;;  %v2835_v22 = vadd.f32 %v2734_v39, %v2623_v35  ;;  %v3695_v13 = vpop.f32.mrf.mxu0  ;;  %v2628_v28 = vadd.f32 %v3660_v26, %v5044_v2 }
 0x1fe   : > { %v2535_v43 = vpop.f32.mrf.mxu1  ;;  %v2908_v59 = vmul.f32 %v2837_v27, %v2837_v27  ;;  %v2200_v35 = vadd.f32 %v5070_v30, %v4959_v52  ;;  %v2201_v52 = vadd.f32 %v5077_v23, %v4965_v12 }
 0x1ff   : > { %v2936_v34 = vadd.f32 %v2935_v7, %v2905_v48  ;;  %v2867_v44 = vadd.f32 %v2866_v37, %v2835_v22  ;;  %v2906_v29 = vmul.f32 %v2835_v22, %v2835_v22  ;;  %v2626_v33 = vadd.f32 %v2535_v43, %v2398_v25  ;;  %v2750_v32 = vpop.f32.mrf.mxu0 }
 0x200   : > { %v3661_v46 = vpop.f32.mrf.mxu1  ;;  %v2840_v15 = vadd.f32 %v3694_v11, %v2628_v28 }
 0x201   : > { %v2868_v4 = vadd.f32 %v2867_v44, %v2836_v14  ;;  %v2937_v60 = vadd.f32 %v2936_v34, %v2906_v29  ;;  %v2838_v31 = vadd.f32 %v2747_v40, %v2626_v33  ;;  %v3698_v20 = vpop.f32.mrf.mxu0  ;;  %v2629_v17 = vadd.f32 %v3661_v46, %v5051_v10 }
 0x202   : > { %v2538_v62 = vpop.f32.mrf.mxu1  ;;  %v2403_v10 = vadd.f32 %v5060_v41, %v2197_v51  ;;  %v2911_v40 = vmul.f32 %v2840_v15, %v2840_v15  ;;  %v2406_v41 = vadd.f32 %v5067_v50, %v2200_v35  ;;  %v5315_v50 = vld [vmem:[#allocation9_spill] sm:$0xff] }
 0x203   : > { %v2938_v6 = vadd.f32 %v2937_v60, %v2907_v21  ;;  %v2869_v58 = vadd.f32 %v2868_v4, %v2837_v27  ;;  %v2763_v39 = vpop.f32.mrf.mxu0  ;;  %v2627_v63 = vadd.f32 %v2538_v62, %v2399_v5  ;;  %v2909_v53 = vmul.f32 %v2838_v31, %v2838_v31  ;;  %v5316_v5 = vld [vmem:[#allocation5_spill] sm:$0xff] }
 0x204   : > { %v3664_v57 = vpop.f32.mrf.mxu1  ;;  %v2841_v8 = vadd.f32 %v3695_v13, %v2629_v17  ;;  %v2204_v28 = vadd.f32 %v5316_v5, %v5315_v50 }
 0x205   : > { %v2870_v61 = vadd.f32 %v2869_v58, %v2838_v31  ;;  %v2939_v19 = vadd.f32 %v2938_v6, %v2908_v59  ;;  %v3699_v47 = vpop.f32.mrf.mxu0  ;;  %v2839_v2 = vadd.f32 %v2750_v32, %v2627_v63  ;;  %v2632_v49 = vadd.f32 %v3664_v57, %v5058_v36  ;;  %v5317_v59 = vld [vmem:[#allocation15_spill] sm:$0xff] }
 0x206   : > { %v2551_v1 = vpop.f32.mrf.mxu1  ;;  %v2912_v7 = vmul.f32 %v2841_v8, %v2841_v8  ;;  %v2407_v31 = vadd.f32 %v5074_v55, %v2201_v52  ;;  %v5319_v55 = vld [vmem:[#allocation24_spill] sm:$0xff] }
 0x207   : > { %v2940_v16 = vadd.f32 %v2939_v19, %v2909_v53  ;;  %v2630_v0 = vadd.f32 %v2551_v1, %v2402_v54  ;;  %v2766_v18 = vpop.f32.mrf.mxu0  ;;  %v2871_v9 = vadd.f32 %v2870_v61, %v2839_v2  ;;  %v2910_v38 = vmul.f32 %v2839_v2, %v2839_v2  ;;  %v5318_v61 = vld [vmem:[#allocation19_spill] sm:$0xff]  ;;  %v5321_v2 = vld [vmem:[#allocation14_spill] sm:$0xff] }
 0x208   : > { %v3665_v3 = vpop.f32.mrf.mxu1  ;;  %v2844_v36 = vadd.f32 %v3698_v20, %v2632_v49 }
 0x209   : > { %v3702_v45 = vpop.f32.mrf.mxu0  ;;  %v2872_v25 = vadd.f32 %v2871_v9, %v2840_v15  ;;  %v2941_v11 = vadd.f32 %v2940_v16, %v2910_v38  ;;  %v2842_v14 = vadd.f32 %v2763_v39, %v2630_v0  ;;  %v2633_v56 = vadd.f32 %v3665_v3, %v5065_v42  ;;  %v5320_v15 = vld [vmem:[#allocation7_spill] sm:$0xff] }
 0x20a   : > { %v2554_v26 = vpop.f32.mrf.mxu1  ;;  %v2915_v12 = vmul.f32 %v2844_v36, %v2844_v36  ;;  %v2205_v1 = vadd.f32 %v5321_v2, %v5320_v15 }
 0x20b   : > { %v2631_v37 = vadd.f32 %v2554_v26, %v2403_v10  ;;  %v2779_v48 = vpop.f32.mrf.mxu0  ;;  %v2942_v22 = vadd.f32 %v2941_v11, %v2911_v40  ;;  %v2873_v13 = vadd.f32 %v2872_v25, %v2841_v8  ;;  %v2913_v44 = vmul.f32 %v2842_v14, %v2842_v14  ;;  %v5322_v26 = vld [vmem:[#allocation12_spill] sm:$0xff] }
 0x20c   : > { %v3668_v27 = vpop.f32.mrf.mxu1  ;;  %v2845_v4 = vadd.f32 %v3699_v47, %v2633_v56  ;;  %v2410_v47 = vadd.f32 %v5319_v55, %v2204_v28  ;;  %v5331_v55 = vld [vmem:[#allocation2_spill] sm:$0xff] }
 0x20d   : > { %v2843_v30 = vadd.f32 %v2766_v18, %v2631_v37  ;;  %v3703_v43 = vpop.f32.mrf.mxu0  ;;  %v2874_v34 = vadd.f32 %v2873_v13, %v2842_v14  ;;  %v2943_v29 = vadd.f32 %v2942_v22, %v2912_v7  ;;  %v2636_v6 = vadd.f32 %v3668_v27, %v5317_v59  ;;  %v5324_v7 = vld [vmem:[#allocation25_spill] sm:$0xff]  ;;  %v5325_v13 = vld [vmem:[#allocation10_spill] sm:$0xff] }
 0x20e   : > { %v2567_v33 = vpop.f32.mrf.mxu1  ;;  %v2916_v63 = vmul.f32 %v2845_v4, %v2845_v4  ;;  %v2411_v37 = vadd.f32 %v5322_v26, %v2205_v1 }
 0x20f   : > { %v2914_v32 = vmul.f32 %v2843_v30, %v2843_v30  ;;  %v2634_v24 = vadd.f32 %v2567_v33, %v2406_v41  ;;  %v2782_v46 = vpop.f32.mrf.mxu0  ;;  %v2944_v21 = vadd.f32 %v2943_v29, %v2913_v44  ;;  %v2875_v60 = vadd.f32 %v2874_v34, %v2843_v30 }
 0x210   : > { %v3669_v42 = vpop.f32.mrf.mxu1  ;;  %v2848_v18 = vadd.f32 %v3702_v45, %v2636_v6 }
 0x211   : > { %v3706_v23 = vpop.f32.mrf.mxu0  ;;  %v2876_v20 = vadd.f32 %v2875_v60, %v2844_v36  ;;  %v2945_v62 = vadd.f32 %v2944_v21, %v2914_v32  ;;  %v2846_v58 = vadd.f32 %v2779_v48, %v2634_v24  ;;  %v2637_v53 = vadd.f32 %v3669_v42, %v5318_v61  ;;  %v5323_v48 = vld [vmem:[#allocation11_spill] sm:$0xff]  ;;  %v5327_v21 = vld [vmem:[#allocation22_spill] sm:$0xff]  ;;  %v5328_v60 = vld [vmem:[#allocation13_spill] sm:$0xff] }
 0x212   : > { %v2570_v39 = vpop.f32.mrf.mxu1  ;;  %v2208_v22 = vadd.f32 %v5324_v7, %v5323_v48  ;;  %v2919_v45 = vmul.f32 %v2848_v18, %v2848_v18  ;;  %v5329_v42 = vld [vmem:[#allocation16_spill] sm:$0xff] }
 0x213   : > { %v2635_v54 = vadd.f32 %v2570_v39, %v2407_v31  ;;  %v2795_v17 = vpop.f32.mrf.mxu0  ;;  %v2946_v57 = vadd.f32 %v2945_v62, %v2915_v12  ;;  %v2877_v51 = vadd.f32 %v2876_v20, %v2845_v4  ;;  %v2917_v9 = vmul.f32 %v2846_v58, %v2846_v58 }
 0x214   : > { %v3672_v19 = vpop.f32.mrf.mxu1  ;;  %v2849_v25 = vadd.f32 %v3703_v43, %v2637_v53  ;;  %v5326_v43 = vld [vmem:[#allocation17_spill] sm:$0xff]  ;;  %v2414_v4 = vadd.f32 %v5327_v21, %v2208_v22  ;;  %v2209_v31 = vadd.f32 %v5329_v42, %v5328_v60 }
 0x215   : > { %v2847_v16 = vadd.f32 %v2782_v46, %v2635_v54  ;;  %v3707_v0 = vpop.f32.mrf.mxu0  ;;  %v2878_v8 = vadd.f32 %v2877_v51, %v2846_v58  ;;  %v2947_v38 = vadd.f32 %v2946_v57, %v2916_v63  ;;  %v2640_v56 = vadd.f32 %v3672_v19, %v5325_v13  ;;  %v5330_v57 = vld [vmem:[#allocation20_spill] sm:$0xff] }
 0x216   : > { %v2583_v3 = vpop.f32.mrf.mxu1  ;;  %v2920_v44 = vmul.f32 %v2849_v25, %v2849_v25  ;;  %v2415_v51 = vadd.f32 %v5330_v57, %v2209_v31 }
 0x217   : > { %v2918_v10 = vmul.f32 %v2847_v16, %v2847_v16  ;;  %v2638_v35 = vadd.f32 %v2583_v3, %v2410_v47  ;;  %v2798_v49 = vpop.f32.mrf.mxu0  ;;  %v2948_v40 = vadd.f32 %v2947_v38, %v2917_v9  ;;  %v2879_v11 = vadd.f32 %v2878_v8, %v2847_v16  ;;  %v5332_v8 = vld [vmem:[#allocation18_spill] sm:$0xff] }
 0x218   : > { %v3673_v14 = vpop.f32.mrf.mxu1  ;;  %v2852_v50 = vadd.f32 %v3706_v23, %v2640_v56 }
 0x219   : > { %v3710_v27 = vpop.f32.mrf.mxu0  ;;  %v2880_v41 = vadd.f32 %v2879_v11, %v2848_v18  ;;  %v2949_v52 = vadd.f32 %v2948_v40, %v2918_v10  ;;  %v2850_v36 = vadd.f32 %v2795_v17, %v2638_v35  ;;  %v2641_v32 = vadd.f32 %v3673_v14, %v5326_v43 }
 0x21a   : > { %v2586_v30 = vpop.f32.mrf.mxu1  ;;  %v2923_v61 = vmul.f32 %v2852_v50, %v2852_v50 }
 0x21b   : > { %v2639_v34 = vadd.f32 %v2586_v30, %v2411_v37  ;;  %v2950_v29 = vadd.f32 %v2949_v52, %v2919_v45  ;;  %v2881_v33 = vadd.f32 %v2880_v41, %v2849_v25  ;;  %v2811_v46 = vpop.f32.mrf.mxu0  ;;  %v2921_v12 = vmul.f32 %v2850_v36, %v2850_v36 }
 0x21c   : > { %v3676_v24 = vpop.f32.mrf.mxu1  ;;  %v2853_v39 = vadd.f32 %v3707_v0, %v2641_v32 }
 0x21d   : > { %v2851_v5 = vadd.f32 %v2798_v49, %v2639_v34  ;;  %v2882_v28 = vadd.f32 %v2881_v33, %v2850_v36  ;;  %v2951_v20 = vadd.f32 %v2950_v29, %v2920_v44  ;;  %v3711_v63 = vpop.f32.mrf.mxu0  ;;  %v2644_v47 = vadd.f32 %v3676_v24, %v5331_v55 }
 0x21e   : > { %v2599_v62 = vpop.f32.mrf.mxu1  ;;  %v2924_v1 = vmul.f32 %v2853_v39, %v2853_v39 }
 0x21f   : > { %v2922_v59 = vmul.f32 %v2851_v5, %v2851_v5  ;;  %v2642_v6 = vadd.f32 %v2599_v62, %v2414_v4  ;;  %v2952_v58 = vadd.f32 %v2951_v20, %v2921_v12  ;;  %v2883_v54 = vadd.f32 %v2882_v28, %v2851_v5  ;;  %v2814_v38 = vpop.f32.mrf.mxu0 }
 0x220   : > { %v3677_v17 = vpop.f32.mrf.mxu1  ;;  %v2856_v3 = vadd.f32 %v3710_v27, %v2644_v47 }
 0x221   : > { %v2884_v53 = vadd.f32 %v2883_v54, %v2852_v50  ;;  %v2953_v19 = vadd.f32 %v2952_v58, %v2922_v59  ;;  %v2854_v23 = vadd.f32 %v2811_v46, %v2642_v6  ;;  %v2645_v9 = vadd.f32 %v3677_v17, %v5332_v8 }
 0x222   : > { %v2602_v15 = vpop.f32.mrf.mxu1  ;;  %v2927_v26 = vmul.f32 %v2856_v3, %v2856_v3 }
 0x223   : > { %v2643_v2 = vadd.f32 %v2602_v15, %v2415_v51  ;;  %v2954_v16 = vadd.f32 %v2953_v19, %v2923_v61  ;;  %v2885_v18 = vadd.f32 %v2884_v53, %v2853_v39  ;;  %v2925_v35 = vmul.f32 %v2854_v23, %v2854_v23 }
 0x224   : > { %v2857_v11 = vadd.f32 %v3711_v63, %v2645_v9 }
 0x225   : > { %v2855_v0 = vadd.f32 %v2814_v38, %v2643_v2  ;;  %v2886_v10 = vadd.f32 %v2885_v18, %v2854_v23  ;;  %v2955_v49 = vadd.f32 %v2954_v16, %v2924_v1 }
 0x226   : > { %v2928_v7 = vmul.f32 %v2857_v11, %v2857_v11 }
 0x227   : > { %v2926_v40 = vmul.f32 %v2855_v0, %v2855_v0  ;;  %v2956_v25 = vadd.f32 %v2955_v49, %v2925_v35  ;;  %v2887_v14 = vadd.f32 %v2886_v10, %v2855_v0 }
 0x229   : > { %v2888_v37 = vadd.f32 %v2887_v14, %v2856_v3  ;;  %v2957_v48 = vadd.f32 %v2956_v25, %v2926_v40 }
 0x22b   : > { %v2889_v22 = vadd.f32 %v2888_v37, %v2857_v11  ;;  %v2958_v13 = vadd.f32 %v2957_v48, %v2927_v26 }
 0x22d   : > { %v2890_v56 = vrot.slane %v2889_v22, 4  ;;  %v2959_v45 = vadd.f32 %v2958_v13, %v2928_v7 }
 0x22f   : > { %v2891_v41 = vadd.f32 %v2890_v56, %v2889_v22  ;;  %v2960_v52 = vrot.slane %v2959_v45, 4 }
 0x231   : > { %v2892_v27 = vrot.slane %v2891_v41, 2  ;;  %v2961_v36 = vadd.f32 %v2960_v52, %v2959_v45 }
 0x233   : > { %v2893_v30 = vadd.f32 %v2892_v27, %v2891_v41  ;;  %v2962_v34 = vrot.slane %v2961_v36, 2 }
 0x235   : > { %v2894_v44 = vrot.slane %v2893_v30, 1  ;;  %v2963_v29 = vadd.f32 %v2962_v34, %v2961_v36 }
 0x237   : > { %v2895_v33 = vadd.f32 %v2894_v44, %v2893_v30  ;;  %v2964_v43 = vrot.slane %v2963_v29, 1 }
 0x239   : > { %2896 = vst [vmem:[%s5004_s8] sm:$0x1] %v2895_v33  ;;  %v2965_v32 = vadd.f32 %v2964_v43, %v2963_v29 }
 0x23b   : > { %2966 = vst [vmem:[%s5004_s8 + $0x1] sm:$0x1] %v2965_v32 }
 0x23c PF: > { %s12_s9 = sadd.s32 1, %s3758_s9  }
 0x23d   : > { %p9_p4 = scmp.ge.s32.totalorder %s12_s9, 4  }
 0x23f   :  { %11 = sbr.rel (!%p9_p4) target bundleno = 1 (0x1), region = 66 }

// kernel: cbl_forward.3
= control target key start
LH: loop header
LB: loop body
LE: loop exit
PB: predicated region body
PF: predicated region fallthrough
CT: control target
= control target key end

     0   :  { %s4035_s12 = smov 0   ;;  %s5684_s0 = inlined_call_operand.vmem [shape: bf16[2,18,18,4], index: 0, kind: input, shape index: {}]   ;;  %s5685_s1 = inlined_call_operand.vmem [shape: bf16[3,3,4,128], index: 1, kind: input, shape index: {}]   ;;  %s5686_s2 = inlined_call_operand.vmem [shape: f32[8,128], index: 2, kind: input, shape index: {}]   ;;  %s5687_s3 = inlined_call_operand.vmem [shape: f32[2,256,128], index: 3, kind: output, shape index: {}]  }
   0x1 LB: > { %s3208_s13 = sadd.s32 4294967295, %s4013_s12   ;;  %p3212_p0 = scmp.ge.s32.totalorder %s4013_s12, 1  ;;  %s4013_s12 = sphi %s4035_s12, %s13_s12  }
   0x2   : > { %p137_p1 = scmp.lt.s32.totalorder %s4013_s12, 3 }
   0x4   : > { %p138_p2 = pnand %p3212_p0, %p137_p1 }
   0x6   : > { %141 = sbr.rel (%p138_p2) target bundleno = 585 (0x249), region = 32 }
   0xb   : > { %v3216_v0 = vld [vmem:[%s5685_s1 + $0x2] sm:$0x3]  ;;  %vm713_vm0 = vcmask 1041408   ;;  %p161_p3 = scmp.lt.s32.totalorder %s3208_s13, 1  ;;  %v226_v2 = vld [vmem:[%s5685_s1] sm:$0x3] }
   0xc   : > { %3907 = vmatprep.subr.msk.bf16.mxu1 %vm713_vm0, %v3216_v0  ;;  %3906 = vmatprep.subr.msk.bf16.mxu0 %vm713_vm0, %v3216_v0  ;;  %v715_v1 = vsel %vm713_vm0, %v3216_v0, 0  ;;  %v3297_v3 = vld [vmem:[%s5685_s1 + $0x4] sm:$0x3]  ;;  %vm227_vm1 = vsmask.f32 3328  ;;  %v4066_v4 = vsel %vm713_vm0, %v226_v2, 0 }
   0xd   : > { %3905 = vmatpush3.bf16.msra.mxu1 %v715_v1  ;;  %3599 = vmatpush3.bf16.msra.mxu0 %v715_v1  ;;  %s5853_s13 = smov (!%p161_p3, %s3208_s13), 1  ;;  %vm228_vm2 = vsmask.f32 7440  ;;  %v4069_v5 = vsel %vm713_vm0, %v3297_v3, 0  ;;  %vm664_vm3 = vcmask 31744   ;;  %v5731_v32 = vmov 0 }
   0xe   : > { %3908 = vmatprep.subr.msk.bf16.mxu1 %vm713_vm0, %v226_v2  ;;  %3909 = vmatprep.subr.msk.bf16.mxu0 %vm713_vm0, %v3297_v3  ;;  %s3916_s20 = smul.u32 216, %s5853_s13  ;;  %vm4108_vm4 = vmor %vm227_vm1, %vm228_vm2  ;;  %vm1186_vm5 = vcmask 1042432   ;;  %vm1187_vm6 = vcmask 1046532   ;;  %s3444_s15 = sshll.u32 %s5853_s13, 8 }
   0xf   : > { %v5732_v32 = vsel %vm4108_vm4, 4294967295, %v5731_v32  ;;  %vm4431_vm7 = vmor %vm1186_vm5, %vm1187_vm6  ;;  %s5499_s17 = scalar_lea.vmem %s5687_s3, %s3444_s15 }
  0x10   : > { %s4063_s23 = scalar_lea.vmem %s5684_s0, %s3916_s20  ;;  %5733 = vst [vmem:[#allocation2_spill] sm:$0xff] %v5732_v32 }
  0x11   : > { %v4072_v6 = vld [vmem:[%s4063_s23] sm:$0xf]  ;;  %v4075_v7 = vld [vmem:[%s4063_s23 + $0x4] sm:$0xf]  ;;  %v4078_v8 = vld [vmem:[%s4063_s23 + $0x8] sm:$0x1] }
  0x12   : > { %v231_v9 = vshrl.u32 %v4072_v6, 16  ;;  %v234_v10 = vshll.u32 %v4072_v6, 16  ;;  %v240_v11 = vshll.u32 %v4075_v7, 16  ;;  %v244_v12 = vshrl.u32 %v4075_v7, 16  ;;  %v4085_v13 = vld [vmem:[%s4063_s23 + $0x60] sm:$0xf] }
  0x13   : > { %v250_v14 = vshll.u32 %v4078_v8, 16  ;;  %v4090_v16 = vld [vmem:[%s4063_s23 + $0x64] sm:$0xf]  ;;  %v4093_v17 = vld [vmem:[%s4063_s23 + $0x68] sm:$0x1]  ;;  %v423_v23 = vshrl.u32 %v4085_v13, 16 }
  0x14   : > { %v233_v18 = vrot.slane %v231_v9, 4  ;;  %v236_v19 = vrot.slane %v234_v10, 5  ;;  %v242_v20 = vrot.slane %v240_v11, 5  ;;  %v246_v21 = vrot.slane %v244_v12, 4  ;;  %v4101_v30 = vld [vmem:[%s4063_s23 + $0xc] sm:$0xf] }
  0x15   : > { %v252_v22 = vrot.slane %v250_v14, 5  ;;  %v426_v24 = vshll.u32 %v4085_v13, 16  ;;  %v432_v25 = vshll.u32 %v4090_v16, 16  ;;  %v436_v28 = vshrl.u32 %v4090_v16, 16  ;;  %v4104_v31 = vld [vmem:[%s4063_s23 + $0x10] sm:$0xf] }
  0x16   : > { %v237_v26 = vor.u32 %v236_v19, %v233_v18  ;;  %v247_v27 = vor.u32 %v246_v21, %v242_v20  ;;  %v442_v29 = vshll.u32 %v4093_v17, 16  ;;  %v425_v33 = vrot.slane %v423_v23, 4  ;;  %v4115_v42 = vld [vmem:[%s4063_s23 + $0x14] sm:$0x1]  ;;  %v4126_v54 = vld [vmem:[%s4063_s23 + $0x6c] sm:$0xf] }
  0x17   : > { %v428_v34 = vrot.slane %v426_v24, 5  ;;  %v434_v35 = vrot.slane %v432_v25, 5  ;;  %v438_v39 = vrot.slane %v436_v28, 4  ;;  %v255_v43 = vshrl.u32 %v4101_v30, 16  ;;  %5734 = vst [vmem:[#allocation3_spill] sm:$0xff] %v4126_v54 }
  0x18   : > { %v238_v37 = vrot.slane %v237_v26, 4  ;;  %v248_v38 = vrot.slane %v247_v27, 4  ;;  %v444_v40 = vrot.slane %v442_v29, 5  ;;  %v258_v44 = vshll.u32 %v4101_v30, 16  ;;  %v4130_v59 = vld [vmem:[%s4063_s23 + $0x70] sm:$0xf] }
  0x19   : > { %v429_v41 = vor.u32 %v428_v34, %v425_v33  ;;  %v264_v45 = vshll.u32 %v4104_v31, 16  ;;  %v439_v48 = vor.u32 %v438_v39, %v434_v35  ;;  %v268_v49 = vshrl.u32 %v4104_v31, 16  ;;  %v4138_v0 = vld [vmem:[%s4063_s23 + $0x74] sm:$0x1]  ;;  %v4144_v10 = vld [vmem:[%s4063_s23 + $0x18] sm:$0xf] }
  0x1a   : > { %v243_v46 = vsel %vm4108_vm4, %v238_v37, %v242_v20  ;;  %v253_v47 = vsel %vm4108_vm4, %v248_v38, %v252_v22  ;;  %v257_v52 = vrot.slane %v255_v43, 4  ;;  %v260_v53 = vrot.slane %v258_v44, 5  ;;  %5735 = vst [vmem:[#allocation4_spill] sm:$0xff] %v4138_v0  ;;  %v4153_v23 = vld [vmem:[%s4063_s23 + $0x1c] sm:$0xf] }
  0x1b   : > { %v3217_v50 = vcombine.low %v243_v46, %v253_v47  ;;  %v430_v51 = vrot.slane %v429_v41, 4  ;;  %v440_v55 = vrot.slane %v439_v48, 4  ;;  %v266_v56 = vrot.slane %v264_v45, 5  ;;  %v4160_v27 = vld [vmem:[%s4063_s23 + $0x20] sm:$0x1] }
  0x1c   : > { %v270_v57 = vrot.slane %v268_v49, 4  ;;  %v274_v58 = vshll.u32 %v4115_v42, 16  ;;  %v261_v61 = vor.u32 %v260_v53, %v257_v52  ;;  %v447_v9 = vshrl.u32 %v4126_v54, 16  ;;  %v4167_v37 = vld [vmem:[%s4063_s23 + $0x78] sm:$0xf] }
  0x1d   : > { %3600 = vmatprep.mubr.msk.bf16.mxu0 %vm664_vm3, %v3217_v50  ;;  %v435_v60 = vsel %vm4108_vm4, %v430_v51, %v434_v35  ;;  %v445_v1 = vsel %vm4108_vm4, %v440_v55, %v444_v40  ;;  %v450_v14 = vshll.u32 %v4126_v54, 16  ;;  %v456_v18 = vshll.u32 %v4130_v59, 16  ;;  %5737 = vst [vmem:[#allocation6_spill] sm:$0xff] %v4167_v37  ;;  %v4175_v43 = vld [vmem:[%s5685_s1 + $0x8] sm:$0x3] }
  0x1e   : > { %v271_v2 = vor.u32 %v270_v57, %v266_v56  ;;  %v276_v3 = vrot.slane %v274_v58, 5  ;;  %v4146_v11 = vcombine.low %v435_v60, %v445_v1  ;;  %v262_v12 = vrot.slane %v261_v61, 4  ;;  %v4180_v48 = vld [vmem:[%s4063_s23 + $0x7c] sm:$0xf]  ;;  %v4188_v58 = vld [vmem:[%s4063_s23 + $0x80] sm:$0x1] }
  0x1f   : > { %v449_v20 = vrot.slane %v447_v9, 4  ;;  %v460_v21 = vshrl.u32 %v4130_v59, 16  ;;  %v466_v22 = vshll.u32 %v4138_v0, 16  ;;  %v452_v25 = vrot.slane %v450_v14, 5  ;;  %5739 = vst [vmem:[#allocation8_spill] sm:$0xff] %v4180_v48  ;;  %5740 = vst [vmem:[#allocation9_spill] sm:$0xff] %v4188_v58 }
  0x20   : > { %5736 = vst [vmem:[#allocation5_spill] sm:$0xff] %v4146_v11  ;;  %v272_v19 = vrot.slane %v271_v2, 4  ;;  %3616 = vmatprep.mubr.msk.bf16.mxu1 %vm664_vm3, %v4146_v11  ;;  %v267_v24 = vsel %vm4108_vm4, %v262_v12, %v266_v56  ;;  %v458_v26 = vrot.slane %v456_v18, 5  ;;  %v279_v28 = vshrl.u32 %v4144_v10, 16  ;;  %v4202_v18 = vld [vmem:[%s4063_s23 + $0x28] sm:$0xf] }
  0x21   : > { %v462_v33 = vrot.slane %v460_v21, 4  ;;  %v468_v34 = vrot.slane %v466_v22, 5  ;;  %v282_v35 = vshll.u32 %v4144_v10, 16  ;;  %v453_v39 = vor.u32 %v452_v25, %v449_v20 }
  0x22   : > { %v277_v29 = vsel %vm4108_vm4, %v272_v19, %v276_v3  ;;  %v281_v40 = vrot.slane %v279_v28, 4  ;;  %v288_v41 = vshll.u32 %v4153_v23, 16  ;;  %v292_v46 = vshrl.u32 %v4153_v23, 16  ;;  %v4194_v3 = vld [vmem:[%s4063_s23 + $0x24] sm:$0xf] }
  0x23   : > { %v4169_v38 = vcombine.low %v267_v24, %v277_v29  ;;  %v463_v44 = vor.u32 %v462_v33, %v458_v26  ;;  %v284_v45 = vrot.slane %v282_v35, 5  ;;  %v298_v47 = vshll.u32 %v4160_v27, 16  ;;  %v4210_v24 = vld [vmem:[%s5685_s1 + $0x6] sm:$0x3]  ;;  %v4215_v29 = vld [vmem:[%s4063_s23 + $0x2c] sm:$0x1] }
  0x24   : > { %v454_v49 = vrot.slane %v453_v39, 4  ;;  %v290_v50 = vrot.slane %v288_v41, 5  ;;  %v471_v51 = vshrl.u32 %v4167_v37, 16  ;;  %v474_v52 = vshll.u32 %v4167_v37, 16  ;;  %v4223_v41 = vld [vmem:[%s4063_s23 + $0x84] sm:$0xf] }
  0x25   : > { %5738 = vst [vmem:[#allocation7_spill] sm:$0xff] %v4169_v38  ;;  %3601 = vmatmul.mubr.msk.bf16.vlgmr.msra.gmra.mxu0 %vm664_vm3, %v4169_v38  ;;  %v464_v53 = vrot.slane %v463_v44, 4  ;;  %v285_v55 = vor.u32 %v284_v45, %v281_v40  ;;  %v294_v56 = vrot.slane %v292_v46, 4  ;;  %v300_v57 = vrot.slane %v298_v47, 5  ;;  %v4370_v38 = vld [vmem:[%s4063_s23 + $0xb0] sm:$0x1] }
  0x26   : > { %3667 = vmatpush3.bf16.msra.mxu0 %v4069_v5  ;;  %v459_v60 = vsel %vm4108_vm4, %v454_v49, %v458_v26  ;;  %v473_v61 = vrot.slane %v471_v51, 4  ;;  %v476_v1 = vrot.slane %v474_v52, 5  ;;  %v480_v2 = vshll.u32 %v4180_v48, 16  ;;  %v4230_v49 = vld [vmem:[%s4063_s23 + $0x88] sm:$0xf]  ;;  %5752 = vst [vmem:[#allocation21_spill] sm:$0xff] %v4370_v38 }
  0x27   : > { %3911 = vmatprep.subr.msk.bf16.mxu0 %vm713_vm0, %v4175_v43  ;;  %v469_v5 = vsel %vm4108_vm4, %v464_v53, %v468_v34  ;;  %v286_v9 = vrot.slane %v285_v55, 4  ;;  %v295_v12 = vor.u32 %v294_v56, %v290_v50  ;;  %v484_v14 = vshrl.u32 %v4180_v48, 16  ;;  %v4392_v48 = vld [vmem:[%s4063_s23 + $0x5c] sm:$0x1] }
  0x28   : > { %v4204_v19 = vcombine.low %v459_v60, %v469_v5  ;;  %v477_v20 = vor.u32 %v476_v1, %v473_v61  ;;  %v482_v21 = vrot.slane %v480_v2, 5  ;;  %v490_v22 = vshll.u32 %v4188_v58, 16 }
  0x29   : > { %v291_v25 = vsel %vm4108_vm4, %v286_v9, %v290_v50  ;;  %v296_v26 = vrot.slane %v295_v12, 4  ;;  %v486_v28 = vrot.slane %v484_v14, 4  ;;  %v303_v33 = vshrl.u32 %v4194_v3, 16  ;;  %v4249_v9 = vld [vmem:[%s4063_s23 + $0x30] sm:$0xf] }
  0x2a   : > { %5741 = vst [vmem:[#allocation10_spill] sm:$0xff] %v4204_v19  ;;  %3617 = vmatmul.mubr.msk.bf16.vlgmr.msra.gmra.mxu1 %vm664_vm3, %v4204_v19  ;;  %v478_v34 = vrot.slane %v477_v20, 4  ;;  %v492_v35 = vrot.slane %v490_v22, 5  ;;  %v306_v39 = vshll.u32 %v4194_v3, 16  ;;  %v312_v40 = vshll.u32 %v4202_v18, 16 }
  0x2b   : > { %3633 = vmatpush3.bf16.msra.mxu1 %v4066_v4  ;;  %v301_v44 = vsel %vm4108_vm4, %v296_v26, %v300_v57  ;;  %v487_v45 = vor.u32 %v486_v28, %v482_v21  ;;  %v305_v46 = vrot.slane %v303_v33, 4  ;;  %v316_v47 = vshrl.u32 %v4202_v18, 16  ;;  %v4240_v57 = vld [vmem:[%s4063_s23 + $0x8c] sm:$0x1]  ;;  %v4254_v22 = vld [vmem:[%s4063_s23 + $0x34] sm:$0xf] }
  0x2c   : > { %v4232_v50 = vcombine.low %v291_v25, %v301_v44  ;;  %v483_v51 = vsel %vm4108_vm4, %v478_v34, %v482_v21  ;;  %v308_v52 = vrot.slane %v306_v39, 5  ;;  %v314_v53 = vrot.slane %v312_v40, 5  ;;  %3910 = vmatprep.subr.msk.bf16.mxu1 %vm713_vm0, %v4210_v24 }
  0x2d   : > { %v488_v4 = vrot.slane %v487_v45, 4  ;;  %v318_v55 = vrot.slane %v316_v47, 4  ;;  %v322_v56 = vshll.u32 %v4215_v29, 16  ;;  %v495_v60 = vshrl.u32 %v4223_v41, 16 }
  0x2e   : > { %5742 = vst [vmem:[#allocation11_spill] sm:$0xff] %v4232_v50  ;;  %3604 = vmatprep.mubr.msk.bf16.mxu0 %vm664_vm3, %v4232_v50  ;;  %v309_v61 = vor.u32 %v308_v52, %v305_v46  ;;  %v498_v1 = vshll.u32 %v4223_v41, 16  ;;  %v504_v2 = vshll.u32 %v4230_v49, 16  ;;  %v508_v5 = vshrl.u32 %v4230_v49, 16  ;;  %v4265_v46 = vld [vmem:[%s4063_s23 + $0x38] sm:$0x1] }
  0x2f   : > { %v493_v12 = vsel %vm4108_vm4, %v488_v4, %v492_v35  ;;  %v319_v14 = vor.u32 %v318_v55, %v314_v53  ;;  %v324_v20 = vrot.slane %v322_v56, 5  ;;  %v497_v21 = vrot.slane %v495_v60, 4  ;;  %v4270_v52 = vld [vmem:[%s4063_s23 + $0x90] sm:$0xf] }
  0x30   : > { %v4256_v25 = vcombine.low %v483_v51, %v493_v12  ;;  %v310_v26 = vrot.slane %v309_v61, 4  ;;  %v500_v28 = vrot.slane %v498_v1, 5  ;;  %v506_v33 = vrot.slane %v504_v2, 5  ;;  %v4275_v61 = vld [vmem:[%s4063_s23 + $0x94] sm:$0xf] }
  0x31   : > { %v320_v34 = vrot.slane %v319_v14, 4  ;;  %v510_v39 = vrot.slane %v508_v5, 4  ;;  %v514_v40 = vshll.u32 %v4240_v57, 16  ;;  %v327_v44 = vshrl.u32 %v4249_v9, 16 }
  0x32   : > { %5743 = vst [vmem:[#allocation12_spill] sm:$0xff] %v4256_v25  ;;  %3620 = vmatprep.mubr.msk.bf16.mxu1 %vm664_vm3, %v4256_v25  ;;  %v315_v35 = vsel %vm4108_vm4, %v310_v26, %v314_v53  ;;  %v501_v45 = vor.u32 %v500_v28, %v497_v21  ;;  %v330_v47 = vshll.u32 %v4249_v9, 16  ;;  %v336_v51 = vshll.u32 %v4254_v22, 16  ;;  %v4321_v25 = vld [vmem:[%s4063_s23 + $0xa0] sm:$0xf] }
  0x33   : > { %v325_v4 = vsel %vm4108_vm4, %v320_v34, %v324_v20  ;;  %v511_v55 = vor.u32 %v510_v39, %v506_v33  ;;  %v516_v56 = vrot.slane %v514_v40, 5  ;;  %v329_v60 = vrot.slane %v327_v44, 4  ;;  %v4287_v34 = vld [vmem:[%s4063_s23 + $0x98] sm:$0x1]  ;;  %v4292_v44 = vld [vmem:[%s4063_s23 + $0x3c] sm:$0xf] }
  0x34   : > { %v4277_v53 = vcombine.low %v315_v35, %v325_v4  ;;  %v502_v1 = vrot.slane %v501_v45, 4  ;;  %v332_v2 = vrot.slane %v330_v47, 5  ;;  %v338_v5 = vrot.slane %v336_v51, 5  ;;  %v4297_v4 = vld [vmem:[%s4063_s23 + $0x40] sm:$0xf] }
  0x35   : > { %v512_v12 = vrot.slane %v511_v55, 4  ;;  %v340_v14 = vshrl.u32 %v4254_v22, 16  ;;  %v346_v21 = vshll.u32 %v4265_v46, 16  ;;  %v519_v20 = vshrl.u32 %v4270_v52, 16 }
  0x36   : > { %5744 = vst [vmem:[#allocation13_spill] sm:$0xff] %v4277_v53  ;;  %3605 = vmatmul.mubr.msk.bf16.gmra.mxu0 %vm664_vm3, %v4277_v53  ;;  %v507_v26 = vsel %vm4108_vm4, %v502_v1, %v506_v33  ;;  %v333_v28 = vor.u32 %v332_v2, %v329_v60  ;;  %v522_v39 = vshll.u32 %v4270_v52, 16  ;;  %v528_v40 = vshll.u32 %v4275_v61, 16 }
  0x37   : > { %v517_v35 = vsel %vm4108_vm4, %v512_v12, %v516_v56  ;;  %v342_v45 = vrot.slane %v340_v14, 4  ;;  %v348_v47 = vrot.slane %v346_v21, 5  ;;  %v521_v51 = vrot.slane %v519_v20, 4  ;;  %v4309_v14 = vld [vmem:[%s4063_s23 + $0x44] sm:$0x1] }
  0x38   : > { %v4299_v33 = vcombine.low %v507_v26, %v517_v35  ;;  %v334_v55 = vrot.slane %v333_v28, 4  ;;  %v524_v60 = vrot.slane %v522_v39, 5  ;;  %v530_v1 = vrot.slane %v528_v40, 5  ;;  %v4314_v26 = vld [vmem:[%s4063_s23 + $0x9c] sm:$0xf] }
  0x39   : > { %v343_v2 = vor.u32 %v342_v45, %v338_v5  ;;  %v532_v36 = vshrl.u32 %v4275_v61, 16  ;;  %v538_v63 = vshll.u32 %v4287_v34, 16  ;;  %v351_v15 = vshrl.u32 %v4292_v44, 16 }
  0x3a   : > { %5745 = vst [vmem:[#allocation14_spill] sm:$0xff] %v4299_v33  ;;  %3621 = vmatmul.mubr.msk.bf16.gmra.mxu1 %vm664_vm3, %v4299_v33  ;;  %v339_v56 = vsel %vm4108_vm4, %v334_v55, %v338_v5  ;;  %v525_v12 = vor.u32 %v524_v60, %v521_v51  ;;  %v354_v21 = vshll.u32 %v4292_v44, 16  ;;  %v360_v20 = vshll.u32 %v4297_v4, 16 }
  0x3b   : > { %v344_v28 = vrot.slane %v343_v2, 4  ;;  %v534_v39 = vrot.slane %v532_v36, 4  ;;  %v540_v40 = vrot.slane %v538_v63, 5  ;;  %v353_v35 = vrot.slane %v351_v15, 4 }
  0x3c   : > { %v526_v45 = vrot.slane %v525_v12, 4  ;;  %v356_v62 = vrot.slane %v354_v21, 5  ;;  %v362_v33 = vrot.slane %v360_v20, 5  ;;  %v364_v5 = vshrl.u32 %v4297_v4, 16  ;;  %v4329_v21 = vld [vmem:[%s4063_s23 + $0xa4] sm:$0x1] }
  0x3d   : > { %v349_v51 = vsel %vm4108_vm4, %v344_v28, %v348_v47  ;;  %v535_v55 = vor.u32 %v534_v39, %v530_v1  ;;  %v370_v60 = vshll.u32 %v4309_v14, 16  ;;  %v543_v2 = vshrl.u32 %v4314_v26, 16  ;;  %5747 = vst [vmem:[#allocation16_spill] sm:$0xff] %v4329_v21  ;;  %v4332_v20 = vld [vmem:[%s4063_s23 + $0x48] sm:$0xf] }
  0x3e   : > { %v4324_v36 = vcombine.low %v339_v56, %v349_v51  ;;  %v531_v15 = vsel %vm4108_vm4, %v526_v45, %v530_v1  ;;  %v357_v63 = vor.u32 %v356_v62, %v353_v35  ;;  %v366_v12 = vrot.slane %v364_v5, 4 }
  0x3f   : > { %v536_v47 = vrot.slane %v535_v55, 4  ;;  %v372_v28 = vrot.slane %v370_v60, 5  ;;  %v545_v39 = vrot.slane %v543_v2, 4  ;;  %v546_v19 = vshll.u32 %v4314_v26, 16  ;;  %v4343_v55 = vld [vmem:[%s4063_s23 + $0x4c] sm:$0xf] }
  0x40   : > { %5746 = vst [vmem:[#allocation15_spill] sm:$0xff] %v4324_v36  ;;  %3608 = vmatprep.mubr.msk.bf16.mxu0 %vm664_vm3, %v4324_v36  ;;  %v358_v56 = vrot.slane %v357_v63, 4  ;;  %v367_v51 = vor.u32 %v366_v12, %v362_v33  ;;  %v552_v1 = vshll.u32 %v4321_v25, 16  ;;  %v556_v62 = vshrl.u32 %v4321_v25, 16  ;;  %v4351_v36 = vld [vmem:[%s4063_s23 + $0x50] sm:$0x1] }
  0x41   : > { %v541_v35 = vsel %vm4108_vm4, %v536_v47, %v540_v40  ;;  %v548_v45 = vrot.slane %v546_v19, 5  ;;  %v562_v5 = vshll.u32 %v4329_v21, 16  ;;  %v375_v60 = vshrl.u32 %v4332_v20, 16  ;;  %v4354_v47 = vld [vmem:[%s4063_s23 + $0xa8] sm:$0xf] }
  0x42   : > { %v4346_v2 = vcombine.low %v531_v15, %v541_v35  ;;  %v363_v63 = vsel %vm4108_vm4, %v358_v56, %v362_v33  ;;  %v368_v12 = vrot.slane %v367_v51, 4  ;;  %v554_v11 = vrot.slane %v552_v1, 5  ;;  %5749 = vst [vmem:[#allocation18_spill] sm:$0xff] %v4354_v47 }
  0x43   : > { %v549_v53 = vor.u32 %v548_v45, %v545_v39  ;;  %v558_v50 = vrot.slane %v556_v62, 4  ;;  %v564_v40 = vrot.slane %v562_v5, 5  ;;  %v377_v19 = vrot.slane %v375_v60, 4  ;;  %v4367_v45 = vld [vmem:[%s4063_s23 + $0xac] sm:$0xf] }
  0x44   : > { %5748 = vst [vmem:[#allocation17_spill] sm:$0xff] %v4346_v2  ;;  %3624 = vmatprep.mubr.msk.bf16.mxu1 %vm664_vm3, %v4346_v2  ;;  %v373_v15 = vsel %vm4108_vm4, %v368_v12, %v372_v28  ;;  %v378_v33 = vshll.u32 %v4332_v20, 16  ;;  %v384_v56 = vshll.u32 %v4343_v55, 16  ;;  %v388_v51 = vshrl.u32 %v4343_v55, 16  ;;  %5751 = vst [vmem:[#allocation20_spill] sm:$0xff] %v4367_v45 }
  0x45   : > { %v4363_v1 = vcombine.low %v363_v63, %v373_v15  ;;  %v550_v39 = vrot.slane %v549_v53, 4  ;;  %v559_v62 = vor.u32 %v558_v50, %v554_v11  ;;  %v394_v35 = vshll.u32 %v4351_v36, 16 }
  0x46   : > { %v380_v5 = vrot.slane %v378_v33, 5  ;;  %v386_v60 = vrot.slane %v384_v56, 5  ;;  %v390_v2 = vrot.slane %v388_v51, 4  ;;  %v567_v28 = vshrl.u32 %v4354_v47, 16  ;;  %v4380_v51 = vld [vmem:[%s4063_s23 + $0x54] sm:$0xf] }
  0x47   : > { %5750 = vst [vmem:[#allocation19_spill] sm:$0xff] %v4363_v1  ;;  %3609 = vmatmul.mubr.msk.bf16.gmra.mxu0 %vm664_vm3, %v4363_v1  ;;  %v555_v53 = vsel %vm4108_vm4, %v550_v39, %v554_v11  ;;  %v560_v50 = vrot.slane %v559_v62, 4  ;;  %v396_v63 = vrot.slane %v394_v35, 5  ;;  %v570_v12 = vshll.u32 %v4354_v47, 16  ;;  %v4387_v62 = vld [vmem:[%s4063_s23 + $0x58] sm:$0xf] }
  0x48   : > { %v381_v15 = vor.u32 %v380_v5, %v377_v19  ;;  %v391_v58 = vor.u32 %v390_v2, %v386_v60  ;;  %v569_v33 = vrot.slane %v567_v28, 4  ;;  %v576_v56 = vshll.u32 %v4367_v45, 16 }
  0x49   : > { %v565_v1 = vsel %vm4108_vm4, %v560_v50, %v564_v40  ;;  %v572_v37 = vrot.slane %v570_v12, 5  ;;  %v580_v11 = vshrl.u32 %v4367_v45, 16  ;;  %v586_v39 = vshll.u32 %v4370_v38, 16 }
  0x4a   : > { %v4389_v2 = vcombine.low %v555_v53, %v565_v1  ;;  %v382_v19 = vrot.slane %v381_v15, 4  ;;  %v392_v35 = vrot.slane %v391_v58, 4  ;;  %v578_v5 = vrot.slane %v576_v56, 5 }
  0x4b   : > { %v573_v28 = vor.u32 %v572_v37, %v569_v33  ;;  %v582_v0 = vrot.slane %v580_v11, 4  ;;  %v588_v54 = vrot.slane %v586_v39, 5  ;;  %v399_v40 = vshrl.u32 %v4380_v51, 16  ;;  %v4404_v37 = vld [vmem:[%s4063_s23 + $0xb4] sm:$0xf] }
  0x4c   : > { %5753 = vst [vmem:[#allocation22_spill] sm:$0xff] %v4389_v2  ;;  %3625 = vmatmul.mubr.msk.bf16.gmra.mxu1 %vm664_vm3, %v4389_v2  ;;  %v387_v50 = vsel %vm4108_vm4, %v382_v19, %v386_v60  ;;  %v397_v1 = vsel %vm4108_vm4, %v392_v35, %v396_v63  ;;  %v402_v58 = vshll.u32 %v4380_v51, 16  ;;  %v408_v53 = vshll.u32 %v4387_v62, 16  ;;  %5754 = vst [vmem:[#allocation23_spill] sm:$0xff] %v4404_v37  ;;  %v4409_v11 = vld [vmem:[%s4063_s23 + $0xb8] sm:$0xf] }
  0x4d   : > { %v4406_v12 = vcombine.low %v387_v50, %v397_v1  ;;  %v574_v15 = vrot.slane %v573_v28, 4  ;;  %v583_v33 = vor.u32 %v582_v0, %v578_v5  ;;  %v401_v56 = vrot.slane %v399_v40, 4 }
  0x4e   : > { %v404_v39 = vrot.slane %v402_v58, 5  ;;  %v410_v2 = vrot.slane %v408_v53, 5  ;;  %v412_v60 = vshrl.u32 %v4387_v62, 16  ;;  %v418_v63 = vshll.u32 %v4392_v48, 16  ;;  %v4420_v58 = vld [vmem:[%s4063_s23 + $0xbc] sm:$0x1] }
  0x4f   : > { %5755 = vst [vmem:[#allocation24_spill] sm:$0xff] %v4406_v12  ;;  %3612 = vmatprep.mubr.msk.bf16.mxu0 %vm664_vm3, %v4406_v12  ;;  %v579_v19 = vsel %vm4108_vm4, %v574_v15, %v578_v5  ;;  %v584_v35 = vrot.slane %v583_v33, 4  ;;  %v591_v28 = vshrl.u32 %v4404_v37, 16  ;;  %v594_v0 = vshll.u32 %v4404_v37, 16 }
  0x50   : > { %v405_v40 = vor.u32 %v404_v39, %v401_v56  ;;  %v414_v50 = vrot.slane %v412_v60, 4  ;;  %v420_v1 = vrot.slane %v418_v63, 5  ;;  %v600_v53 = vshll.u32 %v4409_v11, 16 }
  0x51   : > { %v589_v38 = vsel %vm4108_vm4, %v584_v35, %v588_v54  ;;  %v593_v47 = vrot.slane %v591_v28, 4  ;;  %v596_v12 = vrot.slane %v594_v0, 5  ;;  %v604_v45 = vshrl.u32 %v4409_v11, 16 }
  0x52   : > { %v4426_v5 = vcombine.low %v579_v19, %v589_v38  ;;  %v406_v15 = vrot.slane %v405_v40, 4  ;;  %v415_v33 = vor.u32 %v414_v50, %v410_v2  ;;  %v602_v21 = vrot.slane %v600_v53, 5 }
  0x53   : > { %v597_v37 = vor.u32 %v596_v12, %v593_v47  ;;  %v606_v56 = vrot.slane %v604_v45, 4  ;;  %v610_v39 = vshll.u32 %v4420_v58, 16  ;;  %v3281_v54 = vrot.slane %v4072_v6, 9 }
  0x54   : > { %3628 = vmatprep.mubr.msk.bf16.mxu1 %vm664_vm3, %v4426_v5  ;;  %v411_v38 = vsel %vm4108_vm4, %v406_v15, %v410_v2  ;;  %v416_v63 = vrot.slane %v415_v33, 4  ;;  %v1191_v47 = vrot.slane %v4075_v7, 5  ;;  %v4443_v45 = vcombine.low %v4101_v30, %v4104_v31 }
  0x55   : > { %v598_v12 = vrot.slane %v597_v37, 4  ;;  %v607_v19 = vor.u32 %v606_v56, %v602_v21  ;;  %v612_v35 = vrot.slane %v610_v39, 5  ;;  %v3282_v28 = vrot.slane %v4101_v30, 9 }
  0x56   : > { %v421_v0 = vsel %vm4108_vm4, %v416_v63, %v420_v1  ;;  %v1192_v40 = vsel %vm4431_vm7, %v3281_v54, %v1191_v47  ;;  %v1193_v50 = vrot.slane %v1191_v47, 4  ;;  %v5758_v2 = vrot.slane %v4104_v31, 5 }
  0x57   : > { %v4452_v15 = vcombine.low %v411_v38, %v421_v0  ;;  %v603_v33 = vsel %vm4108_vm4, %v598_v12, %v602_v21  ;;  %v608_v37 = vrot.slane %v607_v19, 4  ;;  %v5760_v1 = vrot.slane %v4078_v8, 5 }
  0x58   : > { %v1200_v53 = vrot.slane %v5758_v2, 4  ;;  %v5759_v56 = vmov %v5758_v2  ;;  %v5761_v54 = vrot.slane %v4115_v42, 5  ;;  %v4470_v63 = vcombine.low %v4144_v10, %v4153_v23 }
  0x59   : > { %v1199_v30 = vsel %vm4431_vm7, %v3282_v28, %v5759_v56  ;;  %v1195_v39 = vsel %vm4431_vm7, %v1193_v50, %v5760_v1  ;;  %v3283_v21 = vrot.slane %v4144_v10, 9  ;;  %3613 = vmatmul.mubr.msk.bf16.gmra.mxu0 %vm664_vm3, %v4452_v15  ;;  %v613_v8 = vsel %vm4108_vm4, %v608_v37, %v612_v35 }
  0x5a   : > { %v1202_v38 = vsel %vm4431_vm7, %v1200_v53, %v5761_v54  ;;  %v3298_v31 = vcombine.low %v1192_v40, %v1195_v39  ;;  %v1205_v42 = vrot.slane %v4153_v23, 5  ;;  %v4480_v12 = vcombine.low %v603_v33, %v613_v8 }
  0x5b   : > { %v4477_v47 = vcombine.low %v1199_v30, %v1202_v38  ;;  %v1208_v19 = vrot.slane %v4160_v27, 5  ;;  %v1212_v0 = vrot.slane %v4202_v18, 5  ;;  %v3284_v35 = vrot.slane %v4194_v3, 9 }
  0x5c   : > { %5762 = vst [vmem:[#allocation25_spill] sm:$0xff] %v4480_v12  ;;  %3668 = vmatprep.mubr.msk.bf16.mxu0 %vm664_vm3, %v3298_v31  ;;  %v1206_v10 = vsel %vm4431_vm7, %v3283_v21, %v1205_v42  ;;  %v1207_v28 = vrot.slane %v1205_v42, 4  ;;  %3629 = vmatmul.mubr.msk.bf16.gmra.mxu1 %vm664_vm3, %v4480_v12  ;;  %v3285_v40 = vrot.slane %v4249_v9, 9  ;;  %v1219_v23 = vrot.slane %v4254_v22, 5 }
  0x5d   : > { %v5763_v27 = vcombine.low %v4072_v6, %v4075_v7  ;;  %v1214_v2 = vrot.slane %v1212_v0, 4  ;;  %v1215_v53 = vrot.slane %v4215_v29, 5  ;;  %v1222_v33 = vrot.slane %v4265_v46, 5  ;;  %v4515_v46 = vld [vmem:[%s5685_s1 + $0xc] sm:$0x3] }
  0x5e   : > { %v1209_v50 = vsel %vm4431_vm7, %v1207_v28, %v1208_v19  ;;  %v1221_v56 = vrot.slane %v1219_v23, 4  ;;  %v1834_v30 = vsel %vm713_vm0, %v4175_v43, 0  ;;  %v1226_v1 = vrot.slane %v4297_v4, 5  ;;  %v4532_v19 = vld [vmem:[%s5685_s1 + $0xa] sm:$0x3] }
  0x5f   : > { %3634 = vmatprep.mubr.msk.bf16.mxu1 %vm664_vm3, %v5763_v27  ;;  %v4500_v37 = vcombine.low %v1206_v10, %v1209_v50  ;;  %v1606_v6 = vsel %vm713_vm0, %v4210_v24, 0  ;;  %v1213_v7 = vsel %vm4431_vm7, %v3284_v35, %v1212_v0  ;;  %v1220_v39 = vsel %vm4431_vm7, %v3285_v40, %v1219_v23 }
  0x60   : > { %v1233_v29 = vrot.slane %v4343_v55, 5  ;;  %v1216_v43 = vsel %vm4431_vm7, %v1214_v2, %v1215_v53  ;;  %v1223_v24 = vsel %vm4431_vm7, %v1221_v56, %v1222_v33  ;;  %v3286_v54 = vrot.slane %v4292_v44, 9 }
  0x61   : > { %3669 = vmatmul.mubr.msk.bf16.vlgmr.msra.gmra.mxu0 %vm664_vm3, %v4477_v47  ;;  %v1229_v38 = vrot.slane %v4309_v14, 5  ;;  %v1228_v21 = vrot.slane %v1226_v1, 4  ;;  %v3287_v8 = vrot.slane %v4332_v20, 9  ;;  %v1236_v42 = vrot.slane %v4351_v36, 5 }
  0x62   : > { %3735 = vmatpush3.bf16.msra.mxu0 %v1834_v30  ;;  %3672 = vmatprep.mubr.msk.bf16.mxu0 %vm664_vm3, %v4500_v37  ;;  %v1235_v31 = vrot.slane %v1233_v29, 4  ;;  %v4540_v14 = vcombine.low %v1213_v7, %v1216_v43  ;;  %v4542_v10 = vcombine.low %v1220_v39, %v1223_v24  ;;  %v1227_v36 = vsel %vm4431_vm7, %v3286_v54, %v1226_v1 }
  0x63   : > { %3913 = vmatprep.subr.msk.bf16.mxu0 %vm713_vm0, %v4515_v46  ;;  %v1230_v28 = vsel %vm4431_vm7, %v1228_v21, %v1229_v38  ;;  %v1234_v0 = vsel %vm4431_vm7, %v3287_v8, %v1233_v29  ;;  %v1240_v40 = vrot.slane %v4387_v62, 5  ;;  %v1250_v23 = vrot.slane %v4093_v17, 5  ;;  %v5764_v8 = vld [vmem:[#allocation16_spill] sm:$0xff] }
  0x64   : > { %3635 = vmatmul.mubr.msk.bf16.vlgmr.msra.gmra.mxu1 %vm664_vm3, %v4443_v45  ;;  %v1237_v35 = vsel %vm4431_vm7, %v1235_v31, %v1236_v42  ;;  %v3288_v27 = vrot.slane %v4380_v51, 9  ;;  %v3289_v50 = vrot.slane %v4085_v13, 9  ;;  %v1247_v2 = vrot.slane %v4090_v16, 5  ;;  %v5765_v42 = vld [vmem:[#allocation20_spill] sm:$0xff] }
  0x65   : > { %3701 = vmatpush3.bf16.msra.mxu1 %v1606_v6  ;;  %3638 = vmatprep.mubr.msk.bf16.mxu1 %vm664_vm3, %v4470_v63  ;;  %v4561_v53 = vcombine.low %v4194_v3, %v4202_v18  ;;  %v4565_v33 = vcombine.low %v4249_v9, %v4254_v22  ;;  %v4569_v56 = vcombine.low %v4292_v44, %v4297_v4  ;;  %v1243_v3 = vrot.slane %v4392_v48, 5 }
  0x66   : > { %3912 = vmatprep.subr.msk.bf16.mxu1 %vm713_vm0, %v4532_v19  ;;  %v4573_v17 = vcombine.low %v4332_v20, %v4343_v55  ;;  %v4577_v30 = vcombine.low %v1227_v36, %v1230_v28  ;;  %v4579_v1 = vcombine.low %v1234_v0, %v1237_v35  ;;  %v4584_v18 = vcombine.low %v4223_v41, %v4230_v49  ;;  %v5766_v36 = vld [vmem:[#allocation18_spill] sm:$0xff] }
  0x67   : > { %v1242_v9 = vrot.slane %v1240_v40, 4  ;;  %v3292_v22 = vrot.slane %v4223_v41, 9  ;;  %v1268_v44 = vrot.slane %v4230_v49, 5  ;;  %v1271_v4 = vrot.slane %v4240_v57, 5 }
  0x68   : > { %v1241_v20 = vsel %vm4431_vm7, %v3288_v27, %v1240_v40  ;;  %v1248_v48 = vsel %vm4431_vm7, %v3289_v50, %v1247_v2  ;;  %v1249_v55 = vrot.slane %v1247_v2, 4  ;;  %v4597_v6 = vcombine.low %v4270_v52, %v4275_v61  ;;  %v5767_v40 = vld [vmem:[#allocation21_spill] sm:$0xff] }
  0x69   : > { %3673 = vmatmul.mubr.msk.bf16.gmra.mxu0 %vm664_vm3, %v4540_v14  ;;  %v1269_v41 = vsel %vm4431_vm7, %v3292_v22, %v1268_v44  ;;  %v1270_v49 = vrot.slane %v1268_v44, 4  ;;  %v3293_v57 = vrot.slane %v4270_v52, 9  ;;  %v1275_v7 = vrot.slane %v4275_v61, 5 }
  0x6a   : > { %3676 = vmatprep.mubr.msk.bf16.mxu0 %vm664_vm3, %v4542_v10  ;;  %v1254_v39 = vrot.slane %v4130_v59, 5  ;;  %v1278_v29 = vrot.slane %v4287_v34, 5  ;;  %v4611_v43 = vcombine.low %v4314_v26, %v4321_v25  ;;  %v3294_v24 = vrot.slane %v4314_v26, 9 }
  0x6b   : > { %v1244_v54 = vsel %vm4431_vm7, %v1242_v9, %v1243_v3  ;;  %v1272_v52 = vsel %vm4431_vm7, %v1270_v49, %v1271_v4  ;;  %v1276_v61 = vsel %vm4431_vm7, %v3293_v57, %v1275_v7  ;;  %v1277_v38 = vrot.slane %v1275_v7, 4  ;;  %v5768_v3 = vld [vmem:[#allocation23_spill] sm:$0xff]  ;;  %v5769_v57 = vld [vmem:[#allocation8_spill] sm:$0xff] }
  0x6c   : > { %3639 = vmatmul.mubr.msk.bf16.gmra.mxu1 %vm664_vm3, %v4561_v53  ;;  %v4620_v21 = vcombine.low %v1269_v41, %v1272_v52  ;;  %v1282_v34 = vrot.slane %v4321_v25, 5  ;;  %v1285_v31 = vrot.slane %v5764_v8, 5  ;;  %v4626_v28 = vcombine.low %v5766_v36, %v5765_v42 }
  0x6d   : > { %3642 = vmatprep.mubr.msk.bf16.mxu1 %vm664_vm3, %v4565_v33  ;;  %v1279_v26 = vsel %vm4431_vm7, %v1277_v38, %v1278_v29  ;;  %v3295_v0 = vrot.slane %v5766_v36, 9  ;;  %v1289_v35 = vrot.slane %v5765_v42, 5  ;;  %v1292_v27 = vrot.slane %v5767_v40, 5  ;;  %v5771_v42 = vld [vmem:[#allocation4_spill] sm:$0xff] }
  0x6e   : > { %v4635_v50 = vcombine.low %v1276_v61, %v1279_v26  ;;  %v1283_v25 = vsel %vm4431_vm7, %v3294_v24, %v1282_v34  ;;  %v1284_v2 = vrot.slane %v1282_v34, 4  ;;  %v4641_v9 = vcombine.low %v5768_v3, %v4409_v11 }
  0x6f   : > { %v1290_v22 = vsel %vm4431_vm7, %v3295_v0, %v1289_v35  ;;  %v1291_v44 = vrot.slane %v1289_v35, 4  ;;  %v3296_v4 = vrot.slane %v5768_v3, 9  ;;  %v1296_v41 = vrot.slane %v4409_v11, 5  ;;  %v5772_v0 = vld [vmem:[#allocation6_spill] sm:$0xff] }
  0x70   : > { %v1251_v49 = vsel %vm4431_vm7, %v1249_v55, %v1250_v23  ;;  %v1261_v7 = vrot.slane %v5769_v57, 5  ;;  %v1286_v29 = vsel %vm4431_vm7, %v1284_v2, %v1285_v31  ;;  %v1299_v24 = vrot.slane %v4420_v58, 5  ;;  %v5770_v55 = vld [vmem:[#allocation3_spill] sm:$0xff] }
  0x71   : > { %3677 = vmatmul.mubr.msk.bf16.gmra.mxu0 %vm664_vm3, %v4577_v30  ;;  %v4657_v52 = vcombine.low %v1283_v25, %v1286_v29  ;;  %v1293_v61 = vsel %vm4431_vm7, %v1291_v44, %v1292_v27  ;;  %v1297_v11 = vsel %vm4431_vm7, %v3296_v4, %v1296_v41  ;;  %v1298_v38 = vrot.slane %v1296_v41, 4  ;;  %v5773_v27 = vld [vmem:[#allocation9_spill] sm:$0xff]  ;;  %v4744_v4 = vld [vmem:[%s4063_s23 + $0xc0] sm:$0xf]  ;;  %v222_v41 = vld [vmem:[%s4063_s23 + $0xc8] sm:$0x1] }
  0x72   : > { %3680 = vmatprep.mubr.msk.bf16.mxu0 %vm664_vm3, %v4579_v1  ;;  %v4665_v23 = vcombine.low %v1241_v20, %v1244_v54  ;;  %v3290_v34 = vrot.slane %v5770_v55, 9  ;;  %v4668_v58 = vcombine.low %v1290_v22, %v1293_v61  ;;  %v4670_v8 = vcombine.low %v1248_v48, %v1251_v49  ;;  %v5774_v61 = vld [vmem:[#allocation7_spill] sm:$0xff] }
  0x73   : > { %v1256_v31 = vrot.slane %v1254_v39, 4  ;;  %v1257_v36 = vrot.slane %v5771_v42, 5  ;;  %v1300_v26 = vsel %vm4431_vm7, %v1298_v38, %v1299_v24  ;;  %v3291_v35 = vrot.slane %v5772_v0, 9  ;;  %v5776_v42 = vld [vmem:[#allocation13_spill] sm:$0xff] }
  0x74   : > { %3643 = vmatmul.mubr.msk.bf16.gmra.mxu1 %vm664_vm3, %v4569_v56  ;;  %v1263_v40 = vrot.slane %v1261_v7, 4  ;;  %v1264_v25 = vrot.slane %v5773_v27, 5  ;;  %v4677_v2 = vcombine.low %v1297_v11, %v1300_v26  ;;  %v4681_v20 = vcombine.low %v4380_v51, %v4387_v62  ;;  %v5780_v26 = vld [vmem:[#allocation5_spill] sm:$0xff] }
  0x75   : > { %3646 = vmatprep.mubr.msk.bf16.mxu1 %vm664_vm3, %v4573_v17  ;;  %v4687_v48 = vcombine.low %v4085_v13, %v4090_v16  ;;  %v1255_v54 = vsel %vm4431_vm7, %v3290_v34, %v1254_v39  ;;  %v1258_v3 = vsel %vm4431_vm7, %v1256_v31, %v1257_v36  ;;  %v1262_v51 = vsel %vm4431_vm7, %v3291_v35, %v1261_v7  ;;  %v5775_v34 = vld [vmem:[#allocation11_spill] sm:$0xff]  ;;  %v5779_v36 = vld [vmem:[#allocation24_spill] sm:$0xff] }
  0x76   : > { %v1265_v62 = vsel %vm4431_vm7, %v1263_v40, %v1264_v25  ;;  %v4703_v13 = vcombine.low %v1255_v54, %v1258_v3  ;;  %v4709_v39 = vcombine.low %v5770_v55, %v4130_v59  ;;  %v4715_v22 = vcombine.low %v5772_v0, %v5769_v57  ;;  %v4738_v59 = vld [vmem:[%s4063_s23 + $0xc4] sm:$0xf]  ;;  %v3422_v55 = vld [vmem:[%s5685_s1 + $0x10] sm:$0x3] }
  0x77   : > { %v4705_v16 = vcombine.low %v1262_v51, %v1265_v62  ;;  %v2032_v44 = vrot.slane %v4738_v59, 5  ;;  %v3366_v49 = vrot.slane %v4744_v4, 9  ;;  %v2035_v7 = vrot.slane %v222_v41, 5  ;;  %v5781_v0 = vld [vmem:[#allocation10_spill] sm:$0xff]  ;;  %v5782_v35 = vld [vmem:[#allocation12_spill] sm:$0xff] }
  0x78   : > { %v2252_v38 = vsel %vm713_vm0, %v4515_v46, 0  ;;  %v2046_v31 = vsel %vm713_vm0, %v4532_v19, 0  ;;  %v5777_v46 = vld [vmem:[#allocation15_spill] sm:$0xff]  ;;  %v5783_v40 = vld [vmem:[#allocation14_spill] sm:$0xff]  ;;  %v1802_v27 = vshrl.u32 %v4744_v4, 16  ;;  %v1805_v25 = vshll.u32 %v4744_v4, 16 }
  0x79   : > { %3681 = vmatmul.mubr.msk.bf16.gmra.mxu0 %vm664_vm3, %v4665_v23  ;;  %v2034_v57 = vrot.slane %v2032_v44, 4  ;;  %v2033_v29 = vsel %vm4431_vm7, %v3366_v49, %v2032_v44  ;;  %v5778_v19 = vld [vmem:[#allocation19_spill] sm:$0xff]  ;;  %v1815_v54 = vshrl.u32 %v4738_v59, 16  ;;  %v1811_v3 = vshll.u32 %v4738_v59, 16 }
  0x7a   : > { %3684 = vmatprep.mubr.msk.bf16.mxu0 %vm664_vm3, %v4670_v8  ;;  %v1804_v51 = vrot.slane %v1802_v27, 4  ;;  %v1807_v62 = vrot.slane %v1805_v25, 5 }
  0x7b   : > { %v2036_v24 = vsel %vm4431_vm7, %v2034_v57, %v2035_v7  ;;  %v1813_v44 = vrot.slane %v1811_v3, 5  ;;  %v1817_v49 = vrot.slane %v1815_v54, 4  ;;  %v5784_v57 = vld [vmem:[#allocation17_spill] sm:$0xff]  ;;  %v5785_v7 = vld [vmem:[#allocation22_spill] sm:$0xff]  ;;  %v3331_v3 = vcombine.low %v4744_v4, %v4738_v59 }
  0x7c   : > { %3647 = vmatmul.mubr.msk.bf16.gmra.mxu1 %vm664_vm3, %v4681_v20  ;;  %v4756_v11 = vcombine.low %v2033_v29, %v2036_v24  ;;  %v1808_v29 = vor.u32 %v1807_v62, %v1804_v51  ;;  %v2692_v51 = vsel %vm713_vm0, %v3422_v55, 0 }
  0x7d   : > { %3650 = vmatprep.mubr.msk.bf16.mxu1 %vm664_vm3, %v4687_v48  ;;  %v1818_v24 = vor.u32 %v1817_v49, %v1813_v44 }
  0x81   : > { %3685 = vmatmul.mubr.msk.bf16.gmra.mxu0 %vm664_vm3, %v4703_v13 }
  0x82   : > { %3688 = vmatprep.mubr.msk.bf16.mxu0 %vm664_vm3, %v4705_v16 }
  0x84   : > { %3651 = vmatmul.mubr.msk.bf16.gmra.mxu1 %vm664_vm3, %v4709_v39 }
  0x85   : > { %3654 = vmatprep.mubr.msk.bf16.mxu1 %vm664_vm3, %v4715_v22 }
  0x89   : > { %3689 = vmatmul.mubr.msk.bf16.gmra.mxu0 %vm664_vm3, %v4620_v21 }
  0x8a   : > { %3692 = vmatprep.mubr.msk.bf16.mxu0 %vm664_vm3, %v4635_v50 }
  0x8c   : > { %3655 = vmatmul.mubr.msk.bf16.gmra.mxu1 %vm664_vm3, %v4584_v18 }
  0x8d   : > { %3658 = vmatprep.mubr.msk.bf16.mxu1 %vm664_vm3, %v4597_v6 }
  0x91   : > { %3693 = vmatmul.mubr.msk.bf16.gmra.mxu0 %vm664_vm3, %v4657_v52 }
  0x92   : > { %3696 = vmatprep.mubr.msk.bf16.mxu0 %vm664_vm3, %v4668_v58 }
  0x94   : > { %3659 = vmatmul.mubr.msk.bf16.gmra.mxu1 %vm664_vm3, %v4611_v43 }
  0x95   : > { %3662 = vmatprep.mubr.msk.bf16.mxu1 %vm664_vm3, %v4626_v28 }
  0x99   : > { %3697 = vmatmul.mubr.msk.bf16.gmra.mxu0 %vm664_vm3, %v4677_v2 }
  0x9a   : > { %3736 = vmatprep.mubr.msk.bf16.mxu0 %vm664_vm3, %v5774_v61  ;;  %v1821_v61 = vshll.u32 %v222_v41, 16 }
  0x9c   : > { %3663 = vmatmul.mubr.msk.bf16.gmra.mxu1 %vm664_vm3, %v4641_v9  ;;  %v1823_v27 = vrot.slane %v1821_v61, 5  ;;  %v4948_v61 = vld [vmem:[%s4063_s23 + $0xd0] sm:$0xf] }
  0x9d   : > { %3702 = vmatprep.mubr.msk.bf16.mxu1 %vm664_vm3, %v4443_v45  ;;  %v3403_v45 = vld [vmem:[%s5685_s1 + $0xe] sm:$0x3] }
  0x9e   : > { %v2480_v62 = vsel %vm713_vm0, %v3403_v45, 0 }
  0xa1   : > { %3737 = vmatmul.mubr.msk.bf16.vlgmr.msra.gmra.mxu0 %vm664_vm3, %v5775_v34 }
  0xa2   : > { %3803 = vmatpush3.bf16.msra.mxu0 %v2252_v38  ;;  %3740 = vmatprep.mubr.msk.bf16.mxu0 %vm664_vm3, %v5776_v42  ;;  %v1809_v38 = vrot.slane %v1808_v29, 4 }
  0xa3   : > { %3915 = vmatprep.subr.msk.bf16.mxu0 %vm713_vm0, %v3422_v55 }
  0xa4   : > { %3703 = vmatmul.mubr.msk.bf16.vlgmr.msra.gmra.mxu1 %vm664_vm3, %v4470_v63  ;;  %v1814_v25 = vsel %vm4108_vm4, %v1809_v38, %v1813_v44 }
  0xa5   : > { %3769 = vmatpush3.bf16.msra.mxu1 %v2046_v31  ;;  %3706 = vmatprep.mubr.msk.bf16.mxu1 %vm664_vm3, %v4561_v53  ;;  %v1819_v31 = vrot.slane %v1818_v24, 4 }
  0xa6   : > { %3914 = vmatprep.subr.msk.bf16.mxu1 %vm713_vm0, %v3403_v45 }
  0xa7   : > { %v1824_v41 = vsel %vm4108_vm4, %v1819_v31, %v1823_v27 }
  0xa8   : > { %v4838_v54 = vcombine.low %v1814_v25, %v1824_v41 }
  0xa9   : > { %3741 = vmatmul.mubr.msk.bf16.gmra.mxu0 %vm664_vm3, %v5777_v46 }
  0xaa   : > { %3744 = vmatprep.mubr.msk.bf16.mxu0 %vm664_vm3, %v5778_v19  ;;  %5786 = vst [vmem:[#allocation16_spill] sm:$0xff] %v4838_v54 }
  0xac   : > { %3707 = vmatmul.mubr.msk.bf16.gmra.mxu1 %vm664_vm3, %v4565_v33 }
  0xad   : > { %3710 = vmatprep.mubr.msk.bf16.mxu1 %vm664_vm3, %v4569_v56 }
  0xb1   : > { %3745 = vmatmul.mubr.msk.bf16.gmra.mxu0 %vm664_vm3, %v5779_v36 }
  0xb2   : > { %3748 = vmatprep.mubr.msk.bf16.mxu0 %vm664_vm3, %v4452_v15 }
  0xb4   : > { %3711 = vmatmul.mubr.msk.bf16.gmra.mxu1 %vm664_vm3, %v4573_v17 }
  0xb5   : > { %3714 = vmatprep.mubr.msk.bf16.mxu1 %vm664_vm3, %v4681_v20 }
  0xb9   : > { %3749 = vmatmul.mubr.msk.bf16.gmra.mxu0 %vm664_vm3, %v5780_v26 }
  0xba   : > { %3752 = vmatprep.mubr.msk.bf16.mxu0 %vm664_vm3, %v5781_v0 }
  0xbc   : > { %3715 = vmatmul.mubr.msk.bf16.gmra.mxu1 %vm664_vm3, %v4687_v48 }
  0xbd   : > { %3718 = vmatprep.mubr.msk.bf16.mxu1 %vm664_vm3, %v4709_v39 }
  0xc1   : > { %3753 = vmatmul.mubr.msk.bf16.gmra.mxu0 %vm664_vm3, %v5782_v35 }
  0xc2   : > { %3756 = vmatprep.mubr.msk.bf16.mxu0 %vm664_vm3, %v5783_v40 }
  0xc4   : > { %3719 = vmatmul.mubr.msk.bf16.gmra.mxu1 %vm664_vm3, %v4715_v22 }
  0xc5   : > { %3722 = vmatprep.mubr.msk.bf16.mxu1 %vm664_vm3, %v4584_v18 }
  0xc9   : > { %3757 = vmatmul.mubr.msk.bf16.gmra.mxu0 %vm664_vm3, %v5784_v57 }
  0xca   : > { %3760 = vmatprep.mubr.msk.bf16.mxu0 %vm664_vm3, %v5785_v7 }
  0xcc   : > { %3723 = vmatmul.mubr.msk.bf16.gmra.mxu1 %vm664_vm3, %v4597_v6 }
  0xcd   : > { %3726 = vmatprep.mubr.msk.bf16.mxu1 %vm664_vm3, %v4611_v43 }
  0xd1   : > { %3761 = vmatmul.mubr.msk.bf16.gmra.mxu0 %vm664_vm3, %v4426_v5 }
  0xd2   : > { %3764 = vmatprep.mubr.msk.bf16.mxu0 %vm664_vm3, %v4480_v12 }
  0xd4   : > { %3727 = vmatmul.mubr.msk.bf16.gmra.mxu1 %vm664_vm3, %v4626_v28 }
  0xd5   : > { %3730 = vmatprep.mubr.msk.bf16.mxu1 %vm664_vm3, %v4641_v9 }
  0xd9   : > { %3765 = vmatmul.mubr.msk.bf16.gmra.mxu0 %vm664_vm3, %v4838_v54 }
  0xda   : > { %3804 = vmatprep.mubr.msk.bf16.mxu0 %vm664_vm3, %v4470_v63 }
  0xdc   : > { %3731 = vmatmul.mubr.msk.bf16.gmra.mxu1 %vm664_vm3, %v3331_v3 }
  0xdd   : > { %3770 = vmatprep.mubr.msk.bf16.mxu1 %vm664_vm3, %v4477_v47 }
  0xe1   : > { %3805 = vmatmul.mubr.msk.bf16.vlgmr.msra.gmra.mxu0 %vm664_vm3, %v4561_v53 }
  0xe2   : > { %3871 = vmatpush3.bf16.msra.mxu0 %v2692_v51  ;;  %3808 = vmatprep.mubr.msk.bf16.mxu0 %vm664_vm3, %v4565_v33 }
  0xe4   : > { %3771 = vmatmul.mubr.msk.bf16.vlgmr.msra.gmra.mxu1 %vm664_vm3, %v4500_v37 }
  0xe5   : > { %3837 = vmatpush3.bf16.msra.mxu1 %v2480_v62  ;;  %3774 = vmatprep.mubr.msk.bf16.mxu1 %vm664_vm3, %v4540_v14  ;;  %v4861_v63 = vpop.f32.mrf.mxu0 }
  0xe7   : > { %v4871_v53 = vpop.f32.mrf.mxu0 }
  0xe9   : > { %3809 = vmatmul.mubr.msk.bf16.gmra.mxu0 %vm664_vm3, %v4569_v56  ;;  %v4877_v56 = vpop.f32.mrf.mxu0 }
  0xea   : > { %3812 = vmatprep.mubr.msk.bf16.mxu0 %vm664_vm3, %v4573_v17  ;;  %v4867_v47 = vpop.f32.mrf.mxu1 }
  0xeb   : > { %v4887_v59 = vpop.f32.mrf.mxu0 }
  0xec   : > { %3775 = vmatmul.mubr.msk.bf16.gmra.mxu1 %vm664_vm3, %v4542_v10  ;;  %v4873_v33 = vpop.f32.mrf.mxu1 }
  0xed   : > { %3778 = vmatprep.mubr.msk.bf16.mxu1 %vm664_vm3, %v4577_v30 }
  0xee   : > { %v4883_v17 = vpop.f32.mrf.mxu1 }
  0xf0   : > { %v4889_v4 = vpop.f32.mrf.mxu1 }
  0xf1   : > { %3813 = vmatmul.mubr.msk.bf16.gmra.mxu0 %vm664_vm3, %v4681_v20 }
  0xf2   : > { %3816 = vmatprep.mubr.msk.bf16.mxu0 %vm664_vm3, %v4687_v48 }
  0xf4   : > { %3779 = vmatmul.mubr.msk.bf16.gmra.mxu1 %vm664_vm3, %v4579_v1 }
  0xf5   : > { %3782 = vmatprep.mubr.msk.bf16.mxu1 %vm664_vm3, %v4665_v23 }
  0xf6   : > { %v4893_v20 = vpop.f32.mrf.mxu0 }
  0xf8   : > { %v4903_v55 = vpop.f32.mrf.mxu0 }
  0xf9   : > { %3817 = vmatmul.mubr.msk.bf16.gmra.mxu0 %vm664_vm3, %v4709_v39 }
  0xfa   : > { %3820 = vmatprep.mubr.msk.bf16.mxu0 %vm664_vm3, %v4715_v22  ;;  %v4899_v48 = vpop.f32.mrf.mxu1  ;;  %v4909_v39 = vpop.f32.mrf.mxu0 }
  0xfc   : > { %3783 = vmatmul.mubr.msk.bf16.gmra.mxu1 %vm664_vm3, %v4670_v8  ;;  %v4905_v45 = vpop.f32.mrf.mxu1  ;;  %v4919_v44 = vpop.f32.mrf.mxu0 }
  0xfd   : > { %3786 = vmatprep.mubr.msk.bf16.mxu1 %vm664_vm3, %v4703_v13 }
  0xfe   : > { %v4915_v22 = vpop.f32.mrf.mxu1 }
 0x100   : > { %v4921_v49 = vpop.f32.mrf.mxu1 }
 0x101   : > { %3821 = vmatmul.mubr.msk.bf16.gmra.mxu0 %vm664_vm3, %v4584_v18 }
 0x102   : > { %3824 = vmatprep.mubr.msk.bf16.mxu0 %vm664_vm3, %v4597_v6 }
 0x104   : > { %3787 = vmatmul.mubr.msk.bf16.gmra.mxu1 %vm664_vm3, %v4705_v16 }
 0x105   : > { %3790 = vmatprep.mubr.msk.bf16.mxu1 %vm664_vm3, %v4620_v21 }
 0x107   : > { %v4925_v18 = vpop.f32.mrf.mxu0 }
 0x109   : > { %3825 = vmatmul.mubr.msk.bf16.gmra.mxu0 %vm664_vm3, %v4611_v43  ;;  %v4935_v29 = vpop.f32.mrf.mxu0 }
 0x10a   : > { %3828 = vmatprep.mubr.msk.bf16.mxu0 %vm664_vm3, %v4626_v28  ;;  %v4945_v28 = vld [vmem:[%s4063_s23 + $0xcc] sm:$0xf] }
 0x10b   : > { %v4941_v43 = vpop.f32.mrf.mxu0 }
 0x10c   : > { %3791 = vmatmul.mubr.msk.bf16.gmra.mxu1 %vm664_vm3, %v4635_v50  ;;  %v4931_v6 = vpop.f32.mrf.mxu1 }
 0x10d   : > { %5787 = vst [vmem:[#allocation20_spill] sm:$0xff] %v4931_v6  ;;  %3794 = vmatprep.mubr.msk.bf16.mxu1 %vm664_vm3, %v4657_v52  ;;  %v4954_v31 = vpop.f32.mrf.mxu0 }
 0x10e   : > { %v4937_v24 = vpop.f32.mrf.mxu1 }
 0x10f   : > { %5788 = vst [vmem:[#allocation18_spill] sm:$0xff] %v4937_v24 }
 0x110   : > { %v4952_v38 = vpop.f32.mrf.mxu1 }
 0x111   : > { %3829 = vmatmul.mubr.msk.bf16.gmra.mxu0 %vm664_vm3, %v4641_v9  ;;  %5789 = vst [vmem:[#allocation21_spill] sm:$0xff] %v4952_v38  ;;  %v3386_v9 = vcombine.low %v4945_v28, %v4948_v61 }
 0x112   : > { %3832 = vmatprep.mubr.msk.bf16.mxu0 %vm664_vm3, %v3331_v3  ;;  %v4960_v27 = vpop.f32.mrf.mxu1 }
 0x113   : > { %5790 = vst [vmem:[#allocation23_spill] sm:$0xff] %v4960_v27 }
 0x114   : > { %3795 = vmatmul.mubr.msk.bf16.gmra.mxu1 %vm664_vm3, %v4668_v58 }
 0x115   : > { %3798 = vmatprep.mubr.msk.bf16.mxu1 %vm664_vm3, %v4677_v2 }
 0x119   : > { %v4962_v25 = vpop.f32.mrf.mxu0  ;;  %3833 = vmatmul.mubr.msk.bf16.gmra.mxu0 %vm664_vm3, %v3386_v9 }
 0x11a   : > { %3872 = vmatprep.mubr.msk.bf16.mxu0 %vm664_vm3, %v4500_v37 }
 0x11b   : > { %v4967_v41 = vpop.f32.mrf.mxu0 }
 0x11c   : > { %v4969_v3 = vpop.f32.mrf.mxu1  ;;  %3799 = vmatmul.mubr.msk.bf16.gmra.mxu1 %vm664_vm3, %v4756_v11 }
 0x11d   : > { %5791 = vst [vmem:[#allocation8_spill] sm:$0xff] %v4969_v3  ;;  %v4973_v51 = vpop.f32.mrf.mxu0  ;;  %3838 = vmatprep.mubr.msk.bf16.mxu1 %vm664_vm3, %v5775_v34 }
 0x11e   : > { %v4977_v62 = vpop.f32.mrf.mxu1 }
 0x11f   : > { %5792 = vst [vmem:[#allocation3_spill] sm:$0xff] %v4977_v62  ;;  %v4979_v27 = vpop.f32.mrf.mxu0 }
 0x120   : > { %v4981_v9 = vpop.f32.mrf.mxu1 }
 0x121   : > { %5793 = vst [vmem:[#allocation4_spill] sm:$0xff] %v4981_v9  ;;  %v3670_v38 = vpop.f32.mrf.mxu0  ;;  %3873 = vmatmul.mubr.msk.bf16.vlgmr.msra.gmra.mxu0 %vm664_vm3, %v4540_v14 }
 0x122   : > { %v4985_v37 = vpop.f32.mrf.mxu1  ;;  %3876 = vmatprep.mubr.msk.bf16.mxu0 %vm664_vm3, %v4542_v10 }
 0x123   : > { %5794 = vst [vmem:[#allocation6_spill] sm:$0xff] %v4985_v37  ;;  %v1436_v3 = vpop.f32.mrf.mxu0 }
 0x124   : > { %v3636_v24 = vpop.f32.mrf.mxu1  ;;  %3839 = vmatmul.mubr.msk.bf16.vlgmr.msra.gmra.mxu1 %vm664_vm3, %v5776_v42 }
 0x125   : > { %v1052_v34 = vadd.f32 %v3636_v24, %v4861_v63  ;;  %v3671_v62 = vpop.f32.mrf.mxu0  ;;  %3842 = vmatprep.mubr.msk.bf16.mxu1 %vm664_vm3, %v5777_v46 }
 0x126   : > { %v1043_v9 = vpop.f32.mrf.mxu1 }
 0x127   : > { %v4994_v54 = vadd.f32 %v3670_v38, %v1052_v34  ;;  %v1044_v14 = vadd.f32 %v1043_v9, %v4871_v53  ;;  %v1439_v37 = vpop.f32.mrf.mxu0 }
 0x128   : > { %v3637_v6 = vpop.f32.mrf.mxu1 }
 0x129   : > { %v4997_v32 = vadd.f32 %v1436_v3, %v1044_v14  ;;  %v1055_v10 = vadd.f32 %v3637_v6, %v4877_v56  ;;  %v3674_v12 = vpop.f32.mrf.mxu0  ;;  %3877 = vmatmul.mubr.msk.bf16.gmra.mxu0 %vm664_vm3, %v4577_v30 }
 0x12a   : > { %v1046_v42 = vpop.f32.mrf.mxu1  ;;  %3880 = vmatprep.mubr.msk.bf16.mxu0 %vm664_vm3, %v4579_v1 }
 0x12b   : > { %v5004_v46 = vadd.f32 %v3671_v62, %v1055_v10  ;;  %v1047_v63 = vadd.f32 %v1046_v42, %v4887_v59  ;;  %v1452_v24 = vpop.f32.mrf.mxu0 }
 0x12c   : > { %v3640_v53 = vpop.f32.mrf.mxu1  ;;  %3843 = vmatmul.mubr.msk.bf16.gmra.mxu1 %vm664_vm3, %v5778_v19 }
 0x12d   : > { %v5009_v38 = vadd.f32 %v1439_v37, %v1047_v63  ;;  %v1068_v56 = vadd.f32 %v3640_v53, %v4893_v20  ;;  %v3675_v6 = vpop.f32.mrf.mxu0  ;;  %3846 = vmatprep.mubr.msk.bf16.mxu1 %vm664_vm3, %v5779_v36 }
 0x12e   : > { %v1059_v30 = vpop.f32.mrf.mxu1 }
 0x12f   : > { %v5014_v3 = vadd.f32 %v3674_v12, %v1068_v56  ;;  %v1060_v1 = vadd.f32 %v1059_v30, %v4903_v55  ;;  %v1455_v62 = vpop.f32.mrf.mxu0 }
 0x130   : > { %v3641_v59 = vpop.f32.mrf.mxu1 }
 0x131   : > { %v5017_v9 = vadd.f32 %v1452_v24, %v1060_v1  ;;  %v1071_v34 = vadd.f32 %v3641_v59, %v4909_v39  ;;  %v3678_v19 = vpop.f32.mrf.mxu0  ;;  %3881 = vmatmul.mubr.msk.bf16.gmra.mxu0 %vm664_vm3, %v4665_v23 }
 0x132   : > { %v1062_v20 = vpop.f32.mrf.mxu1  ;;  %3884 = vmatprep.mubr.msk.bf16.mxu0 %vm664_vm3, %v4670_v8 }
 0x133   : > { %v5024_v36 = vadd.f32 %v3675_v6, %v1071_v34  ;;  %v1063_v12 = vadd.f32 %v1062_v20, %v4919_v44  ;;  %v1468_v37 = vpop.f32.mrf.mxu0 }
 0x134   : > { %v3644_v55 = vpop.f32.mrf.mxu1  ;;  %3847 = vmatmul.mubr.msk.bf16.gmra.mxu1 %vm664_vm3, %v4452_v15 }
 0x135   : > { %v5029_v14 = vadd.f32 %v1455_v62, %v1063_v12  ;;  %v1084_v39 = vadd.f32 %v3644_v55, %v4925_v18  ;;  %v3679_v10 = vpop.f32.mrf.mxu0  ;;  %3850 = vmatprep.mubr.msk.bf16.mxu1 %vm664_vm3, %v5780_v26 }
 0x136   : > { %v1075_v23 = vpop.f32.mrf.mxu1 }
 0x137   : > { %v5034_v42 = vadd.f32 %v3678_v19, %v1084_v39  ;;  %v1076_v8 = vadd.f32 %v1075_v23, %v4935_v29  ;;  %v1471_v63 = vpop.f32.mrf.mxu0 }
 0x138   : > { %v3645_v44 = vpop.f32.mrf.mxu1 }
 0x139   : > { %v5037_v24 = vadd.f32 %v1468_v37, %v1076_v8  ;;  %v1087_v53 = vadd.f32 %v3645_v44, %v4941_v43  ;;  %v3682_v15 = vpop.f32.mrf.mxu0  ;;  %3885 = vmatmul.mubr.msk.bf16.gmra.mxu0 %vm664_vm3, %v4703_v13  ;;  %v2451_v37 = vshll.u32 %v4945_v28, 16 }
 0x13a   : > { %v1078_v18 = vpop.f32.mrf.mxu1  ;;  %3888 = vmatprep.mubr.msk.bf16.mxu0 %vm664_vm3, %v4705_v16 }
 0x13b   : > { %v5044_v26 = vadd.f32 %v3679_v10, %v1087_v53  ;;  %v1079_v56 = vadd.f32 %v1078_v18, %v4954_v31  ;;  %v1484_v6 = vpop.f32.mrf.mxu0  ;;  %v2453_v44 = vrot.slane %v2451_v37, 5 }
 0x13c   : > { %v3648_v29 = vpop.f32.mrf.mxu1  ;;  %3851 = vmatmul.mubr.msk.bf16.gmra.mxu1 %vm664_vm3, %v5781_v0 }
 0x13d   : > { %v5049_v30 = vadd.f32 %v1471_v63, %v1079_v56  ;;  %v1100_v43 = vadd.f32 %v3648_v29, %v4962_v25  ;;  %v3683_v1 = vpop.f32.mrf.mxu0  ;;  %3854 = vmatprep.mubr.msk.bf16.mxu1 %vm664_vm3, %v5782_v35 }
 0x13e   : > { %v1091_v13 = vpop.f32.mrf.mxu1 }
 0x13f   : > { %v5054_v62 = vadd.f32 %v3682_v15, %v1100_v43  ;;  %v1092_v16 = vadd.f32 %v1091_v13, %v4967_v41  ;;  %v1487_v59 = vpop.f32.mrf.mxu0  ;;  %v2448_v41 = vshrl.u32 %v4945_v28, 16 }
 0x140   : > { %v3649_v31 = vpop.f32.mrf.mxu1 }
 0x141   : > { %v5057_v34 = vadd.f32 %v1484_v6, %v1092_v16  ;;  %v1103_v19 = vadd.f32 %v3649_v31, %v4973_v51  ;;  %v3686_v0 = vpop.f32.mrf.mxu0  ;;  %3889 = vmatmul.mubr.msk.bf16.gmra.mxu0 %vm664_vm3, %v4620_v21  ;;  %v2457_v51 = vshll.u32 %v4948_v61, 16  ;;  %v2461_v21 = vshrl.u32 %v4948_v61, 16 }
 0x142   : > { %v1094_v25 = vpop.f32.mrf.mxu1  ;;  %3892 = vmatprep.mubr.msk.bf16.mxu0 %vm664_vm3, %v4635_v50 }
 0x143   : > { %v5064_v35 = vadd.f32 %v3683_v1, %v1103_v19  ;;  %v1095_v20 = vadd.f32 %v1094_v25, %v4979_v27  ;;  %v1500_v12 = vpop.f32.mrf.mxu0  ;;  %v2459_v15 = vrot.slane %v2457_v51, 5  ;;  %v2463_v18 = vrot.slane %v2461_v21, 4 }
 0x144   : > { %v3652_v55 = vpop.f32.mrf.mxu1  ;;  %3855 = vmatmul.mubr.msk.bf16.gmra.mxu1 %vm664_vm3, %v5783_v40  ;;  %v2450_v40 = vrot.slane %v2448_v41, 4  ;;  %v3421_v19 = vrot.slane %v4945_v28, 9 }
 0x145   : > { %v5073_v39 = vadd.f32 %v1487_v59, %v1095_v20  ;;  %v1116_v50 = vadd.f32 %v3652_v55, %v4867_v47  ;;  %v3687_v10 = vpop.f32.mrf.mxu0  ;;  %3858 = vmatprep.mubr.msk.bf16.mxu1 %vm664_vm3, %v5784_v57  ;;  %v2678_v57 = vrot.slane %v4948_v61, 5 }
 0x146   : > { %v1107_v27 = vpop.f32.mrf.mxu1 }
 0x147   : > { %v5078_v23 = vadd.f32 %v3686_v0, %v1116_v50  ;;  %v1108_v8 = vadd.f32 %v1107_v27, %v4873_v33  ;;  %v1503_v63 = vpop.f32.mrf.mxu0  ;;  %v225_v33 = vld [vmem:[%s4063_s23 + $0xd4] sm:$0x1] }
 0x148   : > { %v3653_v53 = vpop.f32.mrf.mxu1  ;;  %v2467_v31 = vshll.u32 %v225_v33, 16  ;;  %v2681_v25 = vrot.slane %v225_v33, 5 }
 0x149   : > { %v5081_v56 = vadd.f32 %v1500_v12, %v1108_v8  ;;  %v1119_v47 = vadd.f32 %v3653_v53, %v4883_v17  ;;  %v3690_v6 = vpop.f32.mrf.mxu0  ;;  %3893 = vmatmul.mubr.msk.bf16.gmra.mxu0 %vm664_vm3, %v4657_v52  ;;  %v2454_v17 = vor.u32 %v2453_v44, %v2450_v40 }
 0x14a   : > { %v1110_v29 = vpop.f32.mrf.mxu1  ;;  %3896 = vmatprep.mubr.msk.bf16.mxu0 %vm664_vm3, %v4668_v58  ;;  %v2464_v58 = vor.u32 %v2463_v18, %v2459_v15  ;;  %v2469_v28 = vrot.slane %v2467_v31, 5 }
 0x14b   : > { %v5090_v43 = vadd.f32 %v3687_v10, %v1119_v47  ;;  %v1111_v1 = vadd.f32 %v1110_v29, %v4889_v4  ;;  %v1516_v13 = vpop.f32.mrf.mxu0  ;;  %v2680_v4 = vrot.slane %v2678_v57, 4  ;;  %v2455_v37 = vrot.slane %v2454_v17, 4  ;;  %v5798_v47 = vld [vmem:[#allocation16_spill] sm:$0xff]  ;;  %v5799_v29 = vld [vmem:[#allocation18_spill] sm:$0xff]  ;;  %v5800_v17 = vld [vmem:[#allocation21_spill] sm:$0xff] }
 0x14c   : > { %v3656_v16 = vpop.f32.mrf.mxu1  ;;  %3859 = vmatmul.mubr.msk.bf16.gmra.mxu1 %vm664_vm3, %v5785_v7 }
 0x14d   : > { %v5095_v59 = vadd.f32 %v1503_v63, %v1111_v1  ;;  %v1132_v52 = vadd.f32 %v3656_v16, %v4899_v48  ;;  %v3691_v61 = vpop.f32.mrf.mxu0  ;;  %3862 = vmatprep.mubr.msk.bf16.mxu1 %vm664_vm3, %v4426_v5  ;;  %v2465_v5 = vrot.slane %v2464_v58, 4  ;;  %v2682_v50 = vsel %vm4431_vm7, %v2680_v4, %v2681_v25  ;;  %v5795_v63 = vld [vmem:[#allocation25_spill] sm:$0xff] }
 0x14e   : > { %v1123_v0 = vpop.f32.mrf.mxu1  ;;  %v2460_v40 = vsel %vm4108_vm4, %v2455_v37, %v2459_v15 }
 0x14f   : > { %v5101_v20 = vadd.f32 %v3690_v6, %v1132_v52  ;;  %v1124_v7 = vadd.f32 %v1123_v0, %v4905_v45  ;;  %v1519_v12 = vpop.f32.mrf.mxu0  ;;  %v2679_v45 = vsel %vm4431_vm7, %v3421_v19, %v2678_v57  ;;  %v2470_v60 = vsel %vm4108_vm4, %v2465_v5, %v2469_v28  ;;  %v5801_v19 = vld [vmem:[#allocation23_spill] sm:$0xff] }
 0x150   : > { %v3657_v41 = vpop.f32.mrf.mxu1  ;;  %v3404_v15 = vcombine.low %v2460_v40, %v2470_v60  ;;  %v5803_v5 = vld [vmem:[#allocation3_spill] sm:$0xff]  ;;  %v5805_v40 = vld [vmem:[#allocation6_spill] sm:$0xff] }
 0x151   : > { %v5104_v55 = vadd.f32 %v1516_v13, %v1124_v7  ;;  %v1135_v48 = vadd.f32 %v3657_v41, %v4915_v22  ;;  %v3694_v51 = vpop.f32.mrf.mxu0  ;;  %3897 = vmatmul.mubr.msk.bf16.gmra.mxu0 %vm664_vm3, %v4677_v2 }
 0x152   : > { %v1126_v21 = vpop.f32.mrf.mxu1  ;;  %3900 = vmatprep.mubr.msk.bf16.mxu0 %vm664_vm3, %v4756_v11  ;;  %v5797_v11 = vld [vmem:[#allocation20_spill] sm:$0xff] }
 0x153   : > { %v5115_v10 = vadd.f32 %v3691_v61, %v1135_v48  ;;  %v1127_v22 = vadd.f32 %v1126_v21, %v4921_v49  ;;  %v1532_v27 = vpop.f32.mrf.mxu0  ;;  %v3423_v49 = vcombine.low %v2679_v45, %v2682_v50 }
 0x154   : > { %v3660_v8 = vpop.f32.mrf.mxu1  ;;  %3863 = vmatmul.mubr.msk.bf16.gmra.mxu1 %vm664_vm3, %v5795_v63 }
 0x155   : > { %v5122_v44 = vadd.f32 %v1519_v12, %v1127_v22  ;;  %v1148_v53 = vadd.f32 %v3660_v8, %v5797_v11  ;;  %v3695_v18 = vpop.f32.mrf.mxu0  ;;  %3866 = vmatprep.mubr.msk.bf16.mxu1 %vm664_vm3, %v5798_v47  ;;  %v5802_v12 = vld [vmem:[#allocation8_spill] sm:$0xff] }
 0x156   : > { %v1139_v6 = vpop.f32.mrf.mxu1  ;;  %v5804_v22 = vld [vmem:[#allocation4_spill] sm:$0xff] }
 0x157   : > { %v5129_v57 = vadd.f32 %v3694_v51, %v1148_v53  ;;  %v1140_v33 = vadd.f32 %v1139_v6, %v5799_v29  ;;  %v1535_v1 = vpop.f32.mrf.mxu0 }
 0x158   : > { %v3661_v13 = vpop.f32.mrf.mxu1 }
 0x159   : > { %v5132_v16 = vadd.f32 %v1532_v27, %v1140_v33  ;;  %v1151_v52 = vadd.f32 %v3661_v13, %v5800_v17  ;;  %v3698_v61 = vpop.f32.mrf.mxu0  ;;  %3901 = vmatmul.mubr.msk.bf16.gmra.mxu0 %vm664_vm3, %v3423_v49 }
 0x15a   : > { %v1142_v58 = vpop.f32.mrf.mxu1 }
 0x15b   : > { %v5136_v31 = vadd.f32 %v3695_v18, %v1151_v52  ;;  %v1143_v0 = vadd.f32 %v1142_v58, %v5801_v19  ;;  %v1548_v4 = vpop.f32.mrf.mxu0 }
 0x15c   : > { %v3664_v25 = vpop.f32.mrf.mxu1  ;;  %3867 = vmatmul.mubr.msk.bf16.gmra.mxu1 %vm664_vm3, %v3404_v15 }
 0x15d   : > { %v5140_v7 = vadd.f32 %v1535_v1, %v1143_v0  ;;  %v1164_v41 = vadd.f32 %v3664_v25, %v5802_v12  ;;  %v3699_v37 = vpop.f32.mrf.mxu0 }
 0x15e   : > { %v1155_v48 = vpop.f32.mrf.mxu1 }
 0x15f   : > { %v5143_v51 = vadd.f32 %v3698_v61, %v1164_v41  ;;  %v1156_v28 = vadd.f32 %v1155_v48, %v5803_v5  ;;  %v1551_v21 = vpop.f32.mrf.mxu0 }
 0x160   : > { %v3665_v45 = vpop.f32.mrf.mxu1 }
 0x161   : > { %v5146_v50 = vadd.f32 %v1548_v4, %v1156_v28  ;;  %v1167_v27 = vadd.f32 %v3665_v45, %v5804_v22  ;;  %v3738_v8 = vpop.f32.mrf.mxu0 }
 0x162   : > { %v1158_v63 = vpop.f32.mrf.mxu1 }
 0x163   : > { %v5149_v2 = vadd.f32 %v3699_v37, %v1167_v27  ;;  %v1159_v11 = vadd.f32 %v1158_v63, %v5805_v40  ;;  %v1870_v53 = vpop.f32.mrf.mxu0 }
 0x164   : > { %v3704_v18 = vpop.f32.mrf.mxu1 }
 0x165   : > { %v5152_v47 = vadd.f32 %v1551_v21, %v1159_v11  ;;  %v1771_v60 = vadd.f32 %v3704_v18, %v4994_v54  ;;  %v3739_v49 = vpop.f32.mrf.mxu0 }
 0x166   : > { %v1642_v6 = vpop.f32.mrf.mxu1 }
 0x167   : > { %v5155_v29 = vadd.f32 %v3738_v8, %v1771_v60  ;;  %v1769_v33 = vadd.f32 %v1642_v6, %v4997_v32  ;;  %v1873_v1 = vpop.f32.mrf.mxu0 }
 0x168   : > { %v3705_v13 = vpop.f32.mrf.mxu1 }
 0x169   : > { %v5158_v15 = vadd.f32 %v1870_v53, %v1769_v33  ;;  %v1772_v17 = vadd.f32 %v3705_v13, %v5004_v46  ;;  %v3742_v52 = vpop.f32.mrf.mxu0 }
 0x16a   : > { %v1645_v61 = vpop.f32.mrf.mxu1 }
 0x16b   : > { %v5161_v58 = vadd.f32 %v3739_v49, %v1772_v17  ;;  %v1770_v19 = vadd.f32 %v1645_v61, %v5009_v38  ;;  %v1886_v0 = vpop.f32.mrf.mxu0 }
 0x16c   : > { %v3708_v54 = vpop.f32.mrf.mxu1 }
 0x16d   : > { %v5164_v4 = vadd.f32 %v1873_v1, %v1770_v19  ;;  %v1775_v25 = vadd.f32 %v3708_v54, %v5014_v3  ;;  %v3743_v12 = vpop.f32.mrf.mxu0 }
 0x16e   : > { %v1658_v32 = vpop.f32.mrf.mxu1 }
 0x16f   : > { %v5167_v41 = vadd.f32 %v3742_v52, %v1775_v25  ;;  %v1773_v37 = vadd.f32 %v1658_v32, %v5017_v9  ;;  %v1889_v48 = vpop.f32.mrf.mxu0 }
 0x170   : > { %v3709_v46 = vpop.f32.mrf.mxu1 }
 0x171   : > { %v5170_v5 = vadd.f32 %v1886_v0, %v1773_v37  ;;  %v1776_v28 = vadd.f32 %v3709_v46, %v5024_v36  ;;  %v3746_v21 = vpop.f32.mrf.mxu0 }
 0x172   : > { %v1661_v38 = vpop.f32.mrf.mxu1 }
 0x173   : > { %v5173_v45 = vadd.f32 %v3743_v12, %v1776_v28  ;;  %v1774_v22 = vadd.f32 %v1661_v38, %v5029_v14  ;;  %v1902_v27 = vpop.f32.mrf.mxu0 }
 0x174   : > { %v3712_v3 = vpop.f32.mrf.mxu1 }
 0x175   : > { %v5176_v8 = vadd.f32 %v1889_v48, %v1774_v22  ;;  %v1779_v63 = vadd.f32 %v3712_v3, %v5034_v42  ;;  %v3747_v40 = vpop.f32.mrf.mxu0 }
 0x176   : > { %v1674_v9 = vpop.f32.mrf.mxu1 }
 0x177   : > { %v5179_v11 = vadd.f32 %v3746_v21, %v1779_v63  ;;  %v1777_v53 = vadd.f32 %v1674_v9, %v5037_v24  ;;  %v1905_v18 = vpop.f32.mrf.mxu0 }
 0x178   : > { %v3713_v36 = vpop.f32.mrf.mxu1 }
 0x179   : > { %v5182_v60 = vadd.f32 %v1902_v27, %v1777_v53  ;;  %v1780_v49 = vadd.f32 %v3713_v36, %v5044_v26  ;;  %v3750_v6 = vpop.f32.mrf.mxu0 }
 0x17a   : > { %v1677_v14 = vpop.f32.mrf.mxu1 }
 0x17b   : > { %v5185_v33 = vadd.f32 %v3747_v40, %v1780_v49  ;;  %v1778_v1 = vadd.f32 %v1677_v14, %v5049_v30  ;;  %v1918_v13 = vpop.f32.mrf.mxu0 }
 0x17c   : > { %v3716_v42 = vpop.f32.mrf.mxu1 }
 0x17d   : > { %v5188_v17 = vadd.f32 %v1905_v18, %v1778_v1  ;;  %v1783_v52 = vadd.f32 %v3716_v42, %v5054_v62  ;;  %v3751_v61 = vpop.f32.mrf.mxu0 }
 0x17e   : > { %v1690_v24 = vpop.f32.mrf.mxu1 }
 0x17f   : > { %v5191_v19 = vadd.f32 %v3750_v6, %v1783_v52  ;;  %v1781_v0 = vadd.f32 %v1690_v24, %v5057_v34  ;;  %v1921_v54 = vpop.f32.mrf.mxu0 }
 0x180   : > { %v3717_v26 = vpop.f32.mrf.mxu1 }
 0x181   : > { %5806 = vst [vmem:[#allocation9_spill] sm:$0xff] %v5191_v19  ;;  %v5194_v25 = vadd.f32 %v1918_v13, %v1781_v0  ;;  %v1784_v12 = vadd.f32 %v3717_v26, %v5064_v35  ;;  %v3754_v32 = vpop.f32.mrf.mxu0 }
 0x182   : > { %v1693_v30 = vpop.f32.mrf.mxu1 }
 0x183   : > { %5807 = vst [vmem:[#allocation7_spill] sm:$0xff] %v5194_v25  ;;  %v5197_v37 = vadd.f32 %v3751_v61, %v1784_v12  ;;  %v1782_v48 = vadd.f32 %v1693_v30, %v5073_v39  ;;  %v1934_v46 = vpop.f32.mrf.mxu0 }
 0x184   : > { %v3720_v62 = vpop.f32.mrf.mxu1 }
 0x185   : > { %5808 = vst [vmem:[#allocation11_spill] sm:$0xff] %v5197_v37  ;;  %v5200_v28 = vadd.f32 %v1921_v54, %v1782_v48  ;;  %v1787_v21 = vadd.f32 %v3720_v62, %v5078_v23  ;;  %v3755_v38 = vpop.f32.mrf.mxu0 }
 0x186   : > { %v1706_v34 = vpop.f32.mrf.mxu1 }
 0x187   : > { %5809 = vst [vmem:[#allocation13_spill] sm:$0xff] %v5200_v28  ;;  %v5203_v22 = vadd.f32 %v3754_v32, %v1787_v21  ;;  %v1785_v27 = vadd.f32 %v1706_v34, %v5081_v56  ;;  %v1937_v3 = vpop.f32.mrf.mxu0 }
 0x188   : > { %v3721_v35 = vpop.f32.mrf.mxu1 }
 0x189   : > { %5810 = vst [vmem:[#allocation15_spill] sm:$0xff] %v5203_v22  ;;  %v5206_v63 = vadd.f32 %v1934_v46, %v1785_v27  ;;  %v1788_v40 = vadd.f32 %v3721_v35, %v5090_v43  ;;  %v3758_v9 = vpop.f32.mrf.mxu0 }
 0x18a   : > { %v1709_v39 = vpop.f32.mrf.mxu1 }
 0x18b   : > { %5811 = vst [vmem:[#allocation19_spill] sm:$0xff] %v5206_v63  ;;  %v5209_v53 = vadd.f32 %v3755_v38, %v1788_v40  ;;  %v1786_v18 = vadd.f32 %v1709_v39, %v5095_v59  ;;  %v1950_v36 = vpop.f32.mrf.mxu0 }
 0x18c   : > { %v3724_v23 = vpop.f32.mrf.mxu1 }
 0x18d   : > { %5812 = vst [vmem:[#allocation24_spill] sm:$0xff] %v5209_v53  ;;  %v5212_v49 = vadd.f32 %v1937_v3, %v1786_v18  ;;  %v1791_v6 = vadd.f32 %v3724_v23, %v5101_v20  ;;  %v3759_v14 = vpop.f32.mrf.mxu0 }
 0x18e   : > { %v1722_v56 = vpop.f32.mrf.mxu1 }
 0x18f   : > { %v5215_v1 = vadd.f32 %v3758_v9, %v1791_v6  ;;  %v1789_v13 = vadd.f32 %v1722_v56, %v5104_v55  ;;  %v1953_v42 = vpop.f32.mrf.mxu0 }
 0x190   : > { %v3725_v43 = vpop.f32.mrf.mxu1 }
 0x191   : > { %v5218_v52 = vadd.f32 %v1950_v36, %v1789_v13  ;;  %v1792_v61 = vadd.f32 %v3725_v43, %v5115_v10  ;;  %v3762_v24 = vpop.f32.mrf.mxu0 }
 0x192   : > { %v1725_v59 = vpop.f32.mrf.mxu1 }
 0x193   : > { %v5221_v0 = vadd.f32 %v3759_v14, %v1792_v61  ;;  %v1790_v54 = vadd.f32 %v1725_v59, %v5122_v44  ;;  %v1966_v26 = vpop.f32.mrf.mxu0 }
 0x194   : > { %v3728_v20 = vpop.f32.mrf.mxu1 }
 0x195   : > { %v5224_v12 = vadd.f32 %v1953_v42, %v1790_v54  ;;  %v1795_v32 = vadd.f32 %v3728_v20, %v5129_v57  ;;  %v3763_v30 = vpop.f32.mrf.mxu0 }
 0x196   : > { %v1738_v55 = vpop.f32.mrf.mxu1 }
 0x197   : > { %v5227_v48 = vadd.f32 %v3762_v24, %v1795_v32  ;;  %v1793_v46 = vadd.f32 %v1738_v55, %v5132_v16  ;;  %v1969_v62 = vpop.f32.mrf.mxu0 }
 0x198   : > { %v3729_v10 = vpop.f32.mrf.mxu1 }
 0x199   : > { %v5230_v21 = vadd.f32 %v1966_v26, %v1793_v46  ;;  %v1796_v38 = vadd.f32 %v3729_v10, %v5136_v31  ;;  %v3766_v34 = vpop.f32.mrf.mxu0 }
 0x19a   : > { %v1741_v44 = vpop.f32.mrf.mxu1 }
 0x19b   : > { %v5233_v27 = vadd.f32 %v3763_v30, %v1796_v38  ;;  %v1794_v3 = vadd.f32 %v1741_v44, %v5140_v7  ;;  %v1982_v35 = vpop.f32.mrf.mxu0 }
 0x19c   : > { %v3732_v57 = vpop.f32.mrf.mxu1 }
 0x19d   : > { %v5236_v40 = vadd.f32 %v1969_v62, %v1794_v3  ;;  %v1799_v9 = vadd.f32 %v3732_v57, %v5143_v51  ;;  %v3767_v39 = vpop.f32.mrf.mxu0 }
 0x19e   : > { %v1754_v16 = vpop.f32.mrf.mxu1 }
 0x19f   : > { %v5239_v18 = vadd.f32 %v3766_v34, %v1799_v9  ;;  %v1797_v36 = vadd.f32 %v1754_v16, %v5146_v50  ;;  %v1985_v23 = vpop.f32.mrf.mxu0 }
 0x1a0   : > { %v3733_v31 = vpop.f32.mrf.mxu1 }
 0x1a1   : > { %v5242_v6 = vadd.f32 %v1982_v35, %v1797_v36  ;;  %v1800_v14 = vadd.f32 %v3733_v31, %v5149_v2  ;;  %v5245_v56 = vpop.f32.mrf.mxu0 }
 0x1a2   : > { %v1757_v7 = vpop.f32.mrf.mxu1 }
 0x1a3   : > { %v5247_v13 = vadd.f32 %v3767_v39, %v1800_v14  ;;  %v1798_v42 = vadd.f32 %v1757_v7, %v5152_v47  ;;  %v5250_v51 = vpop.f32.mrf.mxu0 }
 0x1a4   : > { %v5252_v43 = vpop.f32.mrf.mxu1 }
 0x1a5   : > { %v5254_v61 = vadd.f32 %v1985_v23, %v1798_v42  ;;  %v5256_v50 = vpop.f32.mrf.mxu0 }
 0x1a6   : > { %v5258_v24 = vpop.f32.mrf.mxu1 }
 0x1a7   : > { %v5260_v59 = vpop.f32.mrf.mxu0 }
 0x1a8   : > { %v5262_v2 = vpop.f32.mrf.mxu1 }
 0x1a9   : > { %v5264_v54 = vpop.f32.mrf.mxu0 }
 0x1aa   : > { %v5266_v26 = vpop.f32.mrf.mxu1 }
 0x1ab   : > { %v5268_v20 = vpop.f32.mrf.mxu0 }
 0x1ac   : > { %v5270_v47 = vpop.f32.mrf.mxu1 }
 0x1ad   : > { %v5272_v32 = vpop.f32.mrf.mxu0 }
 0x1ae   : > { %v5274_v30 = vpop.f32.mrf.mxu1 }
 0x1af   : > { %v5276_v55 = vpop.f32.mrf.mxu0 }
 0x1b0   : > { %v5278_v46 = vpop.f32.mrf.mxu1 }
 0x1b1   : > { %v5280_v62 = vpop.f32.mrf.mxu0 }
 0x1b2   : > { %v5282_v10 = vpop.f32.mrf.mxu1 }
 0x1b3   : > { %v5284_v38 = vpop.f32.mrf.mxu0 }
 0x1b4   : > { %v5286_v34 = vpop.f32.mrf.mxu1 }
 0x1b5   : > { %v5288_v44 = vpop.f32.mrf.mxu0 }
 0x1b6   : > { %v5290_v3 = vpop.f32.mrf.mxu1 }
 0x1b7   : > { %v5292_v35 = vpop.f32.mrf.mxu0 }
 0x1b8   : > { %5813 = vst [vmem:[#allocation5_spill] sm:$0xff] %v5292_v35  ;;  %v5294_v57 = vpop.f32.mrf.mxu1 }
 0x1b9   : > { %v5296_v9 = vpop.f32.mrf.mxu0 }
 0x1ba   : > { %5814 = vst [vmem:[#allocation10_spill] sm:$0xff] %v5296_v9  ;;  %v5298_v39 = vpop.f32.mrf.mxu1 }
 0x1bb   : > { %5815 = vst [vmem:[#allocation12_spill] sm:$0xff] %v5298_v39  ;;  %v5300_v16 = vpop.f32.mrf.mxu0 }
 0x1bc   : > { %5816 = vst [vmem:[#allocation14_spill] sm:$0xff] %v5300_v16  ;;  %v5302_v36 = vpop.f32.mrf.mxu1 }
 0x1bd   : > { %5817 = vst [vmem:[#allocation17_spill] sm:$0xff] %v5302_v36  ;;  %v5304_v23 = vpop.f32.mrf.mxu0 }
 0x1be   : > { %5818 = vst [vmem:[#allocation22_spill] sm:$0xff] %v5304_v23  ;;  %v5306_v31 = vpop.f32.mrf.mxu1 }
 0x1bf   : > { %5819 = vst [vmem:[#allocation25_spill] sm:$0xff] %v5306_v31  ;;  %v5308_v14 = vpop.f32.mrf.mxu0 }
 0x1c0   : > { %5820 = vst [vmem:[#allocation2_spill] sm:$0xff] %v5308_v14  ;;  %v5310_v7 = vpop.f32.mrf.mxu1 }
 0x1c1   : > { %5821 = vst [vmem:[#allocation20_spill] sm:$0xff] %v5310_v7  ;;  %v5312_v42 = vpop.f32.mrf.mxu0 }
 0x1c2   : > { %5822 = vst [vmem:[#allocation16_spill] sm:$0xff] %v5312_v42  ;;  %v5314_v53 = vpop.f32.mrf.mxu1 }
 0x1c3   : > { %5823 = vst [vmem:[#allocation18_spill] sm:$0xff] %v5314_v53  ;;  %v5316_v63 = vpop.f32.mrf.mxu0 }
 0x1c4   : > { %5824 = vst [vmem:[#allocation21_spill] sm:$0xff] %v5316_v63  ;;  %v5318_v22 = vpop.f32.mrf.mxu1 }
 0x1c5   : > { %5825 = vst [vmem:[#allocation23_spill] sm:$0xff] %v5318_v22  ;;  %v5320_v28 = vpop.f32.mrf.mxu0 }
 0x1c6   : > { %5826 = vst [vmem:[#allocation8_spill] sm:$0xff] %v5320_v28  ;;  %v5322_v16 = vpop.f32.mrf.mxu1 }
 0x1c7   : > { %5827 = vst [vmem:[#allocation3_spill] sm:$0xff] %v5322_v16  ;;  %v2355_v9 = vpop.f32.mrf.mxu0 }
 0x1c8   : > { %v5324_v23 = vpop.f32.mrf.mxu1 }
 0x1c9   : > { %5828 = vst [vmem:[#allocation4_spill] sm:$0xff] %v5324_v23  ;;  %v3826_v37 = vpop.f32.mrf.mxu0 }
 0x1ca   : > { %v2149_v35 = vpop.f32.mrf.mxu1 }
 0x1cb   : > { %v2226_v14 = vadd.f32 %v2149_v35, %v5212_v49  ;;  %v2368_v7 = vpop.f32.mrf.mxu0 }
 0x1cc   : > { %v3792_v31 = vpop.f32.mrf.mxu1 }
 0x1cd   : > { %v5327_v42 = vadd.f32 %v2355_v9, %v2226_v14  ;;  %v2231_v53 = vadd.f32 %v3792_v31, %v5215_v1  ;;  %v3827_v63 = vpop.f32.mrf.mxu0 }
 0x1ce   : > { %v2162_v25 = vpop.f32.mrf.mxu1 }
 0x1cf   : > { %v5330_v22 = vadd.f32 %v3826_v37, %v2231_v53  ;;  %v2229_v28 = vadd.f32 %v2162_v25, %v5218_v52  ;;  %v2371_v16 = vpop.f32.mrf.mxu0 }
 0x1d0   : > { %v3793_v36 = vpop.f32.mrf.mxu1 }
 0x1d1   : > { %v5333_v19 = vadd.f32 %v2368_v7, %v2229_v28  ;;  %v2232_v23 = vadd.f32 %v3793_v36, %v5221_v0  ;;  %v3830_v39 = vpop.f32.mrf.mxu0 }
 0x1d2   : > { %v2165_v49 = vpop.f32.mrf.mxu1 }
 0x1d3   : > { %v5336_v35 = vadd.f32 %v3827_v63, %v2232_v23  ;;  %v2230_v9 = vadd.f32 %v2165_v49, %v5224_v12  ;;  %v2384_v14 = vpop.f32.mrf.mxu0 }
 0x1d4   : > { %v3796_v1 = vpop.f32.mrf.mxu1 }
 0x1d5   : > { %v5339_v31 = vadd.f32 %v2371_v16, %v2230_v9  ;;  %v2235_v37 = vadd.f32 %v3796_v1, %v5227_v48  ;;  %v3831_v53 = vpop.f32.mrf.mxu0 }
 0x1d6   : > { %v2178_v25 = vpop.f32.mrf.mxu1 }
 0x1d7   : > { %v5342_v52 = vadd.f32 %v3830_v39, %v2235_v37  ;;  %v2233_v28 = vadd.f32 %v2178_v25, %v5230_v21  ;;  %v2387_v7 = vpop.f32.mrf.mxu0 }
 0x1d8   : > { %v3797_v0 = vpop.f32.mrf.mxu1 }
 0x1d9   : > { %v5345_v36 = vadd.f32 %v2384_v14, %v2233_v28  ;;  %v2236_v63 = vadd.f32 %v3797_v0, %v5233_v27  ;;  %v3834_v23 = vpop.f32.mrf.mxu0  ;;  %v2211_v14 = vadd.f32 %v5252_v43, %v5155_v29  ;;  %v2212_v29 = vadd.f32 %v5262_v2, %v5161_v58  ;;  %v5380_v58 = vld [vmem:[%s5686_s2] ss:$0 sm:$0xff] }
 0x1da   : > { %v2181_v12 = vpop.f32.mrf.mxu1 }
 0x1db   : > { %v5348_v49 = vadd.f32 %v3831_v53, %v2236_v63  ;;  %v2234_v16 = vadd.f32 %v2181_v12, %v5236_v40  ;;  %v2400_v9 = vpop.f32.mrf.mxu0  ;;  %v2209_v40 = vadd.f32 %v5258_v24, %v5158_v15  ;;  %v2417_v12 = vadd.f32 %v5245_v56, %v2211_v14 }
 0x1dc   : > { %v3800_v48 = vpop.f32.mrf.mxu1  ;;  %v2210_v15 = vadd.f32 %v5266_v26, %v5164_v4  ;;  %v2215_v56 = vadd.f32 %v5270_v47, %v5167_v41  ;;  %v2418_v2 = vadd.f32 %v5256_v50, %v2212_v29  ;;  %v2213_v4 = vadd.f32 %v5274_v30, %v5170_v5 }
 0x1dd   : > { %v5351_v1 = vadd.f32 %v2387_v7, %v2234_v16  ;;  %v2239_v39 = vadd.f32 %v3800_v48, %v5239_v18  ;;  %v3835_v37 = vpop.f32.mrf.mxu0  ;;  %v2415_v48 = vadd.f32 %v5250_v51, %v2209_v40  ;;  %v2216_v26 = vadd.f32 %v5278_v46, %v5173_v45 }
 0x1de   : > { %v2194_v21 = vpop.f32.mrf.mxu1  ;;  %v2214_v41 = vadd.f32 %v5282_v10, %v5176_v8  ;;  %v2219_v47 = vadd.f32 %v5286_v34, %v5179_v11  ;;  %v2416_v14 = vadd.f32 %v5260_v59, %v2210_v15  ;;  %v2421_v45 = vadd.f32 %v5264_v54, %v2215_v56  ;;  %v5831_v56 = vld [vmem:[#allocation17_spill] sm:$0xff] }
 0x1df   : > { %v5356_v25 = vadd.f32 %v3834_v23, %v2239_v39  ;;  %v2237_v27 = vadd.f32 %v2194_v21, %v5242_v6  ;;  %v2403_v28 = vpop.f32.mrf.mxu0  ;;  %v5394_v21 = vld [vmem:[%s5686_s2 + $0x1] ss:$0 sm:$0xff]  ;;  %v2217_v8 = vadd.f32 %v5290_v3, %v5182_v60  ;;  %v2220_v11 = vadd.f32 %v5294_v57, %v5185_v33 }
 0x1e0   : > { %v3801_v53 = vpop.f32.mrf.mxu1  ;;  %v2420_v54 = vadd.f32 %v5276_v55, %v2214_v41  ;;  %v2425_v60 = vadd.f32 %v5280_v62, %v2219_v47  ;;  %v5834_v47 = vld [vmem:[#allocation5_spill] sm:$0xff] }
 0x1e1   : > { %v5361_v0 = vadd.f32 %v2400_v9, %v2237_v27  ;;  %v2240_v7 = vadd.f32 %v3801_v53, %v5247_v13  ;;  %v3874_v63 = vpop.f32.mrf.mxu0 }
 0x1e2   : > { %v2197_v18 = vpop.f32.mrf.mxu1 }
 0x1e3   : > { %v5367_v43 = vadd.f32 %v3835_v37, %v2240_v7  ;;  %v2238_v6 = vadd.f32 %v2197_v18, %v5254_v61  ;;  %v2728_v23 = vpop.f32.mrf.mxu0  ;;  %v2419_v7 = vadd.f32 %v5268_v20, %v2213_v4  ;;  %v2426_v20 = vadd.f32 %v5288_v44, %v2220_v11 }
 0x1e4   : > { %v3840_v16 = vpop.f32.mrf.mxu1 }
 0x1e5   : > { %v5373_v24 = vadd.f32 %v2403_v28, %v2238_v6  ;;  %v2645_v13 = vadd.f32 %v3840_v16, %v2417_v12  ;;  %v3875_v9 = vpop.f32.mrf.mxu0  ;;  %v2423_v6 = vadd.f32 %v5284_v38, %v2217_v8  ;;  %v5832_v38 = vld [vmem:[#allocation7_spill] sm:$0xff] }
 0x1e6   : > { %v2516_v61 = vpop.f32.mrf.mxu1 }
 0x1e7   : > { %v2857_v39 = vadd.f32 %v3874_v63, %v2645_v13  ;;  %v2643_v51 = vadd.f32 %v2516_v61, %v2415_v48  ;;  %v2731_v37 = vpop.f32.mrf.mxu0  ;;  %v2422_v63 = vadd.f32 %v5272_v32, %v2216_v26  ;;  %v5829_v32 = vld [vmem:[#allocation12_spill] sm:$0xff] }
 0x1e8   : > { %v3841_v50 = vpop.f32.mrf.mxu1 }
 0x1e9   : > { %v2895_v27 = vmul.f32 %v5380_v58, %v2857_v39  ;;  %v2855_v5 = vadd.f32 %v2728_v23, %v2643_v51  ;;  %v2646_v30 = vadd.f32 %v3841_v50, %v2418_v2  ;;  %v3878_v28 = vpop.f32.mrf.mxu0  ;;  %v2218_v23 = vadd.f32 %v5829_v32, %v5188_v17  ;;  %v5833_v2 = vld [vmem:[#allocation25_spill] sm:$0xff] }
 0x1ea   : > { %v2519_v46 = vpop.f32.mrf.mxu1  ;;  %v2221_v44 = vadd.f32 %v5833_v2, %v5832_v38 }
 0x1eb   : > { %v5404_v10 = vadd.f32 %v5394_v21, %v2895_v27  ;;  %v2893_v34 = vmul.f32 %v5380_v58, %v2855_v5  ;;  %v2858_v59 = vadd.f32 %v3875_v9, %v2646_v30  ;;  %v2644_v53 = vadd.f32 %v2519_v46, %v2416_v14  ;;  %v2744_v40 = vpop.f32.mrf.mxu0  ;;  %v5830_v9 = vld [vmem:[#allocation9_spill] sm:$0xff]  ;;  %v5835_v14 = vld [vmem:[#allocation11_spill] sm:$0xff]  ;;  %v5836_v27 = vld [vmem:[#allocation20_spill] sm:$0xff] }
 0x1ec   : > { %v3844_v3 = vpop.f32.mrf.mxu1  ;;  %v2223_v61 = vadd.f32 %v5831_v56, %v5830_v9  ;;  %v2424_v50 = vadd.f32 %v5834_v47, %v2218_v23  ;;  %v2224_v5 = vadd.f32 %v5836_v27, %v5835_v14 }
 0x1ed   : > { %v2963_v33 = vmul.f32 0.5, %v5404_v10  ;;  %v5413_v57 = vadd.f32 %v5394_v21, %v2893_v34  ;;  %v2896_v18 = vmul.f32 %v5380_v58, %v2858_v59  ;;  %v2856_v12 = vadd.f32 %v2731_v37, %v2644_v53  ;;  %v3879_v29 = vpop.f32.mrf.mxu0  ;;  %v5837_v59 = vld [vmem:[#allocation10_spill] sm:$0xff] }
 0x1ee   : > { %v2649_v55 = vadd.f32 %v3844_v3, %v2421_v45  ;;  %v2532_v16 = vpop.f32.mrf.mxu1  ;;  %v2429_v53 = vadd.f32 %v5837_v59, %v2223_v61 }
 0x1ef   : > { %3943 = vtanh.f32 %v2963_v33  ;;  %v2961_v62 = vmul.f32 0.5, %v5413_v57  ;;  %v5422_v48 = vadd.f32 %v5394_v21, %v2896_v18  ;;  %v2894_v15 = vmul.f32 %v5380_v58, %v2856_v12  ;;  %v2747_v13 = vpop.f32.mrf.mxu0 }
 0x1f0   : > { %v2861_v39 = vadd.f32 %v3878_v28, %v2649_v55  ;;  %v2647_v51 = vadd.f32 %v2532_v16, %v2419_v7  ;;  %v3845_v17 = vpop.f32.mrf.mxu1  ;;  %v5838_v7 = vld [vmem:[#allocation14_spill] sm:$0xff]  ;;  %v5840_v55 = vld [vmem:[#allocation13_spill] sm:$0xff] }
 0x1f1   : > { %3945 = vtanh.f32 %v2961_v62  ;;  %v2964_v37 = vmul.f32 0.5, %v5422_v48  ;;  %v5431_v4 = vadd.f32 %v5394_v21, %v2894_v15  ;;  %v2650_v26 = vadd.f32 %v3845_v17, %v2422_v63  ;;  %v3882_v41 = vpop.f32.mrf.mxu0  ;;  %v5841_v16 = vld [vmem:[#allocation18_spill] sm:$0xff]  ;;  %v5844_v17 = vld [vmem:[#allocation19_spill] sm:$0xff] }
 0x1f2   : > { %v2899_v30 = vmul.f32 %v5380_v58, %v2861_v39  ;;  %v2859_v45 = vadd.f32 %v2744_v40, %v2647_v51  ;;  %v2535_v8 = vpop.f32.mrf.mxu1  ;;  %v5440_v63 = vadd.f32 %v5838_v7, %v2221_v44  ;;  %v2222_v62 = vadd.f32 %v5841_v16, %v5840_v55  ;;  %v5842_v44 = vld [vmem:[#allocation15_spill] sm:$0xff]  ;;  %v5850_v55 = vld [vmem:[#allocation21_spill] sm:$0xff] }
 0x1f3   : > { %3947 = vtanh.f32 %v2964_v37  ;;  %v2962_v28 = vmul.f32 0.5, %v5431_v4  ;;  %v2862_v11 = vadd.f32 %v3879_v29, %v2650_v26  ;;  %v2648_v46 = vadd.f32 %v2535_v8, %v2420_v54  ;;  %v2760_v34 = vpop.f32.mrf.mxu0  ;;  %v5839_v29 = vld [vmem:[#allocation22_spill] sm:$0xff]  ;;  %v5843_v39 = vld [vmem:[#allocation23_spill] sm:$0xff] }
 0x1f4   : > { %v5443_v3 = vadd.f32 %v5394_v21, %v2899_v30  ;;  %v2897_v33 = vmul.f32 %v5380_v58, %v2859_v45  ;;  %v3848_v18 = vpop.f32.mrf.mxu1  ;;  %v5448_v54 = vadd.f32 %v5839_v29, %v2224_v5  ;;  %v2227_v51 = vadd.f32 %v5843_v39, %v5842_v44  ;;  %v5845_v37 = vld [vmem:[#allocation3_spill] sm:$0xff]  ;;  %v5846_v45 = vld [vmem:[#allocation2_spill] sm:$0xff]  ;;  %v5851_v39 = vld [vmem:[#allocation8_spill] sm:$0xff] }
 0x1f5   : > { %3949 = vtanh.f32 %v2962_v28  ;;  %v2900_v40 = vmul.f32 %v5380_v58, %v2862_v11  ;;  %v2860_v12 = vadd.f32 %v2747_v13, %v2648_v46  ;;  %v2653_v32 = vadd.f32 %v3848_v18, %v2425_v60  ;;  %v3883_v23 = vpop.f32.mrf.mxu0  ;;  %v5847_v28 = vld [vmem:[#allocation24_spill] sm:$0xff] }
 0x1f6   : > { %v2967_v15 = vmul.f32 0.5, %v5443_v3  ;;  %v5454_v9 = vadd.f32 %v5394_v21, %v2897_v33  ;;  %v2548_v56 = vpop.f32.mrf.mxu1  ;;  %v2225_v26 = vadd.f32 %v5845_v37, %v5844_v17  ;;  %v5471_v8 = vadd.f32 %v5846_v45, %v2222_v62  ;;  %v5848_v11 = vld [vmem:[#allocation4_spill] sm:$0xff] }
 0x1f7   : > { %v5457_v61 = vadd.f32 %v5394_v21, %v2900_v40  ;;  %v2898_v38 = vmul.f32 %v5380_v58, %v2860_v12  ;;  %v2865_v13 = vadd.f32 %v3882_v41, %v2653_v32  ;;  %v2651_v60 = vadd.f32 %v2548_v56, %v2423_v6  ;;  %v2763_v2 = vpop.f32.mrf.mxu0  ;;  %v5849_v32 = vld [vmem:[#allocation16_spill] sm:$0xff] }
 0x1f8   : > { %3951 = vtanh.f32 %v2967_v15  ;;  %v2965_v47 = vmul.f32 0.5, %v5454_v9  ;;  %v3849_v14 = vpop.f32.mrf.mxu1  ;;  %v2228_v46 = vadd.f32 %v5848_v11, %v5847_v28  ;;  %v5481_v29 = vadd.f32 %v5849_v32, %v2227_v51 }
 0x1f9   : > { %v2968_v27 = vmul.f32 0.5, %v5457_v61  ;;  %v5467_v5 = vadd.f32 %v5394_v21, %v2898_v38  ;;  %v2903_v30 = vmul.f32 %v5380_v58, %v2865_v13  ;;  %v2863_v41 = vadd.f32 %v2760_v34, %v2651_v60  ;;  %v3886_v6 = vpop.f32.mrf.mxu0 }
 0x1fa   : > { %3953 = vtanh.f32 %v2965_v47  ;;  %v2654_v59 = vadd.f32 %v3849_v14, %v2426_v20  ;;  %v2551_v7 = vpop.f32.mrf.mxu1  ;;  %v5484_v16 = vadd.f32 %v5850_v55, %v2225_v26  ;;  %v5492_v17 = vadd.f32 %v5851_v39, %v2228_v46 }
 0x1fb   : > { %3955 = vtanh.f32 %v2968_v27  ;;  %v2966_v33 = vmul.f32 0.5, %v5467_v5  ;;  %v5477_v18 = vadd.f32 %v5394_v21, %v2903_v30  ;;  %v2901_v40 = vmul.f32 %v5380_v58, %v2863_v41  ;;  %v2776_v34 = vpop.f32.mrf.mxu0 }
 0x1fc   : > { %v3944_v12 = vpop.eup %3943  ;;  %v2866_v62 = vadd.f32 %v3883_v23, %v2654_v59  ;;  %v2652_v15 = vadd.f32 %v2551_v7, %v2424_v50  ;;  %v3852_v20 = vpop.f32.mrf.mxu1 }
 0x1fd   : > { %v3027_v56 = vadd.f32 1.0, %v3944_v12  ;;  %3957 = vtanh.f32 %v2966_v33  ;;  %v2971_v38 = vmul.f32 0.5, %v5477_v18  ;;  %v5489_v13 = vadd.f32 %v5394_v21, %v2901_v40  ;;  %v3887_v60 = vpop.f32.mrf.mxu0 }
 0x1fe   : > { %v3946_v44 = vpop.eup %3945  ;;  %v2904_v51 = vmul.f32 %v5380_v58, %v2866_v62  ;;  %v2864_v37 = vadd.f32 %v2763_v2, %v2652_v15  ;;  %v2657_v26 = vadd.f32 %v3852_v20, %v2429_v53  ;;  %v2564_v23 = vpop.f32.mrf.mxu1 }
 0x1ff   : > { %v3059_v50 = vmul.f32 0.5, %v3027_v56  ;;  %v3025_v47 = vadd.f32 1.0, %v3946_v44  ;;  %3959 = vtanh.f32 %v2971_v38  ;;  %v2969_v14 = vmul.f32 0.5, %v5489_v13  ;;  %v2779_v27 = vpop.f32.mrf.mxu0 }
 0x200   : > { %v3948_v30 = vpop.eup %3947  ;;  %v5502_v41 = vadd.f32 %v5394_v21, %v2904_v51  ;;  %v2902_v2 = vmul.f32 %v5380_v58, %v2864_v37  ;;  %v2869_v53 = vadd.f32 %v3886_v6, %v2657_v26  ;;  %v2655_v45 = vadd.f32 %v2564_v23, %v5440_v63  ;;  %v3853_v28 = vpop.f32.mrf.mxu1 }
 0x201   : > { %v3091_v11 = vmul.f32 %v3059_v50, %v5404_v10  ;;  %v3057_v46 = vmul.f32 0.5, %v3025_v47  ;;  %v3028_v59 = vadd.f32 1.0, %v3948_v30  ;;  %3961 = vtanh.f32 %v2969_v14  ;;  %v3890_v7 = vpop.f32.mrf.mxu0 }
 0x202   : > { %v3950_v33 = vpop.eup %3949  ;;  %v2972_v40 = vmul.f32 0.5, %v5502_v41  ;;  %v5509_v12 = vadd.f32 %v5394_v21, %v2902_v2  ;;  %v2907_v32 = vmul.f32 %v5380_v58, %v2869_v53  ;;  %v2867_v55 = vadd.f32 %v2776_v34, %v2655_v45  ;;  %v2567_v6 = vpop.f32.mrf.mxu1 }
 0x203   : > { %3123 = vst [vmem:[%s5499_s17 + $0x10] sm:$0xff] %v3091_v11  ;;  %v3089_v63 = vmul.f32 %v3057_v46, %v5413_v57  ;;  %v3060_v62 = vmul.f32 0.5, %v3028_v59  ;;  %v3026_v10 = vadd.f32 1.0, %v3950_v33  ;;  %v2658_v15 = vadd.f32 %v3853_v28, %v5448_v54  ;;  %v2792_v20 = vpop.f32.mrf.mxu0 }
 0x204   : > { %3963 = vtanh.f32 %v2972_v40  ;;  %v2970_v56 = vmul.f32 0.5, %v5509_v12  ;;  %v5517_v38 = vadd.f32 %v5394_v21, %v2907_v32  ;;  %v2905_v44 = vmul.f32 %v5380_v58, %v2867_v55  ;;  %v3856_v39 = vpop.f32.mrf.mxu1 }
 0x205   : > { %v3952_v34 = vpop.eup %3951  ;;  %3121 = vst [vmem:[%s5499_s17] sm:$0xff] %v3089_v63  ;;  %v3092_v51 = vmul.f32 %v3060_v62, %v5422_v48  ;;  %v3058_v57 = vmul.f32 0.5, %v3026_v10  ;;  %v2870_v37 = vadd.f32 %v3887_v60, %v2658_v15  ;;  %v2656_v26 = vadd.f32 %v2567_v6, %v5471_v8  ;;  %v3891_v54 = vpop.f32.mrf.mxu0 }
 0x206   : > { %v3031_v23 = vadd.f32 1.0, %v3952_v34  ;;  %3965 = vtanh.f32 %v2970_v56  ;;  %v2975_v50 = vmul.f32 0.5, %v5517_v38  ;;  %v5525_v47 = vadd.f32 %v5394_v21, %v2905_v44  ;;  %v2580_v14 = vpop.f32.mrf.mxu1 }
 0x207   : > { %v3954_v30 = vpop.eup %3953  ;;  %3124 = vst [vmem:[%s5499_s17 + $0x18] sm:$0xff] %v3092_v51  ;;  %v3090_v2 = vmul.f32 %v3058_v57, %v5431_v4  ;;  %v2908_v48 = vmul.f32 %v5380_v58, %v2870_v37  ;;  %v2868_v53 = vadd.f32 %v2779_v27, %v2656_v26  ;;  %v2661_v60 = vadd.f32 %v3856_v39, %v5481_v29  ;;  %v2795_v8 = vpop.f32.mrf.mxu0 }
 0x208   : > { %v3956_v45 = vpop.eup %3955  ;;  %v3063_v28 = vmul.f32 0.5, %v3031_v23  ;;  %v3029_v11 = vadd.f32 1.0, %v3954_v30  ;;  %3967 = vtanh.f32 %v2975_v50  ;;  %v2973_v46 = vmul.f32 0.5, %v5525_v47  ;;  %v3857_v59 = vpop.f32.mrf.mxu1 }
 0x209   : > { %3122 = vst [vmem:[%s5499_s17 + $0x8] sm:$0xff] %v3090_v2  ;;  %v3032_v33 = vadd.f32 1.0, %v3956_v45  ;;  %v5534_v40 = vadd.f32 %v5394_v21, %v2908_v48  ;;  %v2906_v4 = vmul.f32 %v5380_v58, %v2868_v53  ;;  %v2873_v32 = vadd.f32 %v3890_v7, %v2661_v60  ;;  %v3894_v27 = vpop.f32.mrf.mxu0 }
 0x20a   : > { %v3958_v55 = vpop.eup %3957  ;;  %v3095_v29 = vmul.f32 %v3063_v28, %v5443_v3  ;;  %v3061_v6 = vmul.f32 0.5, %v3029_v11  ;;  %3969 = vtanh.f32 %v2973_v46  ;;  %v2659_v63 = vadd.f32 %v2580_v14, %v5484_v16  ;;  %v2583_v62 = vpop.f32.mrf.mxu1 }
 0x20b   : > { %v3064_v10 = vmul.f32 0.5, %v3032_v33  ;;  %v3030_v15 = vadd.f32 1.0, %v3958_v55  ;;  %v2976_v56 = vmul.f32 0.5, %v5534_v40  ;;  %v5541_v44 = vadd.f32 %v5394_v21, %v2906_v4  ;;  %v2808_v39 = vpop.f32.mrf.mxu0 }
 0x20c   : > { %v3960_v34 = vpop.eup %3959  ;;  %3127 = vst [vmem:[%s5499_s17 + $0x30] sm:$0xff] %v3095_v29  ;;  %v3093_v7 = vmul.f32 %v3061_v6, %v5454_v9  ;;  %v2911_v3 = vmul.f32 %v5380_v58, %v2873_v32  ;;  %v2871_v51 = vadd.f32 %v2792_v20, %v2659_v63  ;;  %v2662_v16 = vadd.f32 %v3857_v59, %v5492_v17  ;;  %v3860_v57 = vpop.f32.mrf.mxu1 }
 0x20d   : > { %v3096_v37 = vmul.f32 %v3064_v10, %v5457_v61  ;;  %v3062_v26 = vmul.f32 0.5, %v3030_v15  ;;  %v3035_v23 = vadd.f32 1.0, %v3960_v34  ;;  %3971 = vtanh.f32 %v2976_v56  ;;  %v3895_v50 = vpop.f32.mrf.mxu0 }
 0x20e   : > { %v3962_v14 = vpop.eup %3961  ;;  %3125 = vst [vmem:[%s5499_s17 + $0x20] sm:$0xff] %v3093_v7  ;;  %v2974_v30 = vmul.f32 0.5, %v5541_v44  ;;  %v5551_v2 = vadd.f32 %v5394_v21, %v2911_v3  ;;  %v2909_v9 = vmul.f32 %v5380_v58, %v2871_v51  ;;  %v2874_v20 = vadd.f32 %v3891_v54, %v2662_v16  ;;  %v2596_v48 = vpop.f32.mrf.mxu1 }
 0x20f   : > { %3128 = vst [vmem:[%s5499_s17 + $0x38] sm:$0xff] %v3096_v37  ;;  %v3094_v17 = vmul.f32 %v3062_v26, %v5467_v5  ;;  %v3067_v61 = vmul.f32 0.5, %v3035_v23  ;;  %v3033_v53 = vadd.f32 1.0, %v3962_v14  ;;  %v2660_v60 = vadd.f32 %v2583_v62, %v5327_v42  ;;  %v2811_v45 = vpop.f32.mrf.mxu0 }
 0x210   : > { %3973 = vtanh.f32 %v2974_v30  ;;  %v2979_v28 = vmul.f32 0.5, %v5551_v2  ;;  %v5559_v11 = vadd.f32 %v5394_v21, %v2909_v9  ;;  %v2912_v46 = vmul.f32 %v5380_v58, %v2874_v20  ;;  %v3861_v59 = vpop.f32.mrf.mxu1 }
 0x211   : > { %v3964_v54 = vpop.eup %3963  ;;  %3126 = vst [vmem:[%s5499_s17 + $0x28] sm:$0xff] %v3094_v17  ;;  %v3099_v33 = vmul.f32 %v3067_v61, %v5477_v18  ;;  %v3065_v5 = vmul.f32 0.5, %v3033_v53  ;;  %v2872_v4 = vadd.f32 %v2795_v8, %v2660_v60  ;;  %v2665_v32 = vadd.f32 %v3860_v57, %v5330_v22  ;;  %v3898_v42 = vpop.f32.mrf.mxu0 }
 0x212   : > { %v3036_v55 = vadd.f32 1.0, %v3964_v54  ;;  %3975 = vtanh.f32 %v2979_v28  ;;  %v2977_v29 = vmul.f32 0.5, %v5559_v11  ;;  %v5567_v6 = vadd.f32 %v5394_v21, %v2912_v46  ;;  %v2599_v63 = vpop.f32.mrf.mxu1 }
 0x213   : > { %v3966_v62 = vpop.eup %3965  ;;  %3131 = vst [vmem:[%s5499_s17 + $0x50] sm:$0xff] %v3099_v33  ;;  %v3097_v10 = vmul.f32 %v3065_v5, %v5489_v13  ;;  %v2910_v18 = vmul.f32 %v5380_v58, %v2872_v4  ;;  %v2877_v15 = vadd.f32 %v3894_v27, %v2665_v32  ;;  %v2663_v8 = vadd.f32 %v2596_v48, %v5333_v19  ;;  %v2824_v22 = vpop.f32.mrf.mxu0 }
 0x214   : > { %v3068_v56 = vmul.f32 0.5, %v3036_v55  ;;  %v3034_v34 = vadd.f32 1.0, %v3966_v62  ;;  %3977 = vtanh.f32 %v2977_v29  ;;  %v2980_v7 = vmul.f32 0.5, %v5567_v6  ;;  %v3864_v3 = vpop.f32.mrf.mxu1 }
 0x215   : > { %v3968_v51 = vpop.eup %3967  ;;  %3129 = vst [vmem:[%s5499_s17 + $0x40] sm:$0xff] %v3097_v10  ;;  %v5576_v16 = vadd.f32 %v5394_v21, %v2910_v18  ;;  %v2915_v13 = vmul.f32 %v5380_v58, %v2877_v15  ;;  %v2875_v57 = vadd.f32 %v2808_v39, %v2663_v8  ;;  %v2666_v27 = vadd.f32 %v3861_v59, %v5336_v35  ;;  %v3899_v17 = vpop.f32.mrf.mxu0 }
 0x216   : > { %v3100_v19 = vmul.f32 %v3068_v56, %v5502_v41  ;;  %v3066_v37 = vmul.f32 0.5, %v3034_v34  ;;  %v3039_v26 = vadd.f32 1.0, %v3968_v51  ;;  %3979 = vtanh.f32 %v2980_v7  ;;  %v2612_v23 = vpop.f32.mrf.mxu1 }
 0x217   : > { %v3970_v14 = vpop.eup %3969  ;;  %v2978_v30 = vmul.f32 0.5, %v5576_v16  ;;  %v5583_v9 = vadd.f32 %v5394_v21, %v2915_v13  ;;  %v2913_v20 = vmul.f32 %v5380_v58, %v2875_v57  ;;  %v2878_v48 = vadd.f32 %v3895_v50, %v2666_v27  ;;  %v2827_v55 = vpop.f32.mrf.mxu0 }
 0x218   : > { %3132 = vst [vmem:[%s5499_s17 + $0x58] sm:$0xff] %v3100_v19  ;;  %v3098_v35 = vmul.f32 %v3066_v37, %v5509_v12  ;;  %v3071_v39 = vmul.f32 0.5, %v3039_v26  ;;  %v3037_v41 = vadd.f32 1.0, %v3970_v14  ;;  %v2664_v61 = vadd.f32 %v2599_v63, %v5339_v31  ;;  %v3865_v53 = vpop.f32.mrf.mxu1 }
 0x219   : > { %3981 = vtanh.f32 %v2978_v30  ;;  %v2983_v60 = vmul.f32 0.5, %v5583_v9  ;;  %v5591_v28 = vadd.f32 %v5394_v21, %v2913_v20  ;;  %v2916_v46 = vmul.f32 %v5380_v58, %v2878_v48  ;;  %v3902_v51 = vpop.f32.mrf.mxu0 }
 0x21a   : > { %v3972_v59 = vpop.eup %3971  ;;  %3130 = vst [vmem:[%s5499_s17 + $0x48] sm:$0xff] %v3098_v35  ;;  %v3103_v50 = vmul.f32 %v3071_v39, %v5517_v38  ;;  %v3069_v54 = vmul.f32 0.5, %v3037_v41  ;;  %v2876_v12 = vadd.f32 %v2811_v45, %v2664_v61  ;;  %v2669_v33 = vadd.f32 %v3864_v3, %v5342_v52  ;;  %v2615_v5 = vpop.f32.mrf.mxu1 }
 0x21b   : > { %v3040_v31 = vadd.f32 1.0, %v3972_v59  ;;  %3983 = vtanh.f32 %v2983_v60  ;;  %v2981_v4 = vmul.f32 0.5, %v5591_v28  ;;  %v5599_v32 = vadd.f32 %v5394_v21, %v2916_v46  ;;  %v2840_v41 = vpop.f32.mrf.mxu0 }
 0x21c   : > { %3135 = vst [vmem:[%s5499_s17 + $0x70] sm:$0xff] %v3103_v50  ;;  %v3101_v29 = vmul.f32 %v3069_v54, %v5525_v47  ;;  %v2914_v63 = vmul.f32 %v5380_v58, %v2876_v12  ;;  %v2881_v38 = vadd.f32 %v3898_v42, %v2669_v33  ;;  %v2667_v45 = vadd.f32 %v2612_v23, %v5345_v36  ;;  %v3868_v62 = vpop.f32.mrf.mxu1 }
 0x21d   : > { %v3974_v52 = vpop.eup %3973  ;;  %v3072_v10 = vmul.f32 0.5, %v3040_v31  ;;  %3985 = vtanh.f32 %v2981_v4  ;;  %v2984_v18 = vmul.f32 0.5, %v5599_v32  ;;  %v2670_v15 = vadd.f32 %v3865_v53, %v5348_v49 }
 0x21e   : > { %3133 = vst [vmem:[%s5499_s17 + $0x60] sm:$0xff] %v3101_v29  ;;  %v3038_v8 = vadd.f32 1.0, %v3974_v52  ;;  %v5609_v56 = vadd.f32 %v5394_v21, %v2914_v63  ;;  %v2919_v47 = vmul.f32 %v5380_v58, %v2881_v38  ;;  %v2879_v34 = vadd.f32 %v2824_v22, %v2667_v45  ;;  %v2628_v13 = vpop.f32.mrf.mxu1  ;;  %v3903_v29 = vpop.f32.mrf.mxu0 }
 0x21f   : > { %v3976_v42 = vpop.eup %3975  ;;  %v3104_v36 = vmul.f32 %v3072_v10, %v5534_v40  ;;  %3987 = vtanh.f32 %v2984_v18  ;;  %v2882_v7 = vadd.f32 %v3899_v17, %v2670_v15  ;;  %v2668_v3 = vadd.f32 %v2615_v5, %v5351_v1 }
 0x220   : > { %v3070_v57 = vmul.f32 0.5, %v3038_v8  ;;  %v3043_v49 = vadd.f32 1.0, %v3976_v42  ;;  %v2982_v27 = vmul.f32 0.5, %v5609_v56  ;;  %v5616_v19 = vadd.f32 %v5394_v21, %v2919_v47  ;;  %v3869_v61 = vpop.f32.mrf.mxu1 }
 0x221   : > { %v3978_v37 = vpop.eup %3977  ;;  %3136 = vst [vmem:[%s5499_s17 + $0x78] sm:$0xff] %v3104_v36  ;;  %v2917_v22 = vmul.f32 %v5380_v58, %v2879_v34  ;;  %v2920_v40 = vmul.f32 %v5380_v58, %v2882_v7  ;;  %v2880_v26 = vadd.f32 %v2827_v55, %v2668_v3  ;;  %v2673_v23 = vadd.f32 %v3868_v62, %v5356_v25  ;;  %v2843_v36 = vpop.f32.mrf.mxu0 }
 0x222   : > { %v3102_v1 = vmul.f32 %v3070_v57, %v5541_v44  ;;  %v3075_v14 = vmul.f32 0.5, %v3043_v49  ;;  %v3041_v30 = vadd.f32 1.0, %v3978_v37  ;;  %3989 = vtanh.f32 %v2982_v27  ;;  %v2631_v63 = vpop.f32.mrf.mxu1 }
 0x223   : > { %v3980_v20 = vpop.eup %3979  ;;  %v2987_v48 = vmul.f32 0.5, %v5616_v19  ;;  %v5625_v17 = vadd.f32 %v5394_v21, %v2917_v22  ;;  %v5628_v35 = vadd.f32 %v5394_v21, %v2920_v40  ;;  %v2918_v39 = vmul.f32 %v5380_v58, %v2880_v26 }
 0x224   : > { %3134 = vst [vmem:[%s5499_s17 + $0x68] sm:$0xff] %v3102_v1  ;;  %v3107_v25 = vmul.f32 %v3075_v14, %v5551_v2  ;;  %v3073_v44 = vmul.f32 0.5, %v3041_v30  ;;  %v3044_v53 = vadd.f32 1.0, %v3980_v20  ;;  %v2885_v60 = vadd.f32 %v3902_v51, %v2673_v23 }
 0x225   : > { %3991 = vtanh.f32 %v2987_v48  ;;  %v2985_v46 = vmul.f32 0.5, %v5625_v17  ;;  %v2988_v59 = vmul.f32 0.5, %v5628_v35  ;;  %v5636_v50 = vadd.f32 %v5394_v21, %v2918_v39 }
 0x226   : > { %v3982_v54 = vpop.eup %3981  ;;  %3139 = vst [vmem:[%s5499_s17 + $0x90] sm:$0xff] %v3107_v25  ;;  %v3105_v12 = vmul.f32 %v3073_v44, %v5559_v11  ;;  %v3076_v33 = vmul.f32 0.5, %v3044_v53  ;;  %v2923_v5 = vmul.f32 %v5380_v58, %v2885_v60  ;;  %v2671_v2 = vadd.f32 %v2628_v13, %v5361_v0 }
 0x227   : > { %v3042_v31 = vadd.f32 1.0, %v3982_v54  ;;  %3993 = vtanh.f32 %v2985_v46  ;;  %v2986_v4 = vmul.f32 0.5, %v5636_v50  ;;  %v2674_v55 = vadd.f32 %v3869_v61, %v5367_v43 }
 0x228   : > { %v3984_v38 = vpop.eup %3983  ;;  %3137 = vst [vmem:[%s5499_s17 + $0x80] sm:$0xff] %v3105_v12  ;;  %v3108_v45 = vmul.f32 %v3076_v33, %v5567_v6  ;;  %3995 = vtanh.f32 %v2988_v59  ;;  %v5647_v11 = vadd.f32 %v5394_v21, %v2923_v5  ;;  %v2883_v62 = vadd.f32 %v2840_v41, %v2671_v2 }
 0x229   : > { %v3074_v52 = vmul.f32 0.5, %v3042_v31  ;;  %v3047_v0 = vadd.f32 1.0, %v3984_v38  ;;  %3997 = vtanh.f32 %v2986_v4  ;;  %v2886_v10 = vadd.f32 %v3903_v29, %v2674_v55 }
 0x22a   : > { %v3986_v18 = vpop.eup %3985  ;;  %3140 = vst [vmem:[%s5499_s17 + $0x98] sm:$0xff] %v3108_v45  ;;  %v2991_v43 = vmul.f32 0.5, %v5647_v11  ;;  %v2921_v15 = vmul.f32 %v5380_v58, %v2883_v62  ;;  %v2672_v8 = vadd.f32 %v2631_v63, %v5373_v24 }
 0x22b   : > { %v3106_v6 = vmul.f32 %v3074_v52, %v5576_v16  ;;  %v3079_v47 = vmul.f32 0.5, %v3047_v0  ;;  %v3045_v34 = vadd.f32 1.0, %v3986_v18  ;;  %v2924_v42 = vmul.f32 %v5380_v58, %v2886_v10 }
 0x22c   : > { %v3988_v7 = vpop.eup %3987  ;;  %3999 = vtanh.f32 %v2991_v43  ;;  %v2957_v3 = vadd.f32 %v5394_v21, %v2921_v15  ;;  %v2884_v51 = vadd.f32 %v2843_v36, %v2672_v8 }
 0x22d   : > { %3138 = vst [vmem:[%s5499_s17 + $0x88] sm:$0xff] %v3106_v6  ;;  %v3111_v13 = vmul.f32 %v3079_v47, %v5583_v9  ;;  %v3077_v57 = vmul.f32 0.5, %v3045_v34  ;;  %v3048_v49 = vadd.f32 1.0, %v3988_v7  ;;  %v2960_v24 = vadd.f32 %v5394_v21, %v2924_v42 }
 0x22e   : > { %v2989_v16 = vmul.f32 0.5, %v2957_v3  ;;  %v2922_v27 = vmul.f32 %v5380_v58, %v2884_v51 }
 0x22f   : > { %v3990_v37 = vpop.eup %3989  ;;  %3143 = vst [vmem:[%s5499_s17 + $0xb0] sm:$0xff] %v3111_v13  ;;  %v3109_v22 = vmul.f32 %v3077_v57, %v5591_v28  ;;  %v3080_v40 = vmul.f32 0.5, %v3048_v49  ;;  %v2992_v26 = vmul.f32 0.5, %v2960_v24 }
 0x230   : > { %v3046_v23 = vadd.f32 1.0, %v3990_v37  ;;  %4001 = vtanh.f32 %v2989_v16  ;;  %v2958_v1 = vadd.f32 %v5394_v21, %v2922_v27 }
 0x231   : > { %3141 = vst [vmem:[%s5499_s17 + $0xa0] sm:$0xff] %v3109_v22  ;;  %v3112_v9 = vmul.f32 %v3080_v40, %v5599_v32  ;;  %4003 = vtanh.f32 %v2992_v26 }
 0x232   : > { %v3992_v14 = vpop.eup %3991  ;;  %v3078_v30 = vmul.f32 0.5, %v3046_v23  ;;  %v2990_v20 = vmul.f32 0.5, %v2958_v1 }
 0x233   : > { %3144 = vst [vmem:[%s5499_s17 + $0xb8] sm:$0xff] %v3112_v9  ;;  %v3051_v58 = vadd.f32 1.0, %v3992_v14 }
 0x234   : > { %v3994_v48 = vpop.eup %3993  ;;  %v3110_v28 = vmul.f32 %v3078_v30, %v5609_v56  ;;  %4005 = vtanh.f32 %v2990_v20 }
 0x235   : > { %v3996_v39 = vpop.eup %3995  ;;  %v3083_v41 = vmul.f32 0.5, %v3051_v58  ;;  %v3049_v61 = vadd.f32 1.0, %v3994_v48 }
 0x236   : > { %v3998_v21 = vpop.eup %3997  ;;  %3142 = vst [vmem:[%s5499_s17 + $0xa8] sm:$0xff] %v3110_v28  ;;  %v3052_v25 = vadd.f32 1.0, %v3996_v39 }
 0x237   : > { %v3115_v32 = vmul.f32 %v3083_v41, %v5616_v19  ;;  %v3081_v44 = vmul.f32 0.5, %v3049_v61  ;;  %v3050_v53 = vadd.f32 1.0, %v3998_v21 }
 0x238   : > { %v3084_v60 = vmul.f32 0.5, %v3052_v25 }
 0x239   : > { %v4000_v46 = vpop.eup %3999  ;;  %3147 = vst [vmem:[%s5499_s17 + $0xd0] sm:$0xff] %v3115_v32  ;;  %v3113_v56 = vmul.f32 %v3081_v44, %v5625_v17  ;;  %v3082_v59 = vmul.f32 0.5, %v3050_v53 }
 0x23a   : > { %v3116_v54 = vmul.f32 %v3084_v60, %v5628_v35  ;;  %v3055_v12 = vadd.f32 1.0, %v4000_v46 }
 0x23b   : > { %3145 = vst [vmem:[%s5499_s17 + $0xc0] sm:$0xff] %v3113_v56  ;;  %v3114_v33 = vmul.f32 %v3082_v59, %v5636_v50 }
 0x23c   : > { %3148 = vst [vmem:[%s5499_s17 + $0xd8] sm:$0xff] %v3116_v54  ;;  %v3087_v5 = vmul.f32 0.5, %v3055_v12 }
 0x23d   : > { %v4002_v19 = vpop.eup %4001  ;;  %3146 = vst [vmem:[%s5499_s17 + $0xc8] sm:$0xff] %v3114_v33 }
 0x23e   : > { %v4004_v2 = vpop.eup %4003  ;;  %v3119_v31 = vmul.f32 %v3087_v5, %v5647_v11  ;;  %v3053_v4 = vadd.f32 1.0, %v4002_v19 }
 0x23f   : > { %v3056_v55 = vadd.f32 1.0, %v4004_v2 }
 0x240   : > { %3151 = vst [vmem:[%s5499_s17 + $0xf0] sm:$0xff] %v3119_v31  ;;  %v3085_v17 = vmul.f32 0.5, %v3053_v4 }
 0x241   : > { %v4006_v29 = vpop.eup %4005  ;;  %v3088_v35 = vmul.f32 0.5, %v3056_v55 }
 0x242   : > { %v3117_v63 = vmul.f32 %v3085_v17, %v2957_v3  ;;  %v3054_v38 = vadd.f32 1.0, %v4006_v29 }
 0x243   : > { %v3120_v45 = vmul.f32 %v3088_v35, %v2960_v24 }
 0x244   : > { %3149 = vst [vmem:[%s5499_s17 + $0xe0] sm:$0xff] %v3117_v63  ;;  %v3086_v50 = vmul.f32 0.5, %v3054_v38 }
 0x245   : > { %3152 = vst [vmem:[%s5499_s17 + $0xf8] sm:$0xff] %v3120_v45 }
 0x246   : > { %v3118_v62 = vmul.f32 %v3086_v50, %v2958_v1 }
 0x248   : > { %3150 = vst [vmem:[%s5499_s17 + $0xe8] sm:$0xff] %v3118_v62 }
 0x249 PF: > { %s13_s12 = sadd.s32 1, %s4013_s12  }
 0x24a   : > { %p10_p4 = scmp.ge.s32.totalorder %s13_s12, 4  }
 0x24c   :  { %12 = sbr.rel (!%p10_p4) target bundleno = 1 (0x1), region = 70 }

</bundles_post_ra>
